<compile_context>
chip_gen: v5e
topology: v5e:2x2
jax: 0.10.0
libtpu: 0.0.40
codegen_flags: <defaults>
</compile_context>

<pallas_src>
import functools

import numpy as np
import jax
import jax.numpy as jnp
from jax.experimental import pallas as pl
from jax.experimental.pallas import tpu as pltpu


# ----------------------------------------------------------------------------
# Pallas kernel: fused Conv1d + MaxPool1d + 2-layer LSTM + Linear
# ----------------------------------------------------------------------------
def _lstm_model_kernel(x2_ref, wc_ref, cb_ref,
                       wix_ref, bx_ref, whx_ref,
                       wiy_ref, why_ref, by_ref,
                       wl_ref, bl_ref, out_ref,
                       gx_scr, h1_scr, gy_scr, h2_scr,
                       *, seq_len, channels, ksize):
    S, CP, K = seq_len, channels, ksize          # CP = channels padded to 8 sublanes
    SCP, Dp = x2_ref.shape                       # x2: (S*CP, D+2), conv-zero-padded rows (s, cp)
    D = Dp - 2
    Lc = D - 1                                   # Conv1d(k=4, pad=1) output length
    H1 = whx_ref.shape[0]                        # 128
    HP = why_ref.shape[0]                        # 128 = layer-2 hidden padded to a lane slab (real 64)
    f32 = jnp.float32
    bf16 = jnp.bfloat16

    # ---------------- hoisted, non-recurrent stage (runs once for all S) ------
    x2 = x2_ref[...]                                                     # (SCP, D+2) f32
    # im2col: rows indexed by (k, s, c_in); one f32 MXU push replaces S*K tiny ones.
    xcol = jnp.concatenate([x2[:, k:k + Lc] for k in range(K)], axis=0)  # (K*SCP, Lc)
    conv = jnp.dot(wc_ref[...], xcol, preferred_element_type=f32) + cb_ref[...]   # (SCP, Lc)

    # MaxPool1d(kernel=2, stride=1, padding=1); -inf padding == edge copy.
    mid = jnp.maximum(conv[:, :-1], conv[:, 1:])                         # (SCP, Lc-1)
    pool = jnp.concatenate([conv[:, :1], mid, conv[:, -1:]], axis=1)     # (SCP, D)

    # Layer-1 input projection for all timesteps at once (f32, hoisted, -> VMEM scratch).
    gx_scr[...] = jnp.dot(pool, wix_ref[...], preferred_element_type=f32) + bx_ref[...]

    # ---------------- layer-1 recurrence (one dependent matmul per step) ------
    whx = whx_ref[...]                     # (H1, 4*H1) bf16, held resident across the unroll
    h1 = jnp.zeros((CP, H1), f32)
    c1 = jnp.zeros((CP, H1), f32)
    for s in range(S):                     # S is small and static -> unrolled
        g1 = gx_scr[s * CP:(s + 1) * CP, :] + jnp.dot(
            h1.astype(bf16), whx, preferred_element_type=f32)            # (CP, 4*H1)
        # gate layout is (i | f | o | g): one wide sigmoid + one tanh per step
        sg = jax.nn.sigmoid(g1[:, :3 * H1])
        gg = jnp.tanh(g1[:, 3 * H1:])
        c1 = sg[:, H1:2 * H1] * c1 + sg[:, :H1] * gg
        h1 = sg[:, 2 * H1:3 * H1] * jnp.tanh(c1)
        h1_scr[s * CP:(s + 1) * CP, :] = h1                              # sublane-aligned (CP, H1) tile

    # ---------------- hoisted layer-2 input projection (one big matmul) -------
    gy_scr[...] = jnp.dot(h1_scr[...], wiy_ref[...],
                          preferred_element_type=f32) + by_ref[...]      # (SCP, 4*HP)

    # ---------------- layer-2 recurrence ---------------------------------------
    why = why_ref[...]                     # (HP, 4*HP) bf16, held resident
    h2 = jnp.zeros((CP, HP), f32)          # lanes [64,128) provably stay exactly 0
    c2 = jnp.zeros((CP, HP), f32)
    for s in range(S):
        g2 = gy_scr[s * CP:(s + 1) * CP, :] + jnp.dot(
            h2.astype(bf16), why, preferred_element_type=f32)            # (CP, 4*HP)
        sg = jax.nn.sigmoid(g2[:, :3 * HP])
        gg = jnp.tanh(g2[:, 3 * HP:])
        c2 = sg[:, HP:2 * HP] * c2 + sg[:, :HP] * gg                     # pad lanes: 0.5*0 + 0.5*0 = 0
        h2 = sg[:, 2 * HP:3 * HP] * jnp.tanh(c2)                         # pad lanes: 0.5*tanh(0) = 0
        h2_scr[s * CP:(s + 1) * CP, :] = h2

    # ---------------- hoisted epilogue: Linear(64->1) as VPU mul + lane reduce -
    out_ref[...] = (jnp.sum(h2_scr[...] * wl_ref[...], axis=-1, keepdims=True)
                    + bl_ref[...])                                       # (SCP, 1)


# ----------------------------------------------------------------------------
# One-time parameter packing (layout plumbing hoisted out of the forward call)
# ----------------------------------------------------------------------------
_GATE_PERM = np.array([0, 1, 3, 2])       # PyTorch (i, f, g, o) -> (i, f, o, g)


def pack_params(p, seq_len):
    S = seq_len
    C, _, K = p["conv_w"].shape
    D = p["w_ih_x"].shape[1]
    H1 = p["w_hh_x"].shape[1]
    H2 = p["w_hh_y"].shape[1]
    CP = 8                                # pad LSTM batch (channels) to a full sublane tile
    HP = 128                              # pad each layer-2 gate to a full 128-lane slab
    SCP = S * CP
    f32, bf16 = jnp.float32, jnp.bfloat16

    # Conv weight padded to CP in/out channels, block-diagonal im2col layout:
    # wc[s*CP+o, k*SCP + s*CP + i] = conv_w[o, i, k]   (zero for padded o or i)
    cw = jnp.pad(p["conv_w"], ((0, CP - C), (0, CP - C), (0, 0)))
    eye_s = jnp.eye(S, dtype=f32)
    wc = jnp.concatenate([jnp.kron(eye_s, cw[:, :, k]) for k in range(K)], axis=1)  # (SCP, K*SCP)
    cb = jnp.tile(jnp.pad(p["conv_b"], (0, CP - C)), S).reshape(SCP, 1)              # (SCP, 1)

    def reorder(w, h):                     # (R, 4h) gate cols i,f,g,o -> i,f,o,g
        r = w.shape[0]
        return w.reshape(r, 4, h)[:, _GATE_PERM, :].reshape(r, 4 * h)

    def reorder_pad(w, h, hp):             # reorder + pad each gate slab to hp lanes
        r = w.shape[0]
        w4 = w.reshape(r, 4, h)[:, _GATE_PERM, :]
        return jnp.pad(w4, ((0, 0), (0, 0), (0, hp - h))).reshape(r, 4 * hp)

    wix = reorder(p["w_ih_x"].T, H1)                                               # (D, 4*H1) f32
    bx = reorder((p["b_ih_x"] + p["b_hh_x"]).reshape(1, 4 * H1), H1)               # (1, 4*H1)
    whx = reorder(p["w_hh_x"].T, H1).astype(bf16)                                  # (H1, 4*H1) bf16

    wiy = reorder_pad(p["w_ih_y"].T, H2, HP)                                       # (H1, 4*HP) f32
    why = jnp.pad(reorder_pad(p["w_hh_y"].T, H2, HP),
                  ((0, HP - H2), (0, 0))).astype(bf16)                             # (HP, 4*HP) bf16
    by = reorder_pad((p["b_ih_y"] + p["b_hh_y"]).reshape(1, 4 * H2), H2, HP)       # (1, 4*HP)
    wl = jnp.pad(p["lin_w"], ((0, 0), (0, HP - H2)))                               # (1, HP) row
    bl = p["lin_b"].reshape(1, 1)

    return dict(wc=wc, cb=cb, wix=wix, bx=bx, whx=whx,
                wiy=wiy, why=why, by=by, wl=wl, bl=bl)


# ----------------------------------------------------------------------------
# Wrapper: per-call glue (input padding) + pallas_call
# ----------------------------------------------------------------------------
def lstm_forecast_forward(x, packed):
    S, C, D = x.shape
    SCP = packed["wc"].shape[0]
    CP = SCP // S
    K = packed["wc"].shape[1] // SCP
    H1 = packed["whx"].shape[0]
    HP = packed["why"].shape[0]
    f32 = jnp.float32

    # pad channels (LSTM batch) to CP with zero rows + conv zero-pad D; flatten to (S*CP, D+2)
    x2 = jnp.pad(x, ((0, 0), (0, CP - C), (1, 1))).reshape(SCP, D + 2)

    vmem = pl.BlockSpec(memory_space=pltpu.MemorySpace.VMEM)
    kernel = functools.partial(_lstm_model_kernel, seq_len=S, channels=CP, ksize=K)
    out = pl.pallas_call(
        kernel,
        out_shape=jax.ShapeDtypeStruct((SCP, 1), f32),
        in_specs=[vmem] * 11,
        out_specs=vmem,
        scratch_shapes=[
            pltpu.VMEM((SCP, 4 * H1), f32),   # gx_all : layer-1 input projections
            pltpu.VMEM((SCP, H1), f32),       # h1 stack
            pltpu.VMEM((SCP, 4 * HP), f32),   # gy_all : layer-2 input projections
            pltpu.VMEM((SCP, HP), f32),       # h2 stack
        ],
    )(x2, packed["wc"], packed["cb"], packed["wix"], packed["bx"], packed["whx"],
      packed["wiy"], packed["why"], packed["by"], packed["wl"], packed["bl"])

    # drop padded channel rows, restore (s, c) row order; == out.view(-1)
    return out.reshape(S, CP)[:, :C].reshape(-1)


# ----------------------------------------------------------------------------
# Deterministic parameter init (PyTorch-like uniform scales)
# ----------------------------------------------------------------------------
def _uniform(key, shape, scale):
    return jax.random.uniform(key, shape, jnp.float32, -scale, scale)


def init_params(input_dim, batch_size_param, key):
    C = batch_size_param // input_dim
    K, H1, H2 = 4, 128, 64
    ks = jax.random.split(key, 12)
    k_conv = 1.0 / np.sqrt(C * K)
    k1 = 1.0 / np.sqrt(H1)
    k2 = 1.0 / np.sqrt(H2)
    return dict(
        conv_w=_uniform(ks[0], (C, C, K), k_conv),
        conv_b=_uniform(ks[1], (C,), k_conv),
        w_ih_x=_uniform(ks[2], (4 * H1, input_dim), k1),
        w_hh_x=_uniform(ks[3], (4 * H1, H1), k1),
        b_ih_x=_uniform(ks[4], (4 * H1,), k1),
        b_hh_x=_uniform(ks[5], (4 * H1,), k1),
        w_ih_y=_uniform(ks[6], (4 * H2, H1), k2),
        w_hh_y=_uniform(ks[7], (4 * H2, H2), k2),
        b_ih_y=_uniform(ks[8], (4 * H2,), k2),
        b_hh_y=_uniform(ks[9], (4 * H2,), k2),
        lin_w=_uniform(ks[10], (1, H2), k2),
        lin_b=_uniform(ks[11], (1,), k2),
    )


# ----------------------------------------------------------------------------
# Pure-JAX reference (for correctness check); uses original PyTorch gate order
# ----------------------------------------------------------------------------
def reference_forward(x, p):
    hi = jax.lax.Precision.HIGHEST
    conv = jax.lax.conv_general_dilated(
        x, p["conv_w"], window_strides=(1,), padding=[(1, 1)],
        dimension_numbers=("NCH", "OIH", "NCH"), precision=hi)
    conv = conv + p["conv_b"][None, :, None]
    convp = jnp.pad(conv, ((0, 0), (0, 0), (1, 1)), constant_values=-jnp.inf)
    pool = jnp.maximum(convp[:, :, :-1], convp[:, :, 1:])          # (S, C, D)

    def run_lstm(seq, w_ih, w_hh, b_ih, b_hh):
        H = w_hh.shape[1]
        B = seq.shape[1]
        h = jnp.zeros((B, H), jnp.float32)
        c = jnp.zeros((B, H), jnp.float32)
        outs = []
        for s in range(seq.shape[0]):
            g = (jnp.dot(seq[s], w_ih.T, precision=hi)
                 + jnp.dot(h, w_hh.T, precision=hi) + b_ih + b_hh)
            i = jax.nn.sigmoid(g[:, :H])
            f = jax.nn.sigmoid(g[:, H:2 * H])
            gg = jnp.tanh(g[:, 2 * H:3 * H])
            o = jax.nn.sigmoid(g[:, 3 * H:])
            c = f * c + i * gg
            h = o * jnp.tanh(c)
            outs.append(h)
        return jnp.stack(outs, axis=0)

    h1 = run_lstm(pool, p["w_ih_x"], p["w_hh_x"], p["b_ih_x"], p["b_hh_x"])
    h2 = run_lstm(h1, p["w_ih_y"], p["w_hh_y"], p["b_ih_y"], p["b_hh_y"])
    out = jnp.dot(h2.reshape(-1, h2.shape[-1]), p["lin_w"].T, precision=hi) + p["lin_b"]
    return out.reshape(-1)


if __name__ == "__main__":
    input_dim = 8
    batch_size_param = 32          # -> channels = 4
    seq_len = 8
    channels = batch_size_param // input_dim

    key = jax.random.PRNGKey(0)
    kx, kp = jax.random.split(key)
    x = jax.random.normal(kx, (seq_len, channels, input_dim), jnp.float32)
    params = init_params(input_dim, batch_size_param, kp)

    # Parameter packing happens ONCE (model-load time), not per forward call.
    packed = jax.tree_util.tree_map(jax.block_until_ready, pack_params(params, seq_len))

    out = jax.jit(lstm_forecast_forward)(x, packed)
    out = jax.block_until_ready(out)

    ref = reference_forward(x, params)
    # Tolerance accounts for bf16 recurrent-weight MXU operands (f32 accumulation,
    # f32 gate math; conv / input projections / final Linear are full f32).
    np.testing.assert_allclose(np.asarray(out), np.asarray(ref), rtol=3e-2, atol=5e-3)
    assert out.shape == (seq_len * channels,)

    print("KERNEL_OK")
</pallas_src>

<mosaic_0001>
module attributes {stable_mosaic.version = 11 : i64} {
  func.func @_lstm_model_kernel(%arg0: memref<64x10xf32, #tpu.memory_space<vmem>>, %arg1: memref<64x256xf32, #tpu.memory_space<vmem>>, %arg2: memref<64x1xf32, #tpu.memory_space<vmem>>, %arg3: memref<8x512xf32, #tpu.memory_space<vmem>>, %arg4: memref<1x512xf32, #tpu.memory_space<vmem>>, %arg5: memref<128x512xbf16, #tpu.memory_space<vmem>>, %arg6: memref<128x512xf32, #tpu.memory_space<vmem>>, %arg7: memref<128x512xbf16, #tpu.memory_space<vmem>>, %arg8: memref<1x512xf32, #tpu.memory_space<vmem>>, %arg9: memref<1x128xf32, #tpu.memory_space<vmem>>, %arg10: memref<1x1xf32, #tpu.memory_space<vmem>>, %arg11: memref<64x1xf32, #tpu.memory_space<vmem>>, %arg12: memref<64x512xf32, #tpu.memory_space<vmem>>, %arg13: memref<64x128xf32, #tpu.memory_space<vmem>>, %arg14: memref<64x512xf32, #tpu.memory_space<vmem>>, %arg15: memref<64x128xf32, #tpu.memory_space<vmem>>) attributes {dimension_semantics = [], scalar_prefetch = 0 : i64, scratch_operands = 4 : i64, tpu.core_type = #tpu.core_type<tc>} {
    %c0 = arith.constant 0 : index
    %c0_0 = arith.constant 0 : index
    %0 = vector.load %arg0[%c0, %c0_0] : memref<64x10xf32, #tpu.memory_space<vmem>>, vector<64x10xf32>
    %1 = vector.extract_strided_slice %0 {offsets = [0, 0], sizes = [64, 7], strides = [1, 1]} : vector<64x10xf32> to vector<64x7xf32>
    %2 = vector.extract_strided_slice %0 {offsets = [0, 1], sizes = [64, 7], strides = [1, 1]} : vector<64x10xf32> to vector<64x7xf32>
    %3 = vector.extract_strided_slice %0 {offsets = [0, 2], sizes = [64, 7], strides = [1, 1]} : vector<64x10xf32> to vector<64x7xf32>
    %4 = vector.extract_strided_slice %0 {offsets = [0, 3], sizes = [64, 7], strides = [1, 1]} : vector<64x10xf32> to vector<64x7xf32>
    %5 = tpu.concatenate %1, %2, %3, %4 in 0 : vector<64x7xf32>, vector<64x7xf32>, vector<64x7xf32>, vector<64x7xf32> -> vector<256x7xf32>
    %c0_1 = arith.constant 0 : index
    %c0_2 = arith.constant 0 : index
    %6 = vector.load %arg1[%c0_1, %c0_2] : memref<64x256xf32, #tpu.memory_space<vmem>>, vector<64x256xf32>
    %cst = arith.constant dense<0.000000e+00> : vector<64x7xf32>
    %7 = tpu.matmul %6, %5, %cst {dimension_numbers = #tpu.dot_dimension_numbers<[1], [0], [0], [1], [0, 0, 1, 1], [], []>} : vector<64x256xf32>, vector<256x7xf32>, vector<64x7xf32> -> vector<64x7xf32>
    %c0_3 = arith.constant 0 : index
    %c0_4 = arith.constant 0 : index
    %8 = vector.load %arg2[%c0_3, %c0_4] : memref<64x1xf32, #tpu.memory_space<vmem>>, vector<64x1xf32>
    %9 = vector.broadcast %8 : vector<64x1xf32> to vector<64x7xf32>
    %10 = arith.addf %7, %9 : vector<64x7xf32>
    %11 = vector.extract_strided_slice %10 {offsets = [0, 0], sizes = [64, 6], strides = [1, 1]} : vector<64x7xf32> to vector<64x6xf32>
    %12 = vector.extract_strided_slice %10 {offsets = [0, 1], sizes = [64, 6], strides = [1, 1]} : vector<64x7xf32> to vector<64x6xf32>
    %13 = arith.maximumf %11, %12 : vector<64x6xf32>
    %14 = vector.extract_strided_slice %10 {offsets = [0, 0], sizes = [64, 1], strides = [1, 1]} : vector<64x7xf32> to vector<64x1xf32>
    %15 = vector.extract_strided_slice %10 {offsets = [0, 6], sizes = [64, 1], strides = [1, 1]} : vector<64x7xf32> to vector<64x1xf32>
    %16 = tpu.concatenate %14, %13, %15 in 1 : vector<64x1xf32>, vector<64x6xf32>, vector<64x1xf32> -> vector<64x8xf32>
    %c0_5 = arith.constant 0 : index
    %c0_6 = arith.constant 0 : index
    %17 = vector.load %arg3[%c0_5, %c0_6] : memref<8x512xf32, #tpu.memory_space<vmem>>, vector<8x512xf32>
    %cst_7 = arith.constant dense<0.000000e+00> : vector<64x512xf32>
    %18 = tpu.matmul %16, %17, %cst_7 {dimension_numbers = #tpu.dot_dimension_numbers<[1], [0], [0], [1], [0, 0, 1, 1], [], []>} : vector<64x8xf32>, vector<8x512xf32>, vector<64x512xf32> -> vector<64x512xf32>
    %c0_8 = arith.constant 0 : index
    %c0_9 = arith.constant 0 : index
    %19 = vector.load %arg4[%c0_8, %c0_9] : memref<1x512xf32, #tpu.memory_space<vmem>>, vector<1x512xf32>
    %20 = vector.broadcast %19 : vector<1x512xf32> to vector<64x512xf32>
    %21 = arith.addf %18, %20 : vector<64x512xf32>
    %c0_10 = arith.constant 0 : index
    %c0_11 = arith.constant 0 : index
    %22 = vector.load %arg12[%c0_10, %c0_11] : memref<64x512xf32, #tpu.memory_space<vmem>>, vector<64x512xf32>
    tpu.vector_store %arg12[%c0_10, %c0_11], %21 {strides = array<i32>} : memref<64x512xf32, #tpu.memory_space<vmem>>, vector<64x512xf32>,
    %c0_12 = arith.constant 0 : index
    %c0_13 = arith.constant 0 : index
    %23 = vector.load %arg5[%c0_12, %c0_13] : memref<128x512xbf16, #tpu.memory_space<vmem>>, vector<128x512xbf16>
    %cst_14 = arith.constant 0.000000e+00 : f32
    %24 = vector.broadcast %cst_14 : f32 to vector<8x128xf32>
    %cst_15 = arith.constant 0.000000e+00 : f32
    %25 = vector.broadcast %cst_15 : f32 to vector<8x128xf32>
    %c0_16 = arith.constant 0 : index
    %c0_17 = arith.constant 0 : index
    %26 = vector.load %arg12[%c0_16, %c0_17] : memref<64x512xf32, #tpu.memory_space<vmem>>, vector<8x512xf32>
    %27 = arith.truncf %24 : vector<8x128xf32> to vector<8x128xbf16>
    %cst_18 = arith.constant dense<0.000000e+00> : vector<8x512xf32>
    %28 = tpu.matmul %27, %23, %cst_18 {dimension_numbers = #tpu.dot_dimension_numbers<[1], [0], [0], [1], [0, 0, 1, 1], [], []>} : vector<8x128xbf16>, vector<128x512xbf16>, vector<8x512xf32> -> vector<8x512xf32>
    %29 = arith.addf %26, %28 : vector<8x512xf32>
    %30 = vector.extract_strided_slice %29 {offsets = [0, 0], sizes = [8, 384], strides = [1, 1]} : vector<8x512xf32> to vector<8x384xf32>
    %31 = arith.negf %30 : vector<8x384xf32>
    %32 = math.exp %31 : vector<8x384xf32>
    %cst_19 = arith.constant 1.000000e+00 : f32
    %33 = vector.broadcast %cst_19 : f32 to vector<8x384xf32>
    %34 = arith.addf %33, %32 : vector<8x384xf32>
    %35 = arith.divf %33, %34 : vector<8x384xf32>
    %36 = vector.extract_strided_slice %29 {offsets = [0, 384], sizes = [8, 128], strides = [1, 1]} : vector<8x512xf32> to vector<8x128xf32>
    %37 = math.tanh %36 : vector<8x128xf32>
    %38 = vector.extract_strided_slice %35 {offsets = [0, 128], sizes = [8, 128], strides = [1, 1]} : vector<8x384xf32> to vector<8x128xf32>
    %39 = arith.mulf %38, %25 : vector<8x128xf32>
    %40 = vector.extract_strided_slice %35 {offsets = [0, 0], sizes = [8, 128], strides = [1, 1]} : vector<8x384xf32> to vector<8x128xf32>
    %41 = arith.mulf %40, %37 : vector<8x128xf32>
    %42 = arith.addf %39, %41 : vector<8x128xf32>
    %43 = vector.extract_strided_slice %35 {offsets = [0, 256], sizes = [8, 128], strides = [1, 1]} : vector<8x384xf32> to vector<8x128xf32>
    %44 = math.tanh %42 : vector<8x128xf32>
    %45 = arith.mulf %43, %44 : vector<8x128xf32>
    %c0_20 = arith.constant 0 : index
    %c0_21 = arith.constant 0 : index
    %46 = vector.load %arg13[%c0_20, %c0_21] : memref<64x128xf32, #tpu.memory_space<vmem>>, vector<8x128xf32>
    tpu.vector_store %arg13[%c0_20, %c0_21], %45 {strides = array<i32>} : memref<64x128xf32, #tpu.memory_space<vmem>>, vector<8x128xf32>,
    %c8 = arith.constant 8 : index
    %c0_22 = arith.constant 0 : index
    %47 = vector.load %arg12[%c8, %c0_22] : memref<64x512xf32, #tpu.memory_space<vmem>>, vector<8x512xf32>
    %48 = arith.truncf %45 : vector<8x128xf32> to vector<8x128xbf16>
    %cst_23 = arith.constant dense<0.000000e+00> : vector<8x512xf32>
    %49 = tpu.matmul %48, %23, %cst_23 {dimension_numbers = #tpu.dot_dimension_numbers<[1], [0], [0], [1], [0, 0, 1, 1], [], []>} : vector<8x128xbf16>, vector<128x512xbf16>, vector<8x512xf32> -> vector<8x512xf32>
    %50 = arith.addf %47, %49 : vector<8x512xf32>
    %51 = vector.extract_strided_slice %50 {offsets = [0, 0], sizes = [8, 384], strides = [1, 1]} : vector<8x512xf32> to vector<8x384xf32>
    %52 = arith.negf %51 : vector<8x384xf32>
    %53 = math.exp %52 : vector<8x384xf32>
    %cst_24 = arith.constant 1.000000e+00 : f32
    %54 = vector.broadcast %cst_24 : f32 to vector<8x384xf32>
    %55 = arith.addf %54, %53 : vector<8x384xf32>
    %56 = arith.divf %54, %55 : vector<8x384xf32>
    %57 = vector.extract_strided_slice %50 {offsets = [0, 384], sizes = [8, 128], strides = [1, 1]} : vector<8x512xf32> to vector<8x128xf32>
    %58 = math.tanh %57 : vector<8x128xf32>
    %59 = vector.extract_strided_slice %56 {offsets = [0, 128], sizes = [8, 128], strides = [1, 1]} : vector<8x384xf32> to vector<8x128xf32>
    %60 = arith.mulf %59, %42 : vector<8x128xf32>
    %61 = vector.extract_strided_slice %56 {offsets = [0, 0], sizes = [8, 128], strides = [1, 1]} : vector<8x384xf32> to vector<8x128xf32>
    %62 = arith.mulf %61, %58 : vector<8x128xf32>
    %63 = arith.addf %60, %62 : vector<8x128xf32>
    %64 = vector.extract_strided_slice %56 {offsets = [0, 256], sizes = [8, 128], strides = [1, 1]} : vector<8x384xf32> to vector<8x128xf32>
    %65 = math.tanh %63 : vector<8x128xf32>
    %66 = arith.mulf %64, %65 : vector<8x128xf32>
    %c8_25 = arith.constant 8 : index
    %c0_26 = arith.constant 0 : index
    %67 = vector.load %arg13[%c8_25, %c0_26] : memref<64x128xf32, #tpu.memory_space<vmem>>, vector<8x128xf32>
    tpu.vector_store %arg13[%c8_25, %c0_26], %66 {strides = array<i32>} : memref<64x128xf32, #tpu.memory_space<vmem>>, vector<8x128xf32>,
    %c16 = arith.constant 16 : index
    %c0_27 = arith.constant 0 : index
    %68 = vector.load %arg12[%c16, %c0_27] : memref<64x512xf32, #tpu.memory_space<vmem>>, vector<8x512xf32>
    %69 = arith.truncf %66 : vector<8x128xf32> to vector<8x128xbf16>
    %cst_28 = arith.constant dense<0.000000e+00> : vector<8x512xf32>
    %70 = tpu.matmul %69, %23, %cst_28 {dimension_numbers = #tpu.dot_dimension_numbers<[1], [0], [0], [1], [0, 0, 1, 1], [], []>} : vector<8x128xbf16>, vector<128x512xbf16>, vector<8x512xf32> -> vector<8x512xf32>
    %71 = arith.addf %68, %70 : vector<8x512xf32>
    %72 = vector.extract_strided_slice %71 {offsets = [0, 0], sizes = [8, 384], strides = [1, 1]} : vector<8x512xf32> to vector<8x384xf32>
    %73 = arith.negf %72 : vector<8x384xf32>
    %74 = math.exp %73 : vector<8x384xf32>
    %cst_29 = arith.constant 1.000000e+00 : f32
    %75 = vector.broadcast %cst_29 : f32 to vector<8x384xf32>
    %76 = arith.addf %75, %74 : vector<8x384xf32>
    %77 = arith.divf %75, %76 : vector<8x384xf32>
    %78 = vector.extract_strided_slice %71 {offsets = [0, 384], sizes = [8, 128], strides = [1, 1]} : vector<8x512xf32> to vector<8x128xf32>
    %79 = math.tanh %78 : vector<8x128xf32>
    %80 = vector.extract_strided_slice %77 {offsets = [0, 128], sizes = [8, 128], strides = [1, 1]} : vector<8x384xf32> to vector<8x128xf32>
    %81 = arith.mulf %80, %63 : vector<8x128xf32>
    %82 = vector.extract_strided_slice %77 {offsets = [0, 0], sizes = [8, 128], strides = [1, 1]} : vector<8x384xf32> to vector<8x128xf32>
    %83 = arith.mulf %82, %79 : vector<8x128xf32>
    %84 = arith.addf %81, %83 : vector<8x128xf32>
    %85 = vector.extract_strided_slice %77 {offsets = [0, 256], sizes = [8, 128], strides = [1, 1]} : vector<8x384xf32> to vector<8x128xf32>
    %86 = math.tanh %84 : vector<8x128xf32>
    %87 = arith.mulf %85, %86 : vector<8x128xf32>
    %c16_30 = arith.constant 16 : index
    %c0_31 = arith.constant 0 : index
    %88 = vector.load %arg13[%c16_30, %c0_31] : memref<64x128xf32, #tpu.memory_space<vmem>>, vector<8x128xf32>
    tpu.vector_store %arg13[%c16_30, %c0_31], %87 {strides = array<i32>} : memref<64x128xf32, #tpu.memory_space<vmem>>, vector<8x128xf32>,
    %c24 = arith.constant 24 : index
    %c0_32 = arith.constant 0 : index
    %89 = vector.load %arg12[%c24, %c0_32] : memref<64x512xf32, #tpu.memory_space<vmem>>, vector<8x512xf32>
    %90 = arith.truncf %87 : vector<8x128xf32> to vector<8x128xbf16>
    %cst_33 = arith.constant dense<0.000000e+00> : vector<8x512xf32>
    %91 = tpu.matmul %90, %23, %cst_33 {dimension_numbers = #tpu.dot_dimension_numbers<[1], [0], [0], [1], [0, 0, 1, 1], [], []>} : vector<8x128xbf16>, vector<128x512xbf16>, vector<8x512xf32> -> vector<8x512xf32>
    %92 = arith.addf %89, %91 : vector<8x512xf32>
    %93 = vector.extract_strided_slice %92 {offsets = [0, 0], sizes = [8, 384], strides = [1, 1]} : vector<8x512xf32> to vector<8x384xf32>
    %94 = arith.negf %93 : vector<8x384xf32>
    %95 = math.exp %94 : vector<8x384xf32>
    %cst_34 = arith.constant 1.000000e+00 : f32
    %96 = vector.broadcast %cst_34 : f32 to vector<8x384xf32>
    %97 = arith.addf %96, %95 : vector<8x384xf32>
    %98 = arith.divf %96, %97 : vector<8x384xf32>
    %99 = vector.extract_strided_slice %92 {offsets = [0, 384], sizes = [8, 128], strides = [1, 1]} : vector<8x512xf32> to vector<8x128xf32>
    %100 = math.tanh %99 : vector<8x128xf32>
    %101 = vector.extract_strided_slice %98 {offsets = [0, 128], sizes = [8, 128], strides = [1, 1]} : vector<8x384xf32> to vector<8x128xf32>
    %102 = arith.mulf %101, %84 : vector<8x128xf32>
    %103 = vector.extract_strided_slice %98 {offsets = [0, 0], sizes = [8, 128], strides = [1, 1]} : vector<8x384xf32> to vector<8x128xf32>
    %104 = arith.mulf %103, %100 : vector<8x128xf32>
    %105 = arith.addf %102, %104 : vector<8x128xf32>
    %106 = vector.extract_strided_slice %98 {offsets = [0, 256], sizes = [8, 128], strides = [1, 1]} : vector<8x384xf32> to vector<8x128xf32>
    %107 = math.tanh %105 : vector<8x128xf32>
    %108 = arith.mulf %106, %107 : vector<8x128xf32>
    %c24_35 = arith.constant 24 : index
    %c0_36 = arith.constant 0 : index
    %109 = vector.load %arg13[%c24_35, %c0_36] : memref<64x128xf32, #tpu.memory_space<vmem>>, vector<8x128xf32>
    tpu.vector_store %arg13[%c24_35, %c0_36], %108 {strides = array<i32>} : memref<64x128xf32, #tpu.memory_space<vmem>>, vector<8x128xf32>,
    %c32 = arith.constant 32 : index
    %c0_37 = arith.constant 0 : index
    %110 = vector.load %arg12[%c32, %c0_37] : memref<64x512xf32, #tpu.memory_space<vmem>>, vector<8x512xf32>
    %111 = arith.truncf %108 : vector<8x128xf32> to vector<8x128xbf16>
    %cst_38 = arith.constant dense<0.000000e+00> : vector<8x512xf32>
    %112 = tpu.matmul %111, %23, %cst_38 {dimension_numbers = #tpu.dot_dimension_numbers<[1], [0], [0], [1], [0, 0, 1, 1], [], []>} : vector<8x128xbf16>, vector<128x512xbf16>, vector<8x512xf32> -> vector<8x512xf32>
    %113 = arith.addf %110, %112 : vector<8x512xf32>
    %114 = vector.extract_strided_slice %113 {offsets = [0, 0], sizes = [8, 384], strides = [1, 1]} : vector<8x512xf32> to vector<8x384xf32>
    %115 = arith.negf %114 : vector<8x384xf32>
    %116 = math.exp %115 : vector<8x384xf32>
    %cst_39 = arith.constant 1.000000e+00 : f32
    %117 = vector.broadcast %cst_39 : f32 to vector<8x384xf32>
    %118 = arith.addf %117, %116 : vector<8x384xf32>
    %119 = arith.divf %117, %118 : vector<8x384xf32>
    %120 = vector.extract_strided_slice %113 {offsets = [0, 384], sizes = [8, 128], strides = [1, 1]} : vector<8x512xf32> to vector<8x128xf32>
    %121 = math.tanh %120 : vector<8x128xf32>
    %122 = vector.extract_strided_slice %119 {offsets = [0, 128], sizes = [8, 128], strides = [1, 1]} : vector<8x384xf32> to vector<8x128xf32>
    %123 = arith.mulf %122, %105 : vector<8x128xf32>
    %124 = vector.extract_strided_slice %119 {offsets = [0, 0], sizes = [8, 128], strides = [1, 1]} : vector<8x384xf32> to vector<8x128xf32>
    %125 = arith.mulf %124, %121 : vector<8x128xf32>
    %126 = arith.addf %123, %125 : vector<8x128xf32>
    %127 = vector.extract_strided_slice %119 {offsets = [0, 256], sizes = [8, 128], strides = [1, 1]} : vector<8x384xf32> to vector<8x128xf32>
    %128 = math.tanh %126 : vector<8x128xf32>
    %129 = arith.mulf %127, %128 : vector<8x128xf32>
    %c32_40 = arith.constant 32 : index
    %c0_41 = arith.constant 0 : index
    %130 = vector.load %arg13[%c32_40, %c0_41] : memref<64x128xf32, #tpu.memory_space<vmem>>, vector<8x128xf32>
    tpu.vector_store %arg13[%c32_40, %c0_41], %129 {strides = array<i32>} : memref<64x128xf32, #tpu.memory_space<vmem>>, vector<8x128xf32>,
    %c40 = arith.constant 40 : index
    %c0_42 = arith.constant 0 : index
    %131 = vector.load %arg12[%c40, %c0_42] : memref<64x512xf32, #tpu.memory_space<vmem>>, vector<8x512xf32>
    %132 = arith.truncf %129 : vector<8x128xf32> to vector<8x128xbf16>
    %cst_43 = arith.constant dense<0.000000e+00> : vector<8x512xf32>
    %133 = tpu.matmul %132, %23, %cst_43 {dimension_numbers = #tpu.dot_dimension_numbers<[1], [0], [0], [1], [0, 0, 1, 1], [], []>} : vector<8x128xbf16>, vector<128x512xbf16>, vector<8x512xf32> -> vector<8x512xf32>
    %134 = arith.addf %131, %133 : vector<8x512xf32>
    %135 = vector.extract_strided_slice %134 {offsets = [0, 0], sizes = [8, 384], strides = [1, 1]} : vector<8x512xf32> to vector<8x384xf32>
    %136 = arith.negf %135 : vector<8x384xf32>
    %137 = math.exp %136 : vector<8x384xf32>
    %cst_44 = arith.constant 1.000000e+00 : f32
    %138 = vector.broadcast %cst_44 : f32 to vector<8x384xf32>
    %139 = arith.addf %138, %137 : vector<8x384xf32>
    %140 = arith.divf %138, %139 : vector<8x384xf32>
    %141 = vector.extract_strided_slice %134 {offsets = [0, 384], sizes = [8, 128], strides = [1, 1]} : vector<8x512xf32> to vector<8x128xf32>
    %142 = math.tanh %141 : vector<8x128xf32>
    %143 = vector.extract_strided_slice %140 {offsets = [0, 128], sizes = [8, 128], strides = [1, 1]} : vector<8x384xf32> to vector<8x128xf32>
    %144 = arith.mulf %143, %126 : vector<8x128xf32>
    %145 = vector.extract_strided_slice %140 {offsets = [0, 0], sizes = [8, 128], strides = [1, 1]} : vector<8x384xf32> to vector<8x128xf32>
    %146 = arith.mulf %145, %142 : vector<8x128xf32>
    %147 = arith.addf %144, %146 : vector<8x128xf32>
    %148 = vector.extract_strided_slice %140 {offsets = [0, 256], sizes = [8, 128], strides = [1, 1]} : vector<8x384xf32> to vector<8x128xf32>
    %149 = math.tanh %147 : vector<8x128xf32>
    %150 = arith.mulf %148, %149 : vector<8x128xf32>
    %c40_45 = arith.constant 40 : index
    %c0_46 = arith.constant 0 : index
    %151 = vector.load %arg13[%c40_45, %c0_46] : memref<64x128xf32, #tpu.memory_space<vmem>>, vector<8x128xf32>
    tpu.vector_store %arg13[%c40_45, %c0_46], %150 {strides = array<i32>} : memref<64x128xf32, #tpu.memory_space<vmem>>, vector<8x128xf32>,
    %c48 = arith.constant 48 : index
    %c0_47 = arith.constant 0 : index
    %152 = vector.load %arg12[%c48, %c0_47] : memref<64x512xf32, #tpu.memory_space<vmem>>, vector<8x512xf32>
    %153 = arith.truncf %150 : vector<8x128xf32> to vector<8x128xbf16>
    %cst_48 = arith.constant dense<0.000000e+00> : vector<8x512xf32>
    %154 = tpu.matmul %153, %23, %cst_48 {dimension_numbers = #tpu.dot_dimension_numbers<[1], [0], [0], [1], [0, 0, 1, 1], [], []>} : vector<8x128xbf16>, vector<128x512xbf16>, vector<8x512xf32> -> vector<8x512xf32>
    %155 = arith.addf %152, %154 : vector<8x512xf32>
    %156 = vector.extract_strided_slice %155 {offsets = [0, 0], sizes = [8, 384], strides = [1, 1]} : vector<8x512xf32> to vector<8x384xf32>
    %157 = arith.negf %156 : vector<8x384xf32>
    %158 = math.exp %157 : vector<8x384xf32>
    %cst_49 = arith.constant 1.000000e+00 : f32
    %159 = vector.broadcast %cst_49 : f32 to vector<8x384xf32>
    %160 = arith.addf %159, %158 : vector<8x384xf32>
    %161 = arith.divf %159, %160 : vector<8x384xf32>
    %162 = vector.extract_strided_slice %155 {offsets = [0, 384], sizes = [8, 128], strides = [1, 1]} : vector<8x512xf32> to vector<8x128xf32>
    %163 = math.tanh %162 : vector<8x128xf32>
    %164 = vector.extract_strided_slice %161 {offsets = [0, 128], sizes = [8, 128], strides = [1, 1]} : vector<8x384xf32> to vector<8x128xf32>
    %165 = arith.mulf %164, %147 : vector<8x128xf32>
    %166 = vector.extract_strided_slice %161 {offsets = [0, 0], sizes = [8, 128], strides = [1, 1]} : vector<8x384xf32> to vector<8x128xf32>
    %167 = arith.mulf %166, %163 : vector<8x128xf32>
    %168 = arith.addf %165, %167 : vector<8x128xf32>
    %169 = vector.extract_strided_slice %161 {offsets = [0, 256], sizes = [8, 128], strides = [1, 1]} : vector<8x384xf32> to vector<8x128xf32>
    %170 = math.tanh %168 : vector<8x128xf32>
    %171 = arith.mulf %169, %170 : vector<8x128xf32>
    %c48_50 = arith.constant 48 : index
    %c0_51 = arith.constant 0 : index
    %172 = vector.load %arg13[%c48_50, %c0_51] : memref<64x128xf32, #tpu.memory_space<vmem>>, vector<8x128xf32>
    tpu.vector_store %arg13[%c48_50, %c0_51], %171 {strides = array<i32>} : memref<64x128xf32, #tpu.memory_space<vmem>>, vector<8x128xf32>,
    %c56 = arith.constant 56 : index
    %c0_52 = arith.constant 0 : index
    %173 = vector.load %arg12[%c56, %c0_52] : memref<64x512xf32, #tpu.memory_space<vmem>>, vector<8x512xf32>
    %174 = arith.truncf %171 : vector<8x128xf32> to vector<8x128xbf16>
    %cst_53 = arith.constant dense<0.000000e+00> : vector<8x512xf32>
    %175 = tpu.matmul %174, %23, %cst_53 {dimension_numbers = #tpu.dot_dimension_numbers<[1], [0], [0], [1], [0, 0, 1, 1], [], []>} : vector<8x128xbf16>, vector<128x512xbf16>, vector<8x512xf32> -> vector<8x512xf32>
    %176 = arith.addf %173, %175 : vector<8x512xf32>
    %177 = vector.extract_strided_slice %176 {offsets = [0, 0], sizes = [8, 384], strides = [1, 1]} : vector<8x512xf32> to vector<8x384xf32>
    %178 = arith.negf %177 : vector<8x384xf32>
    %179 = math.exp %178 : vector<8x384xf32>
    %cst_54 = arith.constant 1.000000e+00 : f32
    %180 = vector.broadcast %cst_54 : f32 to vector<8x384xf32>
    %181 = arith.addf %180, %179 : vector<8x384xf32>
    %182 = arith.divf %180, %181 : vector<8x384xf32>
    %183 = vector.extract_strided_slice %176 {offsets = [0, 384], sizes = [8, 128], strides = [1, 1]} : vector<8x512xf32> to vector<8x128xf32>
    %184 = math.tanh %183 : vector<8x128xf32>
    %185 = vector.extract_strided_slice %182 {offsets = [0, 128], sizes = [8, 128], strides = [1, 1]} : vector<8x384xf32> to vector<8x128xf32>
    %186 = arith.mulf %185, %168 : vector<8x128xf32>
    %187 = vector.extract_strided_slice %182 {offsets = [0, 0], sizes = [8, 128], strides = [1, 1]} : vector<8x384xf32> to vector<8x128xf32>
    %188 = arith.mulf %187, %184 : vector<8x128xf32>
    %189 = arith.addf %186, %188 : vector<8x128xf32>
    %190 = vector.extract_strided_slice %182 {offsets = [0, 256], sizes = [8, 128], strides = [1, 1]} : vector<8x384xf32> to vector<8x128xf32>
    %191 = math.tanh %189 : vector<8x128xf32>
    %192 = arith.mulf %190, %191 : vector<8x128xf32>
    %c56_55 = arith.constant 56 : index
    %c0_56 = arith.constant 0 : index
    %193 = vector.load %arg13[%c56_55, %c0_56] : memref<64x128xf32, #tpu.memory_space<vmem>>, vector<8x128xf32>
    tpu.vector_store %arg13[%c56_55, %c0_56], %192 {strides = array<i32>} : memref<64x128xf32, #tpu.memory_space<vmem>>, vector<8x128xf32>,
    %c0_57 = arith.constant 0 : index
    %c0_58 = arith.constant 0 : index
    %194 = vector.load %arg13[%c0_57, %c0_58] : memref<64x128xf32, #tpu.memory_space<vmem>>, vector<64x128xf32>
    %c0_59 = arith.constant 0 : index
    %c0_60 = arith.constant 0 : index
    %195 = vector.load %arg6[%c0_59, %c0_60] : memref<128x512xf32, #tpu.memory_space<vmem>>, vector<128x512xf32>
    %cst_61 = arith.constant dense<0.000000e+00> : vector<64x512xf32>
    %196 = tpu.matmul %194, %195, %cst_61 {dimension_numbers = #tpu.dot_dimension_numbers<[1], [0], [0], [1], [0, 0, 1, 1], [], []>} : vector<64x128xf32>, vector<128x512xf32>, vector<64x512xf32> -> vector<64x512xf32>
    %c0_62 = arith.constant 0 : index
    %c0_63 = arith.constant 0 : index
    %197 = vector.load %arg8[%c0_62, %c0_63] : memref<1x512xf32, #tpu.memory_space<vmem>>, vector<1x512xf32>
    %198 = vector.broadcast %197 : vector<1x512xf32> to vector<64x512xf32>
    %199 = arith.addf %196, %198 : vector<64x512xf32>
    %c0_64 = arith.constant 0 : index
    %c0_65 = arith.constant 0 : index
    %200 = vector.load %arg14[%c0_64, %c0_65] : memref<64x512xf32, #tpu.memory_space<vmem>>, vector<64x512xf32>
    tpu.vector_store %arg14[%c0_64, %c0_65], %199 {strides = array<i32>} : memref<64x512xf32, #tpu.memory_space<vmem>>, vector<64x512xf32>,
    %c0_66 = arith.constant 0 : index
    %c0_67 = arith.constant 0 : index
    %201 = vector.load %arg7[%c0_66, %c0_67] : memref<128x512xbf16, #tpu.memory_space<vmem>>, vector<128x512xbf16>
    %cst_68 = arith.constant 0.000000e+00 : f32
    %202 = vector.broadcast %cst_68 : f32 to vector<8x128xf32>
    %cst_69 = arith.constant 0.000000e+00 : f32
    %203 = vector.broadcast %cst_69 : f32 to vector<8x128xf32>
    %c0_70 = arith.constant 0 : index
    %c0_71 = arith.constant 0 : index
    %204 = vector.load %arg14[%c0_70, %c0_71] : memref<64x512xf32, #tpu.memory_space<vmem>>, vector<8x512xf32>
    %205 = arith.truncf %202 : vector<8x128xf32> to vector<8x128xbf16>
    %cst_72 = arith.constant dense<0.000000e+00> : vector<8x512xf32>
    %206 = tpu.matmul %205, %201, %cst_72 {dimension_numbers = #tpu.dot_dimension_numbers<[1], [0], [0], [1], [0, 0, 1, 1], [], []>} : vector<8x128xbf16>, vector<128x512xbf16>, vector<8x512xf32> -> vector<8x512xf32>
    %207 = arith.addf %204, %206 : vector<8x512xf32>
    %208 = vector.extract_strided_slice %207 {offsets = [0, 0], sizes = [8, 384], strides = [1, 1]} : vector<8x512xf32> to vector<8x384xf32>
    %209 = arith.negf %208 : vector<8x384xf32>
    %210 = math.exp %209 : vector<8x384xf32>
    %cst_73 = arith.constant 1.000000e+00 : f32
    %211 = vector.broadcast %cst_73 : f32 to vector<8x384xf32>
    %212 = arith.addf %211, %210 : vector<8x384xf32>
    %213 = arith.divf %211, %212 : vector<8x384xf32>
    %214 = vector.extract_strided_slice %207 {offsets = [0, 384], sizes = [8, 128], strides = [1, 1]} : vector<8x512xf32> to vector<8x128xf32>
    %215 = math.tanh %214 : vector<8x128xf32>
    %216 = vector.extract_strided_slice %213 {offsets = [0, 128], sizes = [8, 128], strides = [1, 1]} : vector<8x384xf32> to vector<8x128xf32>
    %217 = arith.mulf %216, %203 : vector<8x128xf32>
    %218 = vector.extract_strided_slice %213 {offsets = [0, 0], sizes = [8, 128], strides = [1, 1]} : vector<8x384xf32> to vector<8x128xf32>
    %219 = arith.mulf %218, %215 : vector<8x128xf32>
    %220 = arith.addf %217, %219 : vector<8x128xf32>
    %221 = vector.extract_strided_slice %213 {offsets = [0, 256], sizes = [8, 128], strides = [1, 1]} : vector<8x384xf32> to vector<8x128xf32>
    %222 = math.tanh %220 : vector<8x128xf32>
    %223 = arith.mulf %221, %222 : vector<8x128xf32>
    %c0_74 = arith.constant 0 : index
    %c0_75 = arith.constant 0 : index
    %224 = vector.load %arg15[%c0_74, %c0_75] : memref<64x128xf32, #tpu.memory_space<vmem>>, vector<8x128xf32>
    tpu.vector_store %arg15[%c0_74, %c0_75], %223 {strides = array<i32>} : memref<64x128xf32, #tpu.memory_space<vmem>>, vector<8x128xf32>,
    %c8_76 = arith.constant 8 : index
    %c0_77 = arith.constant 0 : index
    %225 = vector.load %arg14[%c8_76, %c0_77] : memref<64x512xf32, #tpu.memory_space<vmem>>, vector<8x512xf32>
    %226 = arith.truncf %223 : vector<8x128xf32> to vector<8x128xbf16>
    %cst_78 = arith.constant dense<0.000000e+00> : vector<8x512xf32>
    %227 = tpu.matmul %226, %201, %cst_78 {dimension_numbers = #tpu.dot_dimension_numbers<[1], [0], [0], [1], [0, 0, 1, 1], [], []>} : vector<8x128xbf16>, vector<128x512xbf16>, vector<8x512xf32> -> vector<8x512xf32>
    %228 = arith.addf %225, %227 : vector<8x512xf32>
    %229 = vector.extract_strided_slice %228 {offsets = [0, 0], sizes = [8, 384], strides = [1, 1]} : vector<8x512xf32> to vector<8x384xf32>
    %230 = arith.negf %229 : vector<8x384xf32>
    %231 = math.exp %230 : vector<8x384xf32>
    %cst_79 = arith.constant 1.000000e+00 : f32
    %232 = vector.broadcast %cst_79 : f32 to vector<8x384xf32>
    %233 = arith.addf %232, %231 : vector<8x384xf32>
    %234 = arith.divf %232, %233 : vector<8x384xf32>
    %235 = vector.extract_strided_slice %228 {offsets = [0, 384], sizes = [8, 128], strides = [1, 1]} : vector<8x512xf32> to vector<8x128xf32>
    %236 = math.tanh %235 : vector<8x128xf32>
    %237 = vector.extract_strided_slice %234 {offsets = [0, 128], sizes = [8, 128], strides = [1, 1]} : vector<8x384xf32> to vector<8x128xf32>
    %238 = arith.mulf %237, %220 : vector<8x128xf32>
    %239 = vector.extract_strided_slice %234 {offsets = [0, 0], sizes = [8, 128], strides = [1, 1]} : vector<8x384xf32> to vector<8x128xf32>
    %240 = arith.mulf %239, %236 : vector<8x128xf32>
    %241 = arith.addf %238, %240 : vector<8x128xf32>
    %242 = vector.extract_strided_slice %234 {offsets = [0, 256], sizes = [8, 128], strides = [1, 1]} : vector<8x384xf32> to vector<8x128xf32>
    %243 = math.tanh %241 : vector<8x128xf32>
    %244 = arith.mulf %242, %243 : vector<8x128xf32>
    %c8_80 = arith.constant 8 : index
    %c0_81 = arith.constant 0 : index
    %245 = vector.load %arg15[%c8_80, %c0_81] : memref<64x128xf32, #tpu.memory_space<vmem>>, vector<8x128xf32>
    tpu.vector_store %arg15[%c8_80, %c0_81], %244 {strides = array<i32>} : memref<64x128xf32, #tpu.memory_space<vmem>>, vector<8x128xf32>,
    %c16_82 = arith.constant 16 : index
    %c0_83 = arith.constant 0 : index
    %246 = vector.load %arg14[%c16_82, %c0_83] : memref<64x512xf32, #tpu.memory_space<vmem>>, vector<8x512xf32>
    %247 = arith.truncf %244 : vector<8x128xf32> to vector<8x128xbf16>
    %cst_84 = arith.constant dense<0.000000e+00> : vector<8x512xf32>
    %248 = tpu.matmul %247, %201, %cst_84 {dimension_numbers = #tpu.dot_dimension_numbers<[1], [0], [0], [1], [0, 0, 1, 1], [], []>} : vector<8x128xbf16>, vector<128x512xbf16>, vector<8x512xf32> -> vector<8x512xf32>
    %249 = arith.addf %246, %248 : vector<8x512xf32>
    %250 = vector.extract_strided_slice %249 {offsets = [0, 0], sizes = [8, 384], strides = [1, 1]} : vector<8x512xf32> to vector<8x384xf32>
    %251 = arith.negf %250 : vector<8x384xf32>
    %252 = math.exp %251 : vector<8x384xf32>
    %cst_85 = arith.constant 1.000000e+00 : f32
    %253 = vector.broadcast %cst_85 : f32 to vector<8x384xf32>
    %254 = arith.addf %253, %252 : vector<8x384xf32>
    %255 = arith.divf %253, %254 : vector<8x384xf32>
    %256 = vector.extract_strided_slice %249 {offsets = [0, 384], sizes = [8, 128], strides = [1, 1]} : vector<8x512xf32> to vector<8x128xf32>
    %257 = math.tanh %256 : vector<8x128xf32>
    %258 = vector.extract_strided_slice %255 {offsets = [0, 128], sizes = [8, 128], strides = [1, 1]} : vector<8x384xf32> to vector<8x128xf32>
    %259 = arith.mulf %258, %241 : vector<8x128xf32>
    %260 = vector.extract_strided_slice %255 {offsets = [0, 0], sizes = [8, 128], strides = [1, 1]} : vector<8x384xf32> to vector<8x128xf32>
    %261 = arith.mulf %260, %257 : vector<8x128xf32>
    %262 = arith.addf %259, %261 : vector<8x128xf32>
    %263 = vector.extract_strided_slice %255 {offsets = [0, 256], sizes = [8, 128], strides = [1, 1]} : vector<8x384xf32> to vector<8x128xf32>
    %264 = math.tanh %262 : vector<8x128xf32>
    %265 = arith.mulf %263, %264 : vector<8x128xf32>
    %c16_86 = arith.constant 16 : index
    %c0_87 = arith.constant 0 : index
    %266 = vector.load %arg15[%c16_86, %c0_87] : memref<64x128xf32, #tpu.memory_space<vmem>>, vector<8x128xf32>
    tpu.vector_store %arg15[%c16_86, %c0_87], %265 {strides = array<i32>} : memref<64x128xf32, #tpu.memory_space<vmem>>, vector<8x128xf32>,
    %c24_88 = arith.constant 24 : index
    %c0_89 = arith.constant 0 : index
    %267 = vector.load %arg14[%c24_88, %c0_89] : memref<64x512xf32, #tpu.memory_space<vmem>>, vector<8x512xf32>
    %268 = arith.truncf %265 : vector<8x128xf32> to vector<8x128xbf16>
    %cst_90 = arith.constant dense<0.000000e+00> : vector<8x512xf32>
    %269 = tpu.matmul %268, %201, %cst_90 {dimension_numbers = #tpu.dot_dimension_numbers<[1], [0], [0], [1], [0, 0, 1, 1], [], []>} : vector<8x128xbf16>, vector<128x512xbf16>, vector<8x512xf32> -> vector<8x512xf32>
    %270 = arith.addf %267, %269 : vector<8x512xf32>
    %271 = vector.extract_strided_slice %270 {offsets = [0, 0], sizes = [8, 384], strides = [1, 1]} : vector<8x512xf32> to vector<8x384xf32>
    %272 = arith.negf %271 : vector<8x384xf32>
    %273 = math.exp %272 : vector<8x384xf32>
    %cst_91 = arith.constant 1.000000e+00 : f32
    %274 = vector.broadcast %cst_91 : f32 to vector<8x384xf32>
    %275 = arith.addf %274, %273 : vector<8x384xf32>
    %276 = arith.divf %274, %275 : vector<8x384xf32>
    %277 = vector.extract_strided_slice %270 {offsets = [0, 384], sizes = [8, 128], strides = [1, 1]} : vector<8x512xf32> to vector<8x128xf32>
    %278 = math.tanh %277 : vector<8x128xf32>
    %279 = vector.extract_strided_slice %276 {offsets = [0, 128], sizes = [8, 128], strides = [1, 1]} : vector<8x384xf32> to vector<8x128xf32>
    %280 = arith.mulf %279, %262 : vector<8x128xf32>
    %281 = vector.extract_strided_slice %276 {offsets = [0, 0], sizes = [8, 128], strides = [1, 1]} : vector<8x384xf32> to vector<8x128xf32>
    %282 = arith.mulf %281, %278 : vector<8x128xf32>
    %283 = arith.addf %280, %282 : vector<8x128xf32>
    %284 = vector.extract_strided_slice %276 {offsets = [0, 256], sizes = [8, 128], strides = [1, 1]} : vector<8x384xf32> to vector<8x128xf32>
    %285 = math.tanh %283 : vector<8x128xf32>
    %286 = arith.mulf %284, %285 : vector<8x128xf32>
    %c24_92 = arith.constant 24 : index
    %c0_93 = arith.constant 0 : index
    %287 = vector.load %arg15[%c24_92, %c0_93] : memref<64x128xf32, #tpu.memory_space<vmem>>, vector<8x128xf32>
    tpu.vector_store %arg15[%c24_92, %c0_93], %286 {strides = array<i32>} : memref<64x128xf32, #tpu.memory_space<vmem>>, vector<8x128xf32>,
    %c32_94 = arith.constant 32 : index
    %c0_95 = arith.constant 0 : index
    %288 = vector.load %arg14[%c32_94, %c0_95] : memref<64x512xf32, #tpu.memory_space<vmem>>, vector<8x512xf32>
    %289 = arith.truncf %286 : vector<8x128xf32> to vector<8x128xbf16>
    %cst_96 = arith.constant dense<0.000000e+00> : vector<8x512xf32>
    %290 = tpu.matmul %289, %201, %cst_96 {dimension_numbers = #tpu.dot_dimension_numbers<[1], [0], [0], [1], [0, 0, 1, 1], [], []>} : vector<8x128xbf16>, vector<128x512xbf16>, vector<8x512xf32> -> vector<8x512xf32>
    %291 = arith.addf %288, %290 : vector<8x512xf32>
    %292 = vector.extract_strided_slice %291 {offsets = [0, 0], sizes = [8, 384], strides = [1, 1]} : vector<8x512xf32> to vector<8x384xf32>
    %293 = arith.negf %292 : vector<8x384xf32>
    %294 = math.exp %293 : vector<8x384xf32>
    %cst_97 = arith.constant 1.000000e+00 : f32
    %295 = vector.broadcast %cst_97 : f32 to vector<8x384xf32>
    %296 = arith.addf %295, %294 : vector<8x384xf32>
    %297 = arith.divf %295, %296 : vector<8x384xf32>
    %298 = vector.extract_strided_slice %291 {offsets = [0, 384], sizes = [8, 128], strides = [1, 1]} : vector<8x512xf32> to vector<8x128xf32>
    %299 = math.tanh %298 : vector<8x128xf32>
    %300 = vector.extract_strided_slice %297 {offsets = [0, 128], sizes = [8, 128], strides = [1, 1]} : vector<8x384xf32> to vector<8x128xf32>
    %301 = arith.mulf %300, %283 : vector<8x128xf32>
    %302 = vector.extract_strided_slice %297 {offsets = [0, 0], sizes = [8, 128], strides = [1, 1]} : vector<8x384xf32> to vector<8x128xf32>
    %303 = arith.mulf %302, %299 : vector<8x128xf32>
    %304 = arith.addf %301, %303 : vector<8x128xf32>
    %305 = vector.extract_strided_slice %297 {offsets = [0, 256], sizes = [8, 128], strides = [1, 1]} : vector<8x384xf32> to vector<8x128xf32>
    %306 = math.tanh %304 : vector<8x128xf32>
    %307 = arith.mulf %305, %306 : vector<8x128xf32>
    %c32_98 = arith.constant 32 : index
    %c0_99 = arith.constant 0 : index
    %308 = vector.load %arg15[%c32_98, %c0_99] : memref<64x128xf32, #tpu.memory_space<vmem>>, vector<8x128xf32>
    tpu.vector_store %arg15[%c32_98, %c0_99], %307 {strides = array<i32>} : memref<64x128xf32, #tpu.memory_space<vmem>>, vector<8x128xf32>,
    %c40_100 = arith.constant 40 : index
    %c0_101 = arith.constant 0 : index
    %309 = vector.load %arg14[%c40_100, %c0_101] : memref<64x512xf32, #tpu.memory_space<vmem>>, vector<8x512xf32>
    %310 = arith.truncf %307 : vector<8x128xf32> to vector<8x128xbf16>
    %cst_102 = arith.constant dense<0.000000e+00> : vector<8x512xf32>
    %311 = tpu.matmul %310, %201, %cst_102 {dimension_numbers = #tpu.dot_dimension_numbers<[1], [0], [0], [1], [0, 0, 1, 1], [], []>} : vector<8x128xbf16>, vector<128x512xbf16>, vector<8x512xf32> -> vector<8x512xf32>
    %312 = arith.addf %309, %311 : vector<8x512xf32>
    %313 = vector.extract_strided_slice %312 {offsets = [0, 0], sizes = [8, 384], strides = [1, 1]} : vector<8x512xf32> to vector<8x384xf32>
    %314 = arith.negf %313 : vector<8x384xf32>
    %315 = math.exp %314 : vector<8x384xf32>
    %cst_103 = arith.constant 1.000000e+00 : f32
    %316 = vector.broadcast %cst_103 : f32 to vector<8x384xf32>
    %317 = arith.addf %316, %315 : vector<8x384xf32>
    %318 = arith.divf %316, %317 : vector<8x384xf32>
    %319 = vector.extract_strided_slice %312 {offsets = [0, 384], sizes = [8, 128], strides = [1, 1]} : vector<8x512xf32> to vector<8x128xf32>
    %320 = math.tanh %319 : vector<8x128xf32>
    %321 = vector.extract_strided_slice %318 {offsets = [0, 128], sizes = [8, 128], strides = [1, 1]} : vector<8x384xf32> to vector<8x128xf32>
    %322 = arith.mulf %321, %304 : vector<8x128xf32>
    %323 = vector.extract_strided_slice %318 {offsets = [0, 0], sizes = [8, 128], strides = [1, 1]} : vector<8x384xf32> to vector<8x128xf32>
    %324 = arith.mulf %323, %320 : vector<8x128xf32>
    %325 = arith.addf %322, %324 : vector<8x128xf32>
    %326 = vector.extract_strided_slice %318 {offsets = [0, 256], sizes = [8, 128], strides = [1, 1]} : vector<8x384xf32> to vector<8x128xf32>
    %327 = math.tanh %325 : vector<8x128xf32>
    %328 = arith.mulf %326, %327 : vector<8x128xf32>
    %c40_104 = arith.constant 40 : index
    %c0_105 = arith.constant 0 : index
    %329 = vector.load %arg15[%c40_104, %c0_105] : memref<64x128xf32, #tpu.memory_space<vmem>>, vector<8x128xf32>
    tpu.vector_store %arg15[%c40_104, %c0_105], %328 {strides = array<i32>} : memref<64x128xf32, #tpu.memory_space<vmem>>, vector<8x128xf32>,
    %c48_106 = arith.constant 48 : index
    %c0_107 = arith.constant 0 : index
    %330 = vector.load %arg14[%c48_106, %c0_107] : memref<64x512xf32, #tpu.memory_space<vmem>>, vector<8x512xf32>
    %331 = arith.truncf %328 : vector<8x128xf32> to vector<8x128xbf16>
    %cst_108 = arith.constant dense<0.000000e+00> : vector<8x512xf32>
    %332 = tpu.matmul %331, %201, %cst_108 {dimension_numbers = #tpu.dot_dimension_numbers<[1], [0], [0], [1], [0, 0, 1, 1], [], []>} : vector<8x128xbf16>, vector<128x512xbf16>, vector<8x512xf32> -> vector<8x512xf32>
    %333 = arith.addf %330, %332 : vector<8x512xf32>
    %334 = vector.extract_strided_slice %333 {offsets = [0, 0], sizes = [8, 384], strides = [1, 1]} : vector<8x512xf32> to vector<8x384xf32>
    %335 = arith.negf %334 : vector<8x384xf32>
    %336 = math.exp %335 : vector<8x384xf32>
    %cst_109 = arith.constant 1.000000e+00 : f32
    %337 = vector.broadcast %cst_109 : f32 to vector<8x384xf32>
    %338 = arith.addf %337, %336 : vector<8x384xf32>
    %339 = arith.divf %337, %338 : vector<8x384xf32>
    %340 = vector.extract_strided_slice %333 {offsets = [0, 384], sizes = [8, 128], strides = [1, 1]} : vector<8x512xf32> to vector<8x128xf32>
    %341 = math.tanh %340 : vector<8x128xf32>
    %342 = vector.extract_strided_slice %339 {offsets = [0, 128], sizes = [8, 128], strides = [1, 1]} : vector<8x384xf32> to vector<8x128xf32>
    %343 = arith.mulf %342, %325 : vector<8x128xf32>
    %344 = vector.extract_strided_slice %339 {offsets = [0, 0], sizes = [8, 128], strides = [1, 1]} : vector<8x384xf32> to vector<8x128xf32>
    %345 = arith.mulf %344, %341 : vector<8x128xf32>
    %346 = arith.addf %343, %345 : vector<8x128xf32>
    %347 = vector.extract_strided_slice %339 {offsets = [0, 256], sizes = [8, 128], strides = [1, 1]} : vector<8x384xf32> to vector<8x128xf32>
    %348 = math.tanh %346 : vector<8x128xf32>
    %349 = arith.mulf %347, %348 : vector<8x128xf32>
    %c48_110 = arith.constant 48 : index
    %c0_111 = arith.constant 0 : index
    %350 = vector.load %arg15[%c48_110, %c0_111] : memref<64x128xf32, #tpu.memory_space<vmem>>, vector<8x128xf32>
    tpu.vector_store %arg15[%c48_110, %c0_111], %349 {strides = array<i32>} : memref<64x128xf32, #tpu.memory_space<vmem>>, vector<8x128xf32>,
    %c56_112 = arith.constant 56 : index
    %c0_113 = arith.constant 0 : index
    %351 = vector.load %arg14[%c56_112, %c0_113] : memref<64x512xf32, #tpu.memory_space<vmem>>, vector<8x512xf32>
    %352 = arith.truncf %349 : vector<8x128xf32> to vector<8x128xbf16>
    %cst_114 = arith.constant dense<0.000000e+00> : vector<8x512xf32>
    %353 = tpu.matmul %352, %201, %cst_114 {dimension_numbers = #tpu.dot_dimension_numbers<[1], [0], [0], [1], [0, 0, 1, 1], [], []>} : vector<8x128xbf16>, vector<128x512xbf16>, vector<8x512xf32> -> vector<8x512xf32>
    %354 = arith.addf %351, %353 : vector<8x512xf32>
    %355 = vector.extract_strided_slice %354 {offsets = [0, 0], sizes = [8, 384], strides = [1, 1]} : vector<8x512xf32> to vector<8x384xf32>
    %356 = arith.negf %355 : vector<8x384xf32>
    %357 = math.exp %356 : vector<8x384xf32>
    %cst_115 = arith.constant 1.000000e+00 : f32
    %358 = vector.broadcast %cst_115 : f32 to vector<8x384xf32>
    %359 = arith.addf %358, %357 : vector<8x384xf32>
    %360 = arith.divf %358, %359 : vector<8x384xf32>
    %361 = vector.extract_strided_slice %354 {offsets = [0, 384], sizes = [8, 128], strides = [1, 1]} : vector<8x512xf32> to vector<8x128xf32>
    %362 = math.tanh %361 : vector<8x128xf32>
    %363 = vector.extract_strided_slice %360 {offsets = [0, 128], sizes = [8, 128], strides = [1, 1]} : vector<8x384xf32> to vector<8x128xf32>
    %364 = arith.mulf %363, %346 : vector<8x128xf32>
    %365 = vector.extract_strided_slice %360 {offsets = [0, 0], sizes = [8, 128], strides = [1, 1]} : vector<8x384xf32> to vector<8x128xf32>
    %366 = arith.mulf %365, %362 : vector<8x128xf32>
    %367 = arith.addf %364, %366 : vector<8x128xf32>
    %368 = vector.extract_strided_slice %360 {offsets = [0, 256], sizes = [8, 128], strides = [1, 1]} : vector<8x384xf32> to vector<8x128xf32>
    %369 = math.tanh %367 : vector<8x128xf32>
    %370 = arith.mulf %368, %369 : vector<8x128xf32>
    %c56_116 = arith.constant 56 : index
    %c0_117 = arith.constant 0 : index
    %371 = vector.load %arg15[%c56_116, %c0_117] : memref<64x128xf32, #tpu.memory_space<vmem>>, vector<8x128xf32>
    tpu.vector_store %arg15[%c56_116, %c0_117], %370 {strides = array<i32>} : memref<64x128xf32, #tpu.memory_space<vmem>>, vector<8x128xf32>,
    %c0_118 = arith.constant 0 : index
    %c0_119 = arith.constant 0 : index
    %372 = vector.load %arg15[%c0_118, %c0_119] : memref<64x128xf32, #tpu.memory_space<vmem>>, vector<64x128xf32>
    %c0_120 = arith.constant 0 : index
    %c0_121 = arith.constant 0 : index
    %373 = vector.load %arg9[%c0_120, %c0_121] : memref<1x128xf32, #tpu.memory_space<vmem>>, vector<1x128xf32>
    %374 = vector.broadcast %373 : vector<1x128xf32> to vector<64x128xf32>
    %375 = arith.mulf %372, %374 : vector<64x128xf32>
    %cst_122 = arith.constant dense<0.000000e+00> : vector<64xf32>
    %376 = vector.multi_reduction <add>, %375, %cst_122 [1] : vector<64x128xf32> to vector<64xf32>
    %377 = vector.shape_cast %376 : vector<64xf32> to vector<64x1xf32>
    %c0_123 = arith.constant 0 : index
    %c0_124 = arith.constant 0 : index
    %378 = vector.load %arg10[%c0_123, %c0_124] : memref<1x1xf32, #tpu.memory_space<vmem>>, vector<1x1xf32>
    %379 = vector.broadcast %378 : vector<1x1xf32> to vector<64x1xf32>
    %380 = arith.addf %377, %379 : vector<64x1xf32>
    %c0_125 = arith.constant 0 : index
    %c0_126 = arith.constant 0 : index
    %381 = vector.load %arg11[%c0_125, %c0_126] : memref<64x1xf32, #tpu.memory_space<vmem>>, vector<64x1xf32>
    tpu.vector_store %arg11[%c0_125, %c0_126], %380 {strides = array<i32>} : memref<64x1xf32, #tpu.memory_space<vmem>>, vector<64x1xf32>,
    return
  }
}

</mosaic_0001>

<bundles_post_ra>
// kernel: lstm_forecast_forward.1
= control target key start
LH: loop header
LB: loop body
LE: loop exit
PB: predicated region body
PF: predicated region fallthrough
CT: control target
= control target key end

     0   :  { %s5849_s0 = inlined_call_operand.vmem [shape: f32[64,10], index: 0, kind: input, shape index: {}]   ;;  %s5850_s1 = inlined_call_operand.vmem [shape: f32[64,256], index: 1, kind: input, shape index: {}]   ;;  %s5851_s2 = inlined_call_operand.vmem [shape: f32[64,1], index: 2, kind: input, shape index: {}]   ;;  %s5852_s3 = inlined_call_operand.vmem [shape: f32[8,512], index: 3, kind: input, shape index: {}]   ;;  %s5853_s4 = inlined_call_operand.hbm [shape: f32[1,512], index: 4, kind: input, shape index: {}]   ;;  %s5854_s5 = inlined_call_operand.hbm [shape: bf16[128,512], index: 5, kind: input, shape index: {}]   ;;  %s5855_s6 = inlined_call_operand.hbm [shape: f32[128,512], index: 6, kind: input, shape index: {}]   ;;  %s5856_s7 = inlined_call_operand.hbm [shape: bf16[128,512], index: 7, kind: input, shape index: {}]   ;;  %s5857_s8 = inlined_call_operand.hbm [shape: f32[1,512], index: 8, kind: input, shape index: {}]   ;;  %s5858_s9 = inlined_call_operand.vmem [shape: f32[1,128], index: 9, kind: input, shape index: {}]   ;;  %s5859_s10 = inlined_call_operand.<no memory space> [shape: f32[1,1], index: 10, kind: input, shape index: {}]   ;;  %s5860_s11 = inlined_call_operand.vmem [shape: f32[64,1], index: 11, kind: output, shape index: {}]  }
   0x1   :  { %v16_v0 = vstv %s5859_s10 }
   0x2   :  { %17 = vst [vmem:[#allocation6] sm:$0x1] %v16_v0 }
   0x3   :  { %18 = vsyncpa [#allocation8], 0 }
   0x4   :  { %19 = vsyncpa [#allocation10], 0  ;;  %s44_s21 = sshll.u32 %s5854_s5, 4  ;;  %s45_s21 = int_to_ptr.hbm [resolvable:$true] %s44_s21 }
   0x5   :  { %20 = vsyncpa [#allocation13], 0  ;;  %s4284_s22 = smov [#allocation9]   ;;  %s70_s26 = sshll.u32 %s5856_s7, 4  ;;  %s71_s26 = int_to_ptr.hbm [resolvable:$true] %s70_s26 }
   0x6   :  { %s46_s23 = sshll.u32 %s4284_s22, 4  ;;  %s4285_s27 = smov 256   ;;  %s47_s23 = int_to_ptr.vmem [resolvable:$true] %s46_s23 }
   0x7   :  { %s4286_s28 = smov 16   ;;  %s4287_s10 = smov [#allocation12]  }
   0x8   :  { %52 = dma.hbm_to_vmem [thread:$0]  %s45_s21, 4096, %s47_s23, [#allocation10], %s4285_s27, %s4285_s27, %s4286_s28  }
   0x9   :  { %s72_s29 = sshll.u32 %s4287_s10, 4  ;;  %s34_s13 = sshll.u32 %s5853_s4, 4  ;;  %s73_s29 = int_to_ptr.vmem [resolvable:$true] %s72_s29  ;;  %s35_s13 = int_to_ptr.hbm [resolvable:$true] %s34_s13 }
   0xa   :  { %78 = dma.hbm_to_vmem [thread:$0]  %s71_s26, 4096, %s73_s29, [#allocation13], %s4285_s27, %s4285_s27, %s4286_s28  }
   0xb   :  { %s57_s15 = sshll.u32 %s5855_s6, 4  ;;  %s4288_s16 = smov [#allocation7]   ;;  %s58_s15 = int_to_ptr.hbm [resolvable:$true] %s57_s15 }
   0xc   :  { %s36_s17 = sshll.u32 %s4288_s16, 4  ;;  %s4289_s7 = smov [#allocation11]   ;;  %s37_s17 = int_to_ptr.vmem [resolvable:$true] %s36_s17 }
   0xd   :  { %39 = dma.hbm_to_vmem [thread:$0]  %s35_s13, 64, %s37_s17, [#allocation8]  }
   0xe   :  { %s59_s18 = sshll.u32 %s4289_s7, 4  ;;  %s4290_s19 = smov 512   ;;  %s60_s18 = int_to_ptr.vmem [resolvable:$true] %s59_s18 }
   0xf   :  { %s4291_s20 = smov 32   ;;  %s84_s22 = sshll.u32 %s5857_s8, 4  ;;  %s85_s22 = int_to_ptr.hbm [resolvable:$true] %s84_s22 }
  0x10   :  { %65 = dma.hbm_to_vmem [thread:$0]  %s58_s15, 8192, %s60_s18, [#allocation10], %s4290_s19, %s4290_s19, %s4291_s20  }
  0x11   :  { %s4292_s23 = smov [#allocation14]  }
  0x12   :  { %s86_s24 = sshll.u32 %s4292_s23, 4  ;;  %s87_s24 = int_to_ptr.vmem [resolvable:$true] %s86_s24 }
  0x13   :  { %89 = dma.hbm_to_vmem [thread:$0]  %s85_s22, 64, %s87_s24, [#allocation13]  }
  0x14   :  { %4278 = dma.done.wait [#allocation8], 64  }
  0x15   :  { %4279 = vsyncadd [#allocation8], 4294967232 }
  0x16   :  { %4280 = dma.done.wait [#allocation10], 12288  }
  0x17   :  { %4281 = vsyncadd [#allocation10], 4294955008 }
  0x18   :  { %4282 = dma.done.wait [#allocation13], 4160  }
  0x19   :  { %4283 = vsyncadd [#allocation13], 4294963136  ;;  %v4379_v1 = vld [vmem:[%s5849_s0 + $0x30] sm:$0xff]  ;;  %v4384_v2 = vld [vmem:[%s5849_s0 + $0x38] sm:$0xff]  ;;  %s4293_s14 = smov 127   ;;  %s4294_s15 = smov 125  }
  0x1a   :  { %v4389_v3 = vld [vmem:[%s5849_s0 + $0x20] sm:$0xff]  ;;  %v3835_v4 = vpack.i.bf16 %v4379_v1, %v4384_v2  ;;  %v4396_v5 = vld [vmem:[%s5849_s0 + $0x28] sm:$0xff]  ;;  %v4403_v7 = vld [vmem:[%s5849_s0 + $0x10] sm:$0xff]  ;;  %s4295_s19 = smov 126   ;;  %v5861_v25 = vmov 0   ;;  %vm445_vm0 = vcmask 7168  }
  0x1b   :  { %v3845_v6 = vpack.i.bf16 %v4389_v3, %v4396_v5  ;;  %v4408_v8 = vld [vmem:[%s5849_s0 + $0x18] sm:$0xff]  ;;  %v4418_v10 = vld [vmem:[%s5849_s0] sm:$0xff]  ;;  %v4423_v11 = vld [vmem:[%s5849_s0 + $0x8] sm:$0xff]  ;;  %3895 = vset.pattern.permute.xlu0 %v5861_v25  ;;  %3896 = vset.pattern.permute.xlu1 %v5861_v25  ;;  %vm454_vm1 = vcmask 56320   ;;  %vm477_vm2 = vcmask 64512  }
  0x1c   :  { %3836 = vrot.lane.b32.xlu0 %v3835_v4, %s4293_s14  ;;  %v3855_v9 = vpack.i.bf16 %v4403_v7, %v4408_v8  ;;  %v3865_v12 = vpack.i.bf16 %v4418_v10, %v4423_v11  ;;  %v219_v26 = vld [vmem:[%s5851_s2] sm:$0xff]  ;;  %3897 = vset.pattern.permute.xlu2 %v5861_v25  ;;  %v224_v36 = vld [vmem:[%s5851_s2 + $0x28] sm:$0xff]  ;;  %v222_v55 = vld [vmem:[%s5851_s2 + $0x18] sm:$0xff] }
  0x1d   :  { %3846 = vrot.lane.b32.xlu1 %v3845_v6, %s4293_s14  ;;  %v220_v43 = vld [vmem:[%s5851_s2 + $0x8] sm:$0xff]  ;;  %v203_v51 = vld [vmem:[%s5850_s1] sm:$0xff]  ;;  %v205_v56 = vld [vmem:[%s5850_s1 + $0x10] sm:$0xff] }
  0x1e   :  { %3856 = vrot.lane.b32.xlu2 %v3855_v9, %s4293_s14  ;;  %v204_v54 = vld [vmem:[%s5850_s1 + $0x8] sm:$0xff]  ;;  %v206_v57 = vld [vmem:[%s5850_s1 + $0x18] sm:$0xff]  ;;  %v207_v58 = vld [vmem:[%s5850_s1 + $0x20] sm:$0xff] }
  0x1f   :  { %v208_v59 = vld [vmem:[%s5850_s1 + $0x28] sm:$0xff]  ;;  %v221_v60 = vld [vmem:[%s5851_s2 + $0x10] sm:$0xff]  ;;  %v210_v62 = vld [vmem:[%s5850_s1 + $0x38] sm:$0xff] }
  0x20   :  { %v209_v61 = vld [vmem:[%s5850_s1 + $0x30] sm:$0xff]  ;;  %v223_v63 = vld [vmem:[%s5851_s2 + $0x20] sm:$0xff] }
  0x21   :  { %v211_v0 = vld [vmem:[%s5850_s1 + $0x40] sm:$0xff] }
  0x24   :  { %3841 = vrot.lane.b32.xlu0 %v3835_v4, %s4294_s15 }
  0x25   :  { %3851 = vrot.lane.b32.xlu1 %v3845_v6, %s4294_s15 }
  0x26   :  { %3861 = vrot.lane.b32.xlu2 %v3855_v9, %s4294_s15 }
  0x2c   :  { %3866 = vrot.lane.b32.xlu0 %v3865_v12, %s4293_s14 }
  0x2d   :  { %3871 = vrot.lane.b32.xlu1 %v3865_v12, %s4294_s15 }
  0x2e   :  { %3876 = vrot.lane.b32.xlu2 %v3835_v4, %s4295_s19  ;;  %v214_v4 = vld [vmem:[%s5850_s1 + $0x58] sm:$0xff] }
  0x34   :  { %3881 = vrot.lane.b32.xlu0 %v3845_v6, %s4295_s19  ;;  %v216_v6 = vld [vmem:[%s5850_s1 + $0x68] sm:$0xff] }
  0x35   :  { %3886 = vrot.lane.b32.xlu1 %v3855_v9, %s4295_s19 }
  0x36   :  { %3891 = vrot.lane.b32.xlu2 %v3865_v12, %s4295_s19 }
  0x3c   :  { %229 = vperm.xlu0 %3895, %v219_v26  }
  0x3d   :  { %234 = vperm.xlu1 %3896, %v220_v43  }
  0x3e   :  { %239 = vperm.xlu2 %3897, %v221_v60   ;;  %v3785_v60 = vld [vmem:[#allocation9 + $0xe4] sm:$0xf] }
  0x44   :  { %254 = vperm.xlu0 %3895, %v224_v36  }
  0x45   :  { %244 = vperm.xlu1 %3896, %v222_v55  }
  0x46   :  { %249 = vperm.xlu2 %3897, %v223_v63   ;;  %v3569_v63 = vld [vmem:[#allocation9 + $0xf0] sm:$0xf0] }
  0x78   :  { %v3857_v14 = vpop.permute.xlu2 %3856 }
  0x79   :  { %v3858_v20 = vunpack.i.l.bf16 %v3857_v14  ;;  %v3859_v27 = vunpack.i.h.bf16 %v3857_v14 }
  0x80   :  { %v3862_v24 = vpop.permute.xlu2 %3861 }
  0x81   :  { %v3863_v31 = vunpack.i.l.bf16 %v3862_v24  ;;  %v3864_v37 = vunpack.i.h.bf16 %v3862_v24 }
  0x88   :  { %v3877_v39 = vpop.permute.xlu2 %3876 }
  0x89   :  { %v3878_v41 = vunpack.i.l.bf16 %v3877_v39  ;;  %v3879_v44 = vunpack.i.h.bf16 %v3877_v39 }
  0x8e   :  { %v3837_v13 = vpop.permute.xlu0 %3836 }
  0x8f   :  { %v3838_v15 = vunpack.i.l.bf16 %v3837_v13  ;;  %v3847_v16 = vpop.permute.xlu1 %3846  ;;  %v3839_v17 = vunpack.i.h.bf16 %v3837_v13 }
  0x90   :  { %v3848_v18 = vunpack.i.l.bf16 %v3847_v16  ;;  %v3849_v19 = vunpack.i.h.bf16 %v3847_v16  ;;  %v3892_v49 = vpop.permute.xlu2 %3891 }
  0x91   :  { %267 = vmatpush.msra.mxu0 %v3838_v15  ;;  %v3893_v52 = vunpack.i.l.bf16 %v3892_v49  ;;  %v3894_v53 = vunpack.i.h.bf16 %v3892_v49 }
  0x93   :  { %268 = vmatpush.msra.mxu0 %v3839_v17 }
  0x95   :  { %269 = vmatpush.msra.mxu0 %v3848_v18  ;;  %v226_v18 = vld [vmem:[%s5851_s2 + $0x38] sm:$0xff] }
  0x96   :  { %v3842_v21 = vpop.permute.xlu0 %3841 }
  0x97   :  { %270 = vmatpush.msra.mxu0 %v3849_v19  ;;  %v3843_v22 = vunpack.i.l.bf16 %v3842_v21  ;;  %v3852_v23 = vpop.permute.xlu1 %3851  ;;  %v3844_v28 = vunpack.i.h.bf16 %v3842_v21 }
  0x98   :  { %v3853_v29 = vunpack.i.l.bf16 %v3852_v23  ;;  %v3854_v30 = vunpack.i.h.bf16 %v3852_v23 }
  0x99   :  { %271 = vmatpush.msra.mxu0 %v3858_v20  ;;  %308 = vmatpush.msra.mxu1 %v3843_v22  ;;  %v240_v20 = vpop.permute.xlu2 %239 }
  0x9b   :  { %272 = vmatpush.msra.mxu0 %v3859_v27  ;;  %309 = vmatpush.msra.mxu1 %v3844_v28 }
  0x9d   :  { %310 = vmatpush.msra.mxu1 %v3853_v29 }
  0x9e   :  { %v3867_v32 = vpop.permute.xlu0 %3866 }
  0x9f   :  { %311 = vmatpush.msra.mxu1 %v3854_v30  ;;  %v3868_v33 = vunpack.i.l.bf16 %v3867_v32  ;;  %v3872_v34 = vpop.permute.xlu1 %3871  ;;  %v3869_v35 = vunpack.i.h.bf16 %v3867_v32 }
  0xa0   :  { %v3873_v38 = vunpack.i.l.bf16 %v3872_v34  ;;  %v3874_v40 = vunpack.i.h.bf16 %v3872_v34 }
  0xa1   :  { %273 = vmatpush.msra.mxu0 %v3868_v33  ;;  %312 = vmatpush.msra.mxu1 %v3863_v31  ;;  %v250_v31 = vpop.permute.xlu2 %249 }
  0xa3   :  { %274 = vmatpush.msra.mxu0 %v3869_v35  ;;  %313 = vmatpush.msra.mxu1 %v3864_v37 }
  0xa5   :  { %275 = vmatpush.msra.mxu0 %v4384_v2  ;;  %314 = vmatpush.msra.mxu1 %v3873_v38  ;;  %v225_v2 = vld [vmem:[%s5851_s2 + $0x30] sm:$0xff] }
  0xa6   :  { %v3882_v42 = vpop.permute.xlu0 %3881  ;;  %259 = vperm.xlu2 %3897, %v225_v2   ;;  %v4558_v2 = vor.u32 %v3785_v60, %v3569_v63 }
  0xa7   :  { %276 = vmatpush.msra.mxu0 %v4379_v1  ;;  %315 = vmatpush.msra.mxu1 %v3874_v40  ;;  %v3883_v45 = vunpack.i.l.bf16 %v3882_v42  ;;  %v3887_v46 = vpop.permute.xlu1 %3886  ;;  %v3884_v47 = vunpack.i.h.bf16 %v3882_v42  ;;  %v212_v1 = vld [vmem:[%s5850_s1 + $0x48] sm:$0xff] }
  0xa8   :  { %v3888_v48 = vunpack.i.l.bf16 %v3887_v46  ;;  %v3889_v50 = vunpack.i.h.bf16 %v3887_v46 }
  0xa9   :  { %277 = vmatpush.msra.mxu0 %v4396_v5  ;;  %316 = vmatpush.msra.mxu1 %v3878_v41  ;;  %v215_v5 = vld [vmem:[%s5850_s1 + $0x60] sm:$0xff] }
  0xab   :  { %278 = vmatpush.msra.mxu0 %v4389_v3  ;;  %317 = vmatpush.msra.mxu1 %v3879_v44  ;;  %v213_v3 = vld [vmem:[%s5850_s1 + $0x50] sm:$0xff] }
  0xad   :  { %279 = vmatpush.msra.mxu0 %v4408_v8  ;;  %318 = vmatpush.msra.mxu1 %v3883_v45  ;;  %v218_v8 = vld [vmem:[%s5850_s1 + $0x78] sm:$0xff] }
  0xae   :  { %v230_v9 = vpop.permute.xlu0 %229 }
  0xaf   :  { %280 = vmatpush.msra.mxu0 %v4403_v7  ;;  %319 = vmatpush.msra.mxu1 %v3884_v47  ;;  %v217_v7 = vld [vmem:[%s5850_s1 + $0x70] sm:$0xff]  ;;  %v235_v14 = vpop.permute.xlu1 %234  ;;  %s4297_s1 = smov 1  }
  0xb1   :  { %281 = vmatpush.msra.mxu0 %v4423_v11  ;;  %320 = vmatpush.msra.mxu1 %v3888_v48 }
  0xb3   :  { %282 = vmatpush.msra.mxu0 %v4418_v10  ;;  %321 = vmatpush.msra.mxu1 %v3889_v50 }
  0xb4   :  { %283 = vmatmul.f32.vlgmr.msra.gmra.mxu0 %v203_v51 }
  0xb5   :  { %322 = vmatpush.msra.mxu1 %v3893_v52 }
  0xb6   :  { %v255_v37 = vpop.permute.xlu0 %254 }
  0xb7   :  { %323 = vmatpush.msra.mxu1 %v3894_v53  ;;  %v245_v26 = vpop.permute.xlu1 %244 }
  0xb8   :  { %324 = vmatmul.f32.vlgmr.msra.gmra.mxu1 %v204_v54 }
  0xb9   :  { %907 = vmatpush.bf16.msrb.mxu1 %v4558_v2 }
  0xbc   :  { %286 = vmatmul.f32.gmra.mxu0 %v205_v56 }
  0xc0   :  { %327 = vmatmul.f32.gmra.mxu1 %v206_v57 }
  0xc4   :  { %289 = vmatmul.f32.gmra.mxu0 %v207_v58  ;;  %v3567_v58 = vld [vmem:[#allocation9 + $0xe0] sm:$0xf] }
  0xc8   :  { %330 = vmatmul.f32.gmra.mxu1 %v208_v59  ;;  %v3787_v59 = vld [vmem:[#allocation9 + $0xec] sm:$0xf0] }
  0xcc   :  { %292 = vmatmul.f32.gmra.mxu0 %v209_v61 }
  0xd0   :  { %333 = vmatmul.f32.gmra.mxu1 %v210_v62  ;;  %v4556_v62 = vor.u32 %v3787_v59, %v3567_v58 }
  0xd2   :  { %894 = vmatpush.bf16.msrb.mxu0 %v4556_v62 }
  0xd4   :  { %295 = vmatmul.f32.gmra.mxu0 %v211_v0  ;;  %v3551_v0 = vld [vmem:[#allocation9 + $0xc0] sm:$0xf] }
  0xd8   :  { %336 = vmatmul.f32.gmra.mxu1 %v212_v1  ;;  %v3783_v1 = vld [vmem:[#allocation9 + $0xcc] sm:$0xf0] }
  0xdc   :  { %298 = vmatmul.f32.gmra.mxu0 %v213_v3  ;;  %v3781_v3 = vld [vmem:[#allocation9 + $0xc4] sm:$0xf] }
  0xe0   :  { %339 = vmatmul.f32.gmra.mxu1 %v214_v4  ;;  %v3553_v4 = vld [vmem:[#allocation9 + $0xd0] sm:$0xf0] }
  0xe4   :  { %301 = vmatmul.f32.gmra.mxu0 %v215_v5 }
  0xe8   :  { %342 = vmatmul.f32.gmra.mxu1 %v216_v6  ;;  %v4565_v6 = vor.u32 %v3783_v1, %v3551_v0 }
  0xea   :  { %895 = vmatpush.bf16.msrb.mxu0 %v4565_v6 }
  0xec   :  { %304 = vmatmul.f32.gmra.mxu0 %v217_v7  ;;  %v4567_v7 = vor.u32 %v3781_v3, %v3553_v4 }
  0xee   :  { %908 = vmatpush.bf16.msrb.mxu1 %v4567_v7 }
  0xf0   :  { %345 = vmatmul.f32.gmra.mxu1 %v218_v8 }
 0x100   :  { %v260_v41 = vpop.permute.xlu2 %259 }
 0x131   :  { %v284_v10 = vpop.f32.mrf.mxu0 }
 0x132   :  { %v285_v11 = vadd.f32 %v284_v10, %v230_v9 }
 0x135   :  { %v325_v12 = vpop.f32.mrf.mxu1 }
 0x136   :  { %v4508_v13 = vadd.f32 %v325_v12, %v285_v11 }
 0x138   :  { %357 = vrot.lane.b32.xlu1 %v4508_v13, %s4293_s14 }
 0x139   :  { %v287_v15 = vpop.f32.mrf.mxu0 }
 0x13a   :  { %v288_v16 = vadd.f32 %v287_v15, %v235_v14  ;;  %v3535_v14 = vld [vmem:[#allocation9 + $0xa0] sm:$0xf]  ;;  %v3779_v15 = vld [vmem:[#allocation9 + $0xac] sm:$0xf0] }
 0x13d   :  { %v328_v17 = vpop.f32.mrf.mxu1 }
 0x13e   :  { %v4515_v19 = vadd.f32 %v328_v17, %v288_v16  ;;  %v3777_v16 = vld [vmem:[#allocation9 + $0xa4] sm:$0xf]  ;;  %v4585_v17 = vor.u32 %v3779_v15, %v3535_v14  ;;  %v466_v14 = vld [vmem:[%s5852_s3 + $0x18] sm:$0xff]  ;;  %v3575_v15 = vld [vmem:[#allocation9 + $0xe8] sm:$0xf] }
 0x140   :  { %359 = vrot.lane.b32.xlu0 %v4515_v19, %s4293_s14  ;;  %264 = vperm.xlu1 %3896, %v226_v18   ;;  %v3537_v18 = vld [vmem:[#allocation9 + $0xb0] sm:$0xf0] }
 0x141   :  { %v290_v21 = vpop.f32.mrf.mxu0  ;;  %896 = vmatpush.bf16.msrb.mxu0 %v4585_v17 }
 0x142   :  { %v291_v22 = vadd.f32 %v290_v21, %v240_v20  ;;  %v4587_v20 = vor.u32 %v3777_v16, %v3537_v18  ;;  %v3519_v21 = vld [vmem:[#allocation9 + $0x80] sm:$0xf]  ;;  %v3788_v16 = vld [vmem:[#allocation9 + $0xf4] sm:$0xf0] }
 0x144   :  { %909 = vmatpush.bf16.msrb.mxu1 %v4587_v20 }
 0x145   :  { %v331_v23 = vpop.f32.mrf.mxu1 }
 0x146   :  { %v4519_v24 = vadd.f32 %v331_v23, %v291_v22  ;;  %v3775_v22 = vld [vmem:[#allocation9 + $0x8c] sm:$0xf0]  ;;  %v3773_v23 = vld [vmem:[#allocation9 + $0x84] sm:$0xf] }
 0x148   :  { %361 = vrot.lane.b32.xlu2 %v4519_v24, %s4293_s14 }
 0x149   :  { %v293_v27 = vpop.f32.mrf.mxu0 }
 0x14a   :  { %v294_v28 = vadd.f32 %v293_v27, %v245_v26  ;;  %v4591_v26 = vor.u32 %v3775_v22, %v3519_v21  ;;  %v3521_v27 = vld [vmem:[#allocation9 + $0x90] sm:$0xf0]  ;;  %v3559_v21 = vld [vmem:[#allocation9 + $0xc8] sm:$0xf]  ;;  %v3784_v22 = vld [vmem:[#allocation9 + $0xd4] sm:$0xf0] }
 0x14c   :  { %897 = vmatpush.bf16.msrb.mxu0 %v4591_v26 }
 0x14d   :  { %v334_v29 = vpop.f32.mrf.mxu1 }
 0x14e   :  { %v4523_v30 = vadd.f32 %v334_v29, %v294_v28  ;;  %v3503_v28 = vld [vmem:[#allocation9 + $0x60] sm:$0xf]  ;;  %v3771_v29 = vld [vmem:[#allocation9 + $0x6c] sm:$0xf0] }
 0x150   :  { %363 = vrot.lane.b32.xlu0 %v4523_v30, %s4293_s14 }
 0x151   :  { %v296_v32 = vpop.f32.mrf.mxu0 }
 0x152   :  { %v297_v33 = vadd.f32 %v296_v32, %v250_v31  ;;  %v4593_v31 = vor.u32 %v3773_v23, %v3521_v27  ;;  %v3769_v32 = vld [vmem:[#allocation9 + $0x64] sm:$0xf]  ;;  %v3786_v23 = vld [vmem:[#allocation9 + $0xec] sm:$0xf]  ;;  %v3577_v27 = vld [vmem:[#allocation9 + $0xf8] sm:$0xf0] }
 0x154   :  { %910 = vmatpush.bf16.msrb.mxu1 %v4593_v31 }
 0x155   :  { %v337_v34 = vpop.f32.mrf.mxu1 }
 0x156   :  { %v4527_v35 = vadd.f32 %v337_v34, %v297_v33  ;;  %v3505_v33 = vld [vmem:[#allocation9 + $0x70] sm:$0xf0]  ;;  %v4596_v34 = vor.u32 %v3771_v29, %v3503_v28  ;;  %v4671_v28 = vor.u32 %v3786_v23, %v3577_v27  ;;  %v3782_v29 = vld [vmem:[#allocation9 + $0xcc] sm:$0xf]  ;;  %v3764_v23 = vld [vmem:[#allocation9 + $0x34] sm:$0xf0] }
 0x157   :  { %v3770_v27 = vld [vmem:[#allocation9 + $0x6c] sm:$0xf] }
 0x158   :  { %365 = vrot.lane.b32.xlu1 %v4527_v35, %s4293_s14  ;;  %898 = vmatpush.bf16.msrb.mxu0 %v4596_v34 }
 0x159   :  { %v299_v36 = vpop.f32.mrf.mxu0 }
 0x15a   :  { %v300_v38 = vadd.f32 %v299_v36, %v255_v37  ;;  %v4599_v36 = vor.u32 %v3769_v32, %v3505_v33  ;;  %v3487_v37 = vld [vmem:[#allocation9 + $0x40] sm:$0xf] }
 0x15c   :  { %911 = vmatpush.bf16.msrb.mxu1 %v4599_v36 }
 0x15d   :  { %v340_v39 = vpop.f32.mrf.mxu1 }
 0x15e   :  { %v4531_v40 = vadd.f32 %v340_v39, %v300_v38  ;;  %v3767_v38 = vld [vmem:[#allocation9 + $0x4c] sm:$0xf0]  ;;  %v3765_v39 = vld [vmem:[#allocation9 + $0x44] sm:$0xf] }
 0x160   :  { %367 = vrot.lane.b32.xlu2 %v4531_v40, %s4293_s14  ;;  %421 = vrot.lane.b32.xlu1 %v4508_v13, %s4297_s1 }
 0x161   :  { %v302_v42 = vpop.f32.mrf.mxu0 }
 0x162   :  { %v303_v43 = vadd.f32 %v302_v42, %v260_v41  ;;  %v3489_v41 = vld [vmem:[#allocation9 + $0x50] sm:$0xf0]  ;;  %v4602_v42 = vor.u32 %v3767_v38, %v3487_v37  ;;  %v4675_v37 = vor.u32 %v3784_v22, %v3559_v21  ;;  %v3561_v38 = vld [vmem:[#allocation9 + $0xd8] sm:$0xf0]  ;;  %v3479_v22 = vld [vmem:[#allocation9 + $0x28] sm:$0xf] }
 0x164   :  { %899 = vmatpush.bf16.msrb.mxu0 %v4602_v42 }
 0x165   :  { %v343_v44 = vpop.f32.mrf.mxu1 }
 0x166   :  { %v4537_v45 = vadd.f32 %v343_v44, %v303_v43  ;;  %v4605_v43 = vor.u32 %v3765_v39, %v3489_v41  ;;  %v463_v44 = vld [vmem:[%s5852_s3] sm:$0xff]  ;;  %v3543_v41 = vld [vmem:[#allocation9 + $0xa8] sm:$0xf] }
 0x167   :  { %517 = vmatpush.msra.mxu2 %v463_v44  ;;  %v3780_v44 = vld [vmem:[#allocation9 + $0xb4] sm:$0xf0] }
 0x168   :  { %369 = vrot.lane.b32.xlu2 %v4537_v45, %s4293_s14  ;;  %423 = vrot.lane.b32.xlu1 %v4515_v19, %s4297_s1 }
 0x169   :  { %v305_v48 = vpop.f32.mrf.mxu0  ;;  %912 = vmatpush.bf16.msrb.mxu1 %v4605_v43 }
 0x16d   :  { %v346_v49 = vpop.f32.mrf.mxu1 }
 0x170   :  { %425 = vrot.lane.b32.xlu1 %v4519_v24, %s4297_s1 }
 0x1a2   :  { %v362_v55 = vpop.permute.xlu2 %361 }
 0x1a3   :  { %v383_v56 = vmax.f32 %v4519_v24, %v362_v55  ;;  %v3759_v55 = vld [vmem:[#allocation9 + $0xc] sm:$0xf0] }
 0x1aa   :  { %v358_v46 = vpop.permute.xlu1 %357 }
 0x1ab   :  { %v381_v47 = vmax.f32 %v4508_v13, %v358_v46  ;;  %v464_v46 = vld [vmem:[%s5852_s3 + $0x8] sm:$0xff] }
 0x1ac   :  { %558 = vmatpush.msra.mxu3 %v464_v46  ;;  %v4681_v46 = vor.u32 %v3782_v29, %v3561_v38  ;;  %v4746_v29 = vor.u32 %v3764_v23, %v3479_v22  ;;  %v3760_v38 = vld [vmem:[#allocation9 + $0x14] sm:$0xf0] }
 0x1ad   :  { %397 = vrot.lane.b32.xlu0 %v381_v47, %s4297_s1  ;;  %v3471_v47 = vld [vmem:[#allocation9 + $0x20] sm:$0xf] }
 0x1ae   :  { %640 = vmatpush.msrb.mxu3 %v466_v14 }
 0x1b2   :  { %v360_v50 = vpop.permute.xlu0 %359  ;;  %v265_v51 = vpop.permute.xlu1 %264 }
 0x1b3   :  { %v382_v52 = vmax.f32 %v4515_v19, %v360_v50  ;;  %v306_v53 = vadd.f32 %v305_v48, %v265_v51  ;;  %v3763_v48 = vld [vmem:[#allocation9 + $0x2c] sm:$0xf0]  ;;  %v3761_v50 = vld [vmem:[#allocation9 + $0x24] sm:$0xf]  ;;  %v3473_v51 = vld [vmem:[#allocation9 + $0x30] sm:$0xf0] }
 0x1b5   :  { %v4548_v54 = vadd.f32 %v346_v49, %v306_v53  ;;  %399 = vrot.lane.b32.xlu0 %v382_v52, %s4297_s1  ;;  %v4615_v49 = vor.u32 %v3763_v48, %v3471_v47  ;;  %v3455_v52 = vld [vmem:[#allocation9] sm:$0xf]  ;;  %v4617_v53 = vor.u32 %v3761_v50, %v3473_v51  ;;  %v3778_v47 = vld [vmem:[#allocation9 + $0xac] sm:$0xf]  ;;  %v3545_v48 = vld [vmem:[#allocation9 + $0xb8] sm:$0xf0] }
 0x1b6   :  { %v4620_v58 = vor.u32 %v3759_v55, %v3455_v52  ;;  %v3527_v50 = vld [vmem:[#allocation9 + $0x88] sm:$0xf]  ;;  %v4693_v51 = vor.u32 %v3778_v47, %v3545_v48  ;;  %v3776_v52 = vld [vmem:[#allocation9 + $0x94] sm:$0xf0]  ;;  %v3774_v55 = vld [vmem:[#allocation9 + $0x8c] sm:$0xf] }
 0x1b7   :  { %371 = vrot.lane.b32.xlu2 %v4548_v54, %s4293_s14  ;;  %900 = vmatpush.bf16.msrb.mxu0 %v4615_v49 }
 0x1b8   :  { %913 = vmatpush.bf16.msrb.mxu1 %v4617_v53 }
 0x1ba   :  { %v368_v5 = vpop.permute.xlu2 %367 }
 0x1bb   :  { %v386_v9 = vmax.f32 %v4531_v40, %v368_v5  ;;  %901 = vmatpush.bf16.msrb.mxu0 %v4620_v58 }
 0x1bd   :  { %401 = vrot.lane.b32.xlu0 %v383_v56, %s4297_s1  ;;  %v3757_v56 = vld [vmem:[#allocation9 + $0x4] sm:$0xf] }
 0x1be   :  { %902 = vmatmul.bf16.vlgmr.msrb.gmra.mxu0 %v5861_v25 }
 0x1c2   :  { %v364_v57 = vpop.permute.xlu0 %363  ;;  %v370_v11 = vpop.permute.xlu2 %369 }
 0x1c3   :  { %v384_v61 = vmax.f32 %v4523_v30, %v364_v57  ;;  %v387_v12 = vmax.f32 %v4537_v45, %v370_v11  ;;  %v3457_v57 = vld [vmem:[#allocation9 + $0x10] sm:$0xf0] }
 0x1c4   :  { %v4623_v59 = vor.u32 %v3757_v56, %v3457_v57  ;;  %v3529_v56 = vld [vmem:[#allocation9 + $0x98] sm:$0xf0] }
 0x1c5   :  { %427 = vrot.lane.b32.xlu0 %v4523_v30, %s4297_s1  ;;  %403 = vrot.lane.b32.xlu2 %v384_v61, %s4297_s1 }
 0x1c6   :  { %914 = vmatpush.bf16.msrb.mxu1 %v4623_v59 }
 0x1c9   :  { %915 = vmatmul.bf16.vlgmr.msrb.gmra.mxu1 %v5861_v25 }
 0x1ca   :  { %v366_v8 = vpop.permute.xlu1 %365  ;;  %933 = vmatpush.bf16.msra.mxu1 %v4671_v28 }
 0x1cb   :  { %v385_v10 = vmax.f32 %v4527_v35, %v366_v8 }
 0x1cd   :  { %407 = vrot.lane.b32.xlu0 %v386_v9, %s4297_s1  ;;  %429 = vrot.lane.b32.xlu2 %v4527_v35, %s4297_s1 }
 0x1ce   :  { %405 = vrot.lane.b32.xlu1 %v385_v10, %s4297_s1  ;;  %934 = vmatpush.bf16.msra.mxu1 %v4681_v46 }
 0x1d2   :  { %v422_v63 = vpop.permute.xlu1 %421  ;;  %935 = vmatpush.bf16.msra.mxu1 %v4693_v51 }
 0x1d5   :  { %433 = vrot.lane.b32.xlu0 %v4537_v45, %s4297_s1  ;;  %409 = vrot.lane.b32.xlu2 %v387_v12, %s4297_s1 }
 0x1d6   :  { %431 = vrot.lane.b32.xlu1 %v4531_v40, %s4297_s1 }
 0x1da   :  { %v424_v4 = vpop.permute.xlu1 %423 }
 0x1dd   :  { %435 = vrot.lane.b32.xlu2 %v4548_v54, %s4297_s1 }
 0x1e2   :  { %v426_v11 = vpop.permute.xlu1 %425 }
 0x211   :  { %v372_v60 = vpop.permute.xlu2 %371 }
 0x212   :  { %v388_v61 = vmax.f32 %v4548_v54, %v372_v60  ;;  %v4698_v60 = vor.u32 %v3776_v52, %v3527_v50  ;;  %v3762_v50 = vld [vmem:[#allocation9 + $0x2c] sm:$0xf]  ;;  %v3481_v52 = vld [vmem:[#allocation9 + $0x38] sm:$0xf0] }
 0x214   :  { %411 = vrot.lane.b32.xlu1 %v388_v61, %s4297_s1  ;;  %v4701_v61 = vor.u32 %v3774_v55, %v3529_v56  ;;  %v4759_v55 = vor.u32 %v3762_v50, %v3481_v52  ;;  %v3758_v56 = vld [vmem:[#allocation9 + $0xc] sm:$0xf] }
 0x216   :  { %936 = vmatpush.bf16.msra.mxu1 %v4701_v61 }
 0x21f   :  { %v398_v0 = vpop.permute.xlu0 %397  ;;  %v404_v18 = vpop.permute.xlu2 %403 }
 0x220   :  { %v446_v1 = vsel %vm445_vm0, %v4508_v13, %v398_v0  ;;  %v465_v13 = vld [vmem:[%s5852_s3 + $0x10] sm:$0xff]  ;;  %v449_v32 = vsel %vm445_vm0, %v4523_v30, %v404_v18  ;;  %v4690_v30 = vor.u32 %v3780_v44, %v3543_v41  ;;  %v3497_v44 = vld [vmem:[#allocation9 + $0x58] sm:$0xf0] }
 0x221   :  { %v4634_v3 = vsel %vm454_vm1, %v446_v1, %v422_v63  ;;  %599 = vmatpush.msrb.mxu2 %v465_v13  ;;  %v3511_v1 = vld [vmem:[#allocation9 + $0x68] sm:$0xf]  ;;  %v3766_v41 = vld [vmem:[#allocation9 + $0x4c] sm:$0xf] }
 0x222   :  { %3421 = vmatmul.msk.f32.vlgmr.msra.gmra.mxu2 %vm477_vm2, %v4634_v3  ;;  %3429 = vmatmul.msk.f32.vlgmr.msra.gmra.mxu3 %vm477_vm2, %v4634_v3  ;;  %v3495_v13 = vld [vmem:[#allocation9 + $0x48] sm:$0xf]  ;;  %v4754_v48 = vor.u32 %v3766_v41, %v3497_v44 }
 0x223   :  { %1019 = vmatpush.bf16.msra.mxu2 %v4556_v62  ;;  %1032 = vmatpush.bf16.msra.mxu3 %v4558_v2 }
 0x227   :  { %v400_v5 = vpop.permute.xlu0 %399  ;;  %1020 = vmatpush.bf16.msra.mxu2 %v4565_v6  ;;  %1033 = vmatpush.bf16.msra.mxu3 %v4567_v7  ;;  %v430_v63 = vpop.permute.xlu2 %429 }
 0x228   :  { %v447_v8 = vsel %vm445_vm0, %v4515_v19, %v400_v5 }
 0x229   :  { %v4643_v9 = vsel %vm454_vm1, %v447_v8, %v424_v4  ;;  %v3772_v4 = vld [vmem:[#allocation9 + $0x74] sm:$0xf0] }
 0x22a   :  { %3422 = vmatmul.msk.f32.gmra.mxu2 %vm477_vm2, %v4643_v9  ;;  %3430 = vmatmul.msk.f32.gmra.mxu3 %vm477_vm2, %v4643_v9  ;;  %v4715_v8 = vor.u32 %v3772_v4, %v3511_v1 }
 0x22b   :  { %1021 = vmatpush.bf16.msra.mxu2 %v4585_v17  ;;  %1034 = vmatpush.bf16.msra.mxu3 %v4587_v20 }
 0x22f   :  { %v402_v10 = vpop.permute.xlu0 %401  ;;  %1022 = vmatpush.bf16.msra.mxu2 %v4591_v26  ;;  %1035 = vmatpush.bf16.msra.mxu3 %v4593_v31 }
 0x230   :  { %v448_v19 = vsel %vm445_vm0, %v4519_v24, %v402_v10  ;;  %v4666_v24 = vor.u32 %v3788_v16, %v3575_v15  ;;  %v3768_v10 = vld [vmem:[#allocation9 + $0x54] sm:$0xf0] }
 0x231   :  { %v4656_v12 = vsel %vm454_vm1, %v448_v19, %v426_v11  ;;  %v4723_v14 = vor.u32 %v3768_v10, %v3495_v13 }
 0x232   :  { %3423 = vmatmul.msk.f32.gmra.mxu2 %vm477_vm2, %v4656_v12  ;;  %3431 = vmatmul.msk.f32.gmra.mxu3 %vm477_vm2, %v4656_v12 }
 0x233   :  { %920 = vmatpush.bf16.msra.mxu0 %v4666_v24  ;;  %1023 = vmatpush.bf16.msra.mxu2 %v4596_v34 }
 0x234   :  { %1036 = vmatpush.bf16.msra.mxu3 %v4599_v36 }
 0x237   :  { %v428_v33 = vpop.permute.xlu0 %427  ;;  %921 = vmatpush.bf16.msra.mxu0 %v4675_v37  ;;  %1024 = vmatpush.bf16.msra.mxu2 %v4602_v42 }
 0x238   :  { %v4678_v39 = vsel %vm454_vm1, %v449_v32, %v428_v33  ;;  %1037 = vmatpush.bf16.msra.mxu3 %v4605_v43  ;;  %v3513_v32 = vld [vmem:[#allocation9 + $0x78] sm:$0xf0]  ;;  %v3463_v33 = vld [vmem:[#allocation9 + $0x8] sm:$0xf] }
 0x239   :  { %v4751_v47 = vor.u32 %v3760_v38, %v3463_v33 }
 0x23a   :  { %3424 = vmatmul.msk.f32.gmra.mxu2 %vm477_vm2, %v4678_v39  ;;  %3432 = vmatmul.msk.f32.gmra.mxu3 %vm477_vm2, %v4678_v39 }
 0x23b   :  { %922 = vmatpush.bf16.msra.mxu0 %v4690_v30  ;;  %1025 = vmatpush.bf16.msra.mxu2 %v4615_v49  ;;  %v4779_v13 = vpop.f32.mrf.mxu0 }
 0x23c   :  { %1038 = vmatpush.bf16.msra.mxu3 %v4617_v53 }
 0x23f   :  { %923 = vmatpush.bf16.msra.mxu0 %v4698_v60  ;;  %1026 = vmatpush.bf16.msra.mxu2 %v4620_v58 }
 0x240   :  { %v406_v57 = vpop.permute.xlu1 %405  ;;  %1039 = vmatpush.bf16.msra.mxu3 %v4623_v59 }
 0x241   :  { %v450_v0 = vsel %vm445_vm0, %v4527_v35, %v406_v57  ;;  %v408_v35 = vpop.permute.xlu0 %407  ;;  %v3465_v57 = vld [vmem:[#allocation9 + $0x18] sm:$0xf0] }
 0x242   :  { %v4708_v5 = vsel %vm454_vm1, %v450_v0, %v430_v63  ;;  %v451_v11 = vsel %vm445_vm0, %v4531_v40, %v408_v35  ;;  %v410_v40 = vpop.permute.xlu2 %409  ;;  %v4763_v63 = vor.u32 %v3758_v56, %v3465_v57 }
 0x243   :  { %3425 = vmatmul.msk.f32.gmra.mxu2 %vm477_vm2, %v4708_v5  ;;  %3433 = vmatmul.msk.f32.gmra.mxu3 %vm477_vm2, %v4708_v5  ;;  %v452_v18 = vsel %vm445_vm0, %v4537_v45, %v410_v40  ;;  %v4748_v45 = vor.u32 %v3770_v27, %v3513_v32 }
 0x244   :  { %924 = vmatpush.bf16.msra.mxu0 %v4715_v8 }
 0x245   :  { %937 = vmatpush.bf16.msra.mxu1 %v4748_v45 }
 0x246   :  { %v4784_v10 = vpop.f32.mrf.mxu1 }
 0x248   :  { %v432_v19 = vpop.permute.xlu1 %431  ;;  %925 = vmatpush.bf16.msra.mxu0 %v4723_v14 }
 0x249   :  { %v4726_v15 = vsel %vm454_vm1, %v451_v11, %v432_v19  ;;  %v434_v16 = vpop.permute.xlu0 %433  ;;  %938 = vmatpush.bf16.msra.mxu1 %v4754_v48 }
 0x24a   :  { %v4740_v21 = vsel %vm454_vm1, %v452_v18, %v434_v16  ;;  %v436_v1 = vpop.permute.xlu2 %435  ;;  %v467_v16 = vld [vmem:[#allocation7] sm:$0xf] }
 0x24b   :  { %3426 = vmatmul.msk.f32.gmra.mxu2 %vm477_vm2, %v4726_v15  ;;  %3434 = vmatmul.msk.f32.gmra.mxu3 %vm477_vm2, %v4726_v15  ;;  %v4865_v18 = vperm.slane %v467_v16, 0 }
 0x24c   :  { %926 = vmatpush.bf16.msra.mxu0 %v4746_v29 }
 0x24d   :  { %939 = vmatpush.bf16.msra.mxu1 %v4759_v55 }
 0x24e   :  { %v918_v11 = vpop.f32.mrf.mxu1 }
 0x250   :  { %927 = vmatpush.bf16.msra.mxu0 %v4751_v47 }
 0x251   :  { %940 = vmatpush.bf16.msra.mxu1 %v4763_v63 }
 0x253   :  { %3427 = vmatmul.msk.f32.gmra.mxu2 %vm477_vm2, %v4740_v21  ;;  %3435 = vmatmul.msk.f32.gmra.mxu3 %vm477_vm2, %v4740_v21 }
 0x254   :  { %1045 = vmatpush.bf16.msrb.mxu0 %v4666_v24  ;;  %941 = vmatmul.bf16.vlgmr.msra.gmra.mxu1 %v5861_v25 }
 0x255   :  { %928 = vmatmul.bf16.vlgmr.msra.gmra.mxu0 %v5861_v25  ;;  %1058 = vmatpush.bf16.msrb.mxu1 %v4671_v28 }
 0x258   :  { %1046 = vmatpush.bf16.msrb.mxu0 %v4675_v37 }
 0x259   :  { %1059 = vmatpush.bf16.msrb.mxu1 %v4681_v46 }
 0x25c   :  { %1047 = vmatpush.bf16.msrb.mxu0 %v4690_v30 }
 0x25d   :  { %1060 = vmatpush.bf16.msrb.mxu1 %v4693_v51 }
 0x260   :  { %1048 = vmatpush.bf16.msrb.mxu0 %v4698_v60 }
 0x261   :  { %1061 = vmatpush.bf16.msrb.mxu1 %v4701_v61 }
 0x264   :  { %1049 = vmatpush.bf16.msrb.mxu0 %v4715_v8 }
 0x265   :  { %1062 = vmatpush.bf16.msrb.mxu1 %v4748_v45 }
 0x268   :  { %1050 = vmatpush.bf16.msrb.mxu0 %v4723_v14 }
 0x269   :  { %1063 = vmatpush.bf16.msrb.mxu1 %v4754_v48 }
 0x26c   :  { %1051 = vmatpush.bf16.msrb.mxu0 %v4746_v29 }
 0x26d   :  { %1064 = vmatpush.bf16.msrb.mxu1 %v4759_v55 }
 0x270   :  { %1052 = vmatpush.bf16.msrb.mxu0 %v4751_v47 }
 0x271   :  { %1065 = vmatpush.bf16.msrb.mxu1 %v4763_v63 }
 0x274   :  { %1170 = vmatpush.bf16.msra.mxu0 %v4666_v24 }
 0x275   :  { %1183 = vmatpush.bf16.msra.mxu1 %v4671_v28 }
 0x278   :  { %1171 = vmatpush.bf16.msra.mxu0 %v4675_v37 }
 0x279   :  { %1184 = vmatpush.bf16.msra.mxu1 %v4681_v46 }
 0x27c   :  { %1172 = vmatpush.bf16.msra.mxu0 %v4690_v30 }
 0x27d   :  { %1185 = vmatpush.bf16.msra.mxu1 %v4693_v51 }
 0x280   :  { %1173 = vmatpush.bf16.msra.mxu0 %v4698_v60 }
 0x281   :  { %1186 = vmatpush.bf16.msra.mxu1 %v4701_v61 }
 0x284   :  { %1174 = vmatpush.bf16.msra.mxu0 %v4715_v8 }
 0x285   :  { %1187 = vmatpush.bf16.msra.mxu1 %v4748_v45 }
 0x286   :  { %v412_v0 = vpop.permute.xlu1 %411 }
 0x287   :  { %v453_v4 = vsel %vm445_vm0, %v4548_v54, %v412_v0  ;;  %v905_v54 = vpop.f32.mrf.mxu0 }
 0x288   :  { %v462_v35 = vsel %vm454_vm1, %v453_v4, %v436_v1  ;;  %1175 = vmatpush.bf16.msra.mxu0 %v4723_v14 }
 0x289   :  { %3428 = vmatmul.msk.f32.gmra.mxu2 %vm477_vm2, %v462_v35  ;;  %3436 = vmatmul.msk.f32.gmra.mxu3 %vm477_vm2, %v462_v35 }
 0x28a   :  { %1188 = vmatpush.bf16.msra.mxu1 %v4754_v48 }
 0x28c   :  { %1176 = vmatpush.bf16.msra.mxu0 %v4746_v29 }
 0x28e   :  { %1189 = vmatpush.bf16.msra.mxu1 %v4759_v55 }
 0x290   :  { %1177 = vmatpush.bf16.msra.mxu0 %v4751_v47 }
 0x291   :  { %3437 = vmatmul.msk.f32.vlgmr.msrb.gmra.mxu2 %vm477_vm2, %v4634_v3  ;;  %3445 = vmatmul.msk.f32.vlgmr.msrb.gmra.mxu3 %vm477_vm2, %v4634_v3 }
 0x292   :  { %1144 = vmatpush.bf16.msrb.mxu2 %v4556_v62  ;;  %1157 = vmatpush.bf16.msrb.mxu3 %v4558_v2 }
 0x293   :  { %1190 = vmatpush.bf16.msra.mxu1 %v4763_v63 }
 0x296   :  { %1145 = vmatpush.bf16.msrb.mxu2 %v4565_v6  ;;  %1158 = vmatpush.bf16.msrb.mxu3 %v4567_v7 }
 0x299   :  { %3438 = vmatmul.msk.f32.gmra.mxu2 %vm477_vm2, %v4643_v9  ;;  %3446 = vmatmul.msk.f32.gmra.mxu3 %vm477_vm2, %v4643_v9 }
 0x29a   :  { %1146 = vmatpush.bf16.msrb.mxu2 %v4585_v17  ;;  %1159 = vmatpush.bf16.msrb.mxu3 %v4587_v20 }
 0x29e   :  { %1147 = vmatpush.bf16.msrb.mxu2 %v4591_v26  ;;  %1160 = vmatpush.bf16.msrb.mxu3 %v4593_v31 }
 0x2a1   :  { %3439 = vmatmul.msk.f32.gmra.mxu2 %vm477_vm2, %v4656_v12  ;;  %3447 = vmatmul.msk.f32.gmra.mxu3 %vm477_vm2, %v4656_v12 }
 0x2a2   :  { %1148 = vmatpush.bf16.msrb.mxu2 %v4596_v34  ;;  %1161 = vmatpush.bf16.msrb.mxu3 %v4599_v36 }
 0x2a5   :  { %v519_v3 = vpop.f32.mrf.mxu2  ;;  %v560_v9 = vpop.f32.mrf.mxu3 }
 0x2a6   :  { %1149 = vmatpush.bf16.msrb.mxu2 %v4602_v42  ;;  %1162 = vmatpush.bf16.msrb.mxu3 %v4605_v43  ;;  %v520_v22 = vadd.f32 %v519_v3, %v4865_v18 }
 0x2a8   :  { %v946_v38 = vadd.f32 %v4779_v13, %v520_v22 }
 0x2a9   :  { %3440 = vmatmul.msk.f32.gmra.mxu2 %vm477_vm2, %v4678_v39  ;;  %3448 = vmatmul.msk.f32.gmra.mxu3 %vm477_vm2, %v4678_v39 }
 0x2aa   :  { %1150 = vmatpush.bf16.msrb.mxu2 %v4615_v49  ;;  %1163 = vmatpush.bf16.msrb.mxu3 %v4617_v53  ;;  %v3581_v44 = vmul.f32 -1.442695, %v946_v38  ;;  %v4889_v38 = vperm.slane %v467_v16, 2 }
 0x2ac   :  { %3900 = vpow2.f32 %v3581_v44 }
 0x2ad   :  { %v4853_v12 = vpop.f32.mrf.mxu2  ;;  %v4855_v39 = vpop.f32.mrf.mxu3 }
 0x2ae   :  { %1151 = vmatpush.bf16.msrb.mxu2 %v4620_v58  ;;  %1164 = vmatpush.bf16.msrb.mxu3 %v4623_v59 }
 0x2b1   :  { %3441 = vmatmul.msk.f32.gmra.mxu2 %vm477_vm2, %v4708_v5  ;;  %3449 = vmatmul.msk.f32.gmra.mxu3 %vm477_vm2, %v4708_v5 }
 0x2b2   :  { %v3901_v4 = vpop.eup %3900 }
 0x2b3   :  { %v959_v54 = vadd.f32 1.0, %v3901_v4 }
 0x2b5   :  { %v4857_v5 = vpop.f32.mrf.mxu2  ;;  %v4859_v19 = vpop.f32.mrf.mxu3  ;;  %vm967_vm5 = vweird.f32 %v959_v54 }
 0x2b6   :  { %5873 = vst [vmem:[#allocation18_spill] sm:$0xff] %v4859_v19 }
 0x2b9   :  { %3442 = vmatmul.msk.f32.gmra.mxu2 %vm477_vm2, %v4726_v15  ;;  %3450 = vmatmul.msk.f32.gmra.mxu3 %vm477_vm2, %v4726_v15 }
 0x2bd   :  { %v4861_v15 = vpop.f32.mrf.mxu2  ;;  %v4863_v40 = vpop.f32.mrf.mxu3 }
 0x2be   :  { %5874 = vst [vmem:[#allocation19_spill] sm:$0xff] %v4861_v15 }
 0x2bf   :  { %5875 = vst [vmem:[#allocation20_spill] sm:$0xff] %v4863_v40 }
 0x2c1   :  { %3443 = vmatmul.msk.f32.gmra.mxu2 %vm477_vm2, %v4740_v21  ;;  %3451 = vmatmul.msk.f32.gmra.mxu3 %vm477_vm2, %v4740_v21  ;;  %v4867_v21 = vperm.slane %v467_v16, 1 }
 0x2c3   :  { %v561_v27 = vadd.f32 %v560_v9, %v4867_v21 }
 0x2c5   :  { %v947_v41 = vadd.f32 %v4784_v10, %v561_v27 }
 0x2c6   :  { %v4871_v32 = vpop.f32.mrf.mxu2  ;;  %v4873_v33 = vpop.f32.mrf.mxu3 }
 0x2c7   :  { %5876 = vst [vmem:[#allocation21_spill] sm:$0xff] %v4871_v32  ;;  %v3582_v52 = vmul.f32 -1.442695, %v947_v41  ;;  %v4891_v41 = vperm.slane %v467_v16, 3 }
 0x2c8   :  { %5877 = vst [vmem:[#allocation22_spill] sm:$0xff] %v4873_v33 }
 0x2c9   :  { %3444 = vmatmul.msk.f32.gmra.mxu2 %vm477_vm2, %v462_v35  ;;  %3452 = vmatmul.msk.f32.gmra.mxu3 %vm477_vm2, %v462_v35  ;;  %3902 = vpow2.f32 %v3582_v52  ;;  %5884 = vst [vmem:[#allocation29_spill] sm:$0xff] %v4891_v41 }
 0x2ca   :  { %3904 = vrcp.f32 %v959_v54 }
 0x2ce   :  { %v4877_v57 = vpop.f32.mrf.mxu2  ;;  %v4879_v0 = vpop.f32.mrf.mxu3 }
 0x2cf   :  { %5878 = vst [vmem:[#allocation23_spill] sm:$0xff] %v4877_v57  ;;  %v3903_v35 = vpop.eup %3902 }
 0x2d0   :  { %5879 = vst [vmem:[#allocation24_spill] sm:$0xff] %v4879_v0  ;;  %v960_v13 = vadd.f32 1.0, %v3903_v35  ;;  %v3905_v22 = vpop.eup %3904 }
 0x2d1   :  { %v942_v56 = vpop.f32.mrf.mxu1  ;;  %v963_v44 = vmul.f32 %v3905_v22, %v959_v54  ;;  %vm968_vm3 = vweird.f32 %v3905_v22 }
 0x2d2   :  { %v929_v23 = vpop.f32.mrf.mxu0  ;;  %3906 = vrcp.f32 %v960_v13  ;;  %vm982_vm6 = vweird.f32 %v960_v13  ;;  %vm4899_vm7 = vmor %vm967_vm5, %vm968_vm3 }
 0x2d3   :  { %v964_v25 = vsub.f32 1.0, %v963_v44 }
 0x2d5   :  { %v965_v57 = vmul.f32 %v3905_v22, %v964_v25  ;;  %v986_v25 = vand.u32 2147483647, %v960_v13 }
 0x2d6   :  { %v4881_v11 = vpop.f32.mrf.mxu2  ;;  %v4883_v3 = vpop.f32.mrf.mxu3 }
 0x2d7   :  { %5880 = vst [vmem:[#allocation25_spill] sm:$0xff] %v4881_v11  ;;  %v966_v32 = vadd.f32 %v3905_v22, %v965_v57  ;;  %vm987_vm10 = vcmp.eq.f32.partialorder %v986_v25, 8.507059e+37 }
 0x2d8   :  { %5881 = vst [vmem:[#allocation26_spill] sm:$0xff] %v4883_v3  ;;  %v3907_v27 = vpop.eup %3906 }
 0x2d9   :  { %v944_v1 = vpop.f32.mrf.mxu1  ;;  %vm983_vm4 = vweird.f32 %v3907_v27 }
 0x2da   :  { %v931_v50 = vpop.f32.mrf.mxu0  ;;  %vm984_vm8 = vmor %vm982_vm6, %vm983_vm4 }
 0x2db   :  { %v978_v50 = vmul.f32 %v3907_v27, %v960_v13 }
 0x2dd   :  { %v979_v3 = vsub.f32 1.0, %v978_v50 }
 0x30c   :  { %v4885_v10 = vpop.f32.mrf.mxu2  ;;  %v4887_v9 = vpop.f32.mrf.mxu3 }
 0x30d   :  { %5882 = vst [vmem:[#allocation27_spill] sm:$0xff] %v4885_v10 }
 0x30e   :  { %5883 = vst [vmem:[#allocation28_spill] sm:$0xff] %v4887_v9  ;;  %v980_v9 = vmul.f32 %v3907_v27, %v979_v3 }
 0x310   :  { %v981_v40 = vadd.f32 %v3907_v27, %v980_v9 }
 0x314   :  { %v601_v52 = vpop.f32.mrf.mxu2  ;;  %v642_v1 = vpop.f32.mrf.mxu3 }
 0x315   :  { %v602_v4 = vadd.f32 %v601_v52, %v4889_v38  ;;  %v643_v35 = vadd.f32 %v642_v1, %v4891_v41  ;;  %v988_v52 = vand.u32 2147483648, %v960_v13  ;;  %v973_v1 = vand.u32 2147483648, %v959_v54 }
 0x317   :  { %v948_v11 = vadd.f32 %v929_v23, %v602_v4  ;;  %v949_v0 = vadd.f32 %v942_v56, %v643_v35  ;;  %v971_v56 = vand.u32 2147483647, %v959_v54  ;;  %v974_v9 = vor.u32 1.1754944e-38, %v973_v1 }
 0x318   :  { %v989_v44 = vor.u32 1.1754944e-38, %v988_v52 }
 0x319   :  { %v3583_v10 = vmul.f32 -1.442695, %v948_v11  ;;  %vm972_vm9 = vcmp.eq.f32.partialorder %v971_v56, 8.507059e+37 }
 0x31b   :  { %3908 = vpow2.f32 %v3583_v10  ;;  %v970_v10 = vsel %vm4899_vm7, %v3905_v22, %v966_v32 }
 0x31c   :  { %v4895_v33 = vpop.f32.mrf.mxu2  ;;  %v4897_v16 = vpop.f32.mrf.mxu3  ;;  %3910 = vtanh.f32 %v949_v0  ;;  %v985_v0 = vsel %vm984_vm8, %v3907_v27, %v981_v40  ;;  %v975_v35 = vsel %vm972_vm9, %v974_v9, %v970_v10 }
 0x31d   :  { %v990_v54 = vsel %vm987_vm10, %v989_v44, %v985_v0 }
 0x31e   :  { %v1008_v15 = vmul.f32 0.0, %v990_v54 }
 0x321   :  { %v3909_v11 = vpop.eup %3908 }
 0x322   :  { %v961_v3 = vadd.f32 1.0, %v3909_v11  ;;  %v3911_v57 = vpop.eup %3910 }
 0x323   :  { %v1009_v13 = vmul.f32 %v3911_v57, %v975_v35 }
 0x324   :  { %3912 = vrcp.f32 %v961_v3  ;;  %v4905_v50 = vpop.f32.mrf.mxu2  ;;  %v4907_v4 = vpop.f32.mrf.mxu3  ;;  %v1003_v27 = vand.u32 2147483648, %v961_v3  ;;  %v1001_v1 = vand.u32 2147483647, %v961_v3  ;;  %vm997_vm12 = vweird.f32 %v961_v3 }
 0x325   :  { %5887 = vst [vmem:[#allocation30_spill] sm:$0xff] %v4907_v4  ;;  %v4909_v11 = vadd.f32 %v1009_v13, %v1008_v15 }
 0x326   :  { %v1004_v25 = vor.u32 1.1754944e-38, %v1003_v27  ;;  %vm1002_vm14 = vcmp.eq.f32.partialorder %v1001_v1, 8.507059e+37  ;;  %v605_v1 = vadd.f32 %v4895_v33, %v4889_v38 }
 0x327   :  { %3914 = vtanh.f32 %v4909_v11 }
 0x32a   :  { %v3913_v19 = vpop.eup %3912 }
 0x32b   :  { %v993_v23 = vmul.f32 %v3913_v19, %v961_v3  ;;  %vm998_vm11 = vweird.f32 %v3913_v19 }
 0x32c   :  { %v4911_v32 = vpop.f32.mrf.mxu2  ;;  %v4913_v40 = vpop.f32.mrf.mxu3  ;;  %vm999_vm13 = vmor %vm997_vm12, %vm998_vm11 }
 0x32d   :  { %5888 = vst [vmem:[#allocation31_spill] sm:$0xff] %v4911_v32  ;;  %v994_v22 = vsub.f32 1.0, %v993_v23  ;;  %v3915_v15 = vpop.eup %3914 }
 0x32e   :  { %5889 = vst [vmem:[#allocation32_spill] sm:$0xff] %v4913_v40 }
 0x32f   :  { %v995_v52 = vmul.f32 %v3913_v19, %v994_v22 }
 0x331   :  { %v996_v56 = vadd.f32 %v3913_v19, %v995_v52 }
 0x333   :  { %v1000_v10 = vsel %vm999_vm13, %v3913_v19, %v996_v56 }
 0x334   :  { %v1005_v0 = vsel %vm1002_vm14, %v1004_v25, %v1000_v10  ;;  %v4916_v57 = vpop.f32.mrf.mxu2  ;;  %v4918_v9 = vpop.f32.mrf.mxu3 }
 0x335   :  { %5890 = vst [vmem:[#allocation33_spill] sm:$0xff] %v4916_v57  ;;  %v4920_v44 = vmul.f32 %v3915_v15, %v1005_v0  ;;  %v523_v0 = vadd.f32 %v4853_v12, %v4865_v18 }
 0x336   :  { %5891 = vst [vmem:[#allocation34_spill] sm:$0xff] %v4918_v9 }
 0x337   :  { %5892 = vst [vmem:[#allocation35_spill] sm:$0xff] %v4920_v44  ;;  %v1018_v35 = vpack.c.bf16 %v4920_v44, %v4920_v44 }
 0x339   :  { %1027 = vmatmul.bf16.vlgmr.msra.gmra.mxu2 %v1018_v35  ;;  %1040 = vmatmul.bf16.vlgmr.msra.gmra.mxu3 %v1018_v35 }
 0x33a   :  { %1053 = vmatmul.bf16.vlgmr.msrb.gmra.mxu0 %v1018_v35  ;;  %1066 = vmatmul.bf16.vlgmr.msrb.gmra.mxu1 %v1018_v35  ;;  %v564_v35 = vadd.f32 %v4855_v39, %v4867_v21 }
 0x33b   :  { %1269 = vmatpush.bf16.msra.mxu2 %v4556_v62  ;;  %1282 = vmatpush.bf16.msra.mxu3 %v4558_v2 }
 0x33c   :  { %v4926_v19 = vpop.f32.mrf.mxu2  ;;  %v4928_v3 = vpop.f32.mrf.mxu3  ;;  %1295 = vmatpush.bf16.msrb.mxu0 %v4666_v24  ;;  %1308 = vmatpush.bf16.msrb.mxu1 %v4671_v28 }
 0x33d   :  { %5893 = vst [vmem:[#allocation36_spill] sm:$0xff] %v4926_v19 }
 0x33e   :  { %5894 = vst [vmem:[#allocation37_spill] sm:$0xff] %v4928_v3 }
 0x33f   :  { %1270 = vmatpush.bf16.msra.mxu2 %v4565_v6  ;;  %1283 = vmatpush.bf16.msra.mxu3 %v4567_v7 }
 0x340   :  { %1296 = vmatpush.bf16.msrb.mxu0 %v4675_v37  ;;  %1309 = vmatpush.bf16.msrb.mxu1 %v4681_v46 }
 0x343   :  { %1271 = vmatpush.bf16.msra.mxu2 %v4585_v17  ;;  %1284 = vmatpush.bf16.msra.mxu3 %v4587_v20 }
 0x344   :  { %v619_v54 = vpop.f32.mrf.mxu2  ;;  %v660_v13 = vpop.f32.mrf.mxu3  ;;  %1297 = vmatpush.bf16.msrb.mxu0 %v4690_v30  ;;  %1310 = vmatpush.bf16.msrb.mxu1 %v4693_v51 }
 0x345   :  { %v4941_v23 = vadd.f32 %v619_v54, %v4889_v38  ;;  %v4944_v22 = vadd.f32 %v660_v13, %v4891_v41 }
 0x347   :  { %5895 = vst [vmem:[#allocation38_spill] sm:$0xff] %v4941_v23  ;;  %1272 = vmatpush.bf16.msra.mxu2 %v4591_v26  ;;  %1285 = vmatpush.bf16.msra.mxu3 %v4593_v31 }
 0x348   :  { %5896 = vst [vmem:[#allocation39_spill] sm:$0xff] %v4944_v22  ;;  %1298 = vmatpush.bf16.msrb.mxu0 %v4698_v60  ;;  %1311 = vmatpush.bf16.msrb.mxu1 %v4701_v61 }
 0x34b   :  { %1273 = vmatpush.bf16.msra.mxu2 %v4596_v34  ;;  %1286 = vmatpush.bf16.msra.mxu3 %v4599_v36 }
 0x34c   :  { %1299 = vmatpush.bf16.msrb.mxu0 %v4715_v8  ;;  %1312 = vmatpush.bf16.msrb.mxu1 %v4748_v45  ;;  %v4966_v27 = vpop.f32.mrf.mxu2  ;;  %v4968_v52 = vpop.f32.mrf.mxu3 }
 0x34d   :  { %5897 = vst [vmem:[#allocation40_spill] sm:$0xff] %v4966_v27 }
 0x34e   :  { %5898 = vst [vmem:[#allocation41_spill] sm:$0xff] %v4968_v52 }
 0x34f   :  { %1274 = vmatpush.bf16.msra.mxu2 %v4602_v42  ;;  %1287 = vmatpush.bf16.msra.mxu3 %v4605_v43 }
 0x350   :  { %1300 = vmatpush.bf16.msrb.mxu0 %v4723_v14  ;;  %1313 = vmatpush.bf16.msrb.mxu1 %v4754_v48 }
 0x353   :  { %1275 = vmatpush.bf16.msra.mxu2 %v4615_v49  ;;  %1288 = vmatpush.bf16.msra.mxu3 %v4617_v53 }
 0x354   :  { %1301 = vmatpush.bf16.msrb.mxu0 %v4746_v29  ;;  %1314 = vmatpush.bf16.msrb.mxu1 %v4759_v55 }
 0x357   :  { %1276 = vmatpush.bf16.msra.mxu2 %v4620_v58  ;;  %1289 = vmatpush.bf16.msra.mxu3 %v4623_v59 }
 0x358   :  { %1302 = vmatpush.bf16.msrb.mxu0 %v4751_v47  ;;  %1315 = vmatpush.bf16.msrb.mxu1 %v4763_v63 }
 0x3b7   :  { %v1054_v56 = vpop.f32.mrf.mxu0  ;;  %v1067_v25 = vpop.f32.mrf.mxu1 }
 0x3b8   :  { %v1073_v10 = vadd.f32 %v1054_v56, %v605_v1 }
 0x3ba   :  { %v3586_v15 = vmul.f32 -1.442695, %v1073_v10 }
 0x3bc   :  { %3916 = vpow2.f32 %v3586_v15  ;;  %v1028_v54 = vpop.f32.mrf.mxu2  ;;  %v1041_v13 = vpop.f32.mrf.mxu3  ;;  %v646_v15 = vadd.f32 %v4897_v16, %v4891_v41 }
 0x3bd   :  { %v1071_v44 = vadd.f32 %v1028_v54, %v523_v0  ;;  %v1072_v27 = vadd.f32 %v1041_v13, %v564_v35 }
 0x3bf   :  { %v3584_v22 = vmul.f32 -1.442695, %v1071_v44  ;;  %v3585_v52 = vmul.f32 -1.442695, %v1072_v27  ;;  %v1056_v23 = vpop.f32.mrf.mxu0  ;;  %v1069_v3 = vpop.f32.mrf.mxu1 }
 0x3c0   :  { %v1074_v23 = vadd.f32 %v1067_v25, %v646_v15 }
 0x3c1   :  { %3918 = vpow2.f32 %v3584_v22 }
 0x3c2   :  { %v3917_v33 = vpop.eup %3916  ;;  %3920 = vpow2.f32 %v3585_v52 }
 0x3c3   :  { %v1086_v10 = vadd.f32 1.0, %v3917_v33 }
 0x3c4   :  { %v1030_v1 = vpop.f32.mrf.mxu2  ;;  %v1043_v56 = vpop.f32.mrf.mxu3 }
 0x3c5   :  { %3922 = vrcp.f32 %v1086_v10  ;;  %vm1122_vm9 = vweird.f32 %v1086_v10 }
 0x3c7   :  { %v3919_v19 = vpop.eup %3918 }
 0x3c8   :  { %v3921_v12 = vpop.eup %3920  ;;  %v1084_v9 = vadd.f32 1.0, %v3919_v19 }
 0x3c9   :  { %v1085_v39 = vadd.f32 1.0, %v3921_v12 }
 0x3ca   :  { %3924 = vrcp.f32 %v1084_v9  ;;  %v1098_v54 = vand.u32 2147483648, %v1084_v9  ;;  %v1096_v19 = vand.u32 2147483647, %v1084_v9  ;;  %vm1092_vm2 = vweird.f32 %v1084_v9 }
 0x3cb   :  { %3926 = vrcp.f32 %v1085_v39  ;;  %v3923_v44 = vpop.eup %3922  ;;  %v1113_v1 = vand.u32 2147483648, %v1085_v39  ;;  %v1111_v12 = vand.u32 2147483647, %v1085_v39  ;;  %vm1107_vm4 = vweird.f32 %v1085_v39 }
 0x3cc   :  { %v1118_v52 = vmul.f32 %v3923_v44, %v1086_v10  ;;  %3928 = vtanh.f32 %v1074_v23  ;;  %v1099_v25 = vor.u32 1.1754944e-38, %v1098_v54  ;;  %vm1097_vm5 = vcmp.eq.f32.partialorder %v1096_v19, 8.507059e+37 }
 0x3cd   :  { %v1114_v23 = vor.u32 1.1754944e-38, %v1113_v1  ;;  %vm1112_vm7 = vcmp.eq.f32.partialorder %v1111_v12, 8.507059e+37  ;;  %vm1123_vm8 = vweird.f32 %v3923_v44  ;;  %v1128_v54 = vand.u32 2147483648, %v1086_v10  ;;  %v5899_v1 = vld [vmem:[#allocation18_spill] sm:$0xff] }
 0x3ce   :  { %v1119_v57 = vsub.f32 1.0, %v1118_v52  ;;  %vm1124_vm10 = vmor %vm1122_vm9, %vm1123_vm8  ;;  %v526_v19 = vadd.f32 %v4857_v5, %v4865_v18 }
 0x3d0   :  { %v3925_v27 = vpop.eup %3924  ;;  %v1120_v32 = vmul.f32 %v3923_v44, %v1119_v57 }
 0x3d1   :  { %v3927_v3 = vpop.eup %3926  ;;  %v1088_v22 = vmul.f32 %v3925_v27, %v1084_v9  ;;  %vm1093_vm15 = vweird.f32 %v3925_v27 }
 0x3d2   :  { %v1103_v0 = vmul.f32 %v3927_v3, %v1085_v39  ;;  %vm1108_vm1 = vweird.f32 %v3927_v3  ;;  %vm1094_vm3 = vmor %vm1092_vm2, %vm1093_vm15  ;;  %v1121_v9 = vadd.f32 %v3923_v44, %v1120_v32  ;;  %v1126_v39 = vand.u32 2147483647, %v1086_v10 }
 0x3d3   :  { %v1089_v35 = vsub.f32 1.0, %v1088_v22  ;;  %vm1109_vm6 = vmor %vm1107_vm4, %vm1108_vm1  ;;  %v3929_v22 = vpop.eup %3928 }
 0x3d4   :  { %v1104_v13 = vsub.f32 1.0, %v1103_v0  ;;  %vm1127_vm11 = vcmp.eq.f32.partialorder %v1126_v39, 8.507059e+37 }
 0x3d5   :  { %v1090_v33 = vmul.f32 %v3925_v27, %v1089_v35 }
 0x3d6   :  { %v1105_v56 = vmul.f32 %v3927_v3, %v1104_v13 }
 0x3d7   :  { %v1091_v16 = vadd.f32 %v3925_v27, %v1090_v33  ;;  %v1129_v33 = vor.u32 1.1754944e-38, %v1128_v54 }
 0x3d8   :  { %v1106_v15 = vadd.f32 %v3927_v3, %v1105_v56  ;;  %v567_v56 = vadd.f32 %v5899_v1, %v4867_v21 }
 0x3d9   :  { %v1095_v40 = vsel %vm1094_vm3, %v3925_v27, %v1091_v16  ;;  %v1125_v27 = vsel %vm1124_vm10, %v3923_v44, %v1121_v9 }
 0x3da   :  { %v1100_v0 = vsel %vm1097_vm5, %v1099_v25, %v1095_v40  ;;  %v1110_v35 = vsel %vm1109_vm6, %v3927_v3, %v1106_v15  ;;  %v1130_v3 = vsel %vm1127_vm11, %v1129_v33, %v1125_v27 }
 0x3db   :  { %v1134_v4 = vmul.f32 %v3929_v22, %v1100_v0  ;;  %v1115_v13 = vsel %vm1112_vm7, %v1114_v23, %v1110_v35 }
 0x3dc   :  { %v1133_v41 = vmul.f32 %v1115_v13, %v4909_v11 }
 0x3de   :  { %v4979_v52 = vadd.f32 %v1134_v4, %v1133_v41  ;;  %v608_v41 = vadd.f32 %v4905_v50, %v4889_v38 }
 0x3e0   :  { %3930 = vtanh.f32 %v4979_v52 }
 0x3e6   :  { %v3931_v40 = vpop.eup %3930 }
 0x3e7   :  { %v4982_v57 = vmul.f32 %v3931_v40, %v1130_v3  ;;  %v5900_v40 = vld [vmem:[#allocation29_spill] sm:$0xff]  ;;  %v5901_v3 = vld [vmem:[#allocation30_spill] sm:$0xff] }
 0x3e9   :  { %v1143_v11 = vpack.c.bf16 %v4982_v57, %v4982_v57 }
 0x3eb   :  { %1152 = vmatmul.bf16.vlgmr.msrb.gmra.mxu2 %v1143_v11  ;;  %1165 = vmatmul.bf16.vlgmr.msrb.gmra.mxu3 %v1143_v11 }
 0x3ec   :  { %1178 = vmatmul.bf16.vlgmr.msra.gmra.mxu0 %v1143_v11  ;;  %1191 = vmatmul.bf16.vlgmr.msra.gmra.mxu1 %v1143_v11  ;;  %v649_v11 = vadd.f32 %v5901_v3, %v5900_v40 }
 0x3ed   :  { %1394 = vmatpush.bf16.msrb.mxu2 %v4556_v62  ;;  %1407 = vmatpush.bf16.msrb.mxu3 %v4558_v2 }
 0x3ee   :  { %1420 = vmatpush.bf16.msra.mxu0 %v4666_v24  ;;  %1433 = vmatpush.bf16.msra.mxu1 %v4671_v28 }
 0x3f1   :  { %1395 = vmatpush.bf16.msrb.mxu2 %v4565_v6  ;;  %1408 = vmatpush.bf16.msrb.mxu3 %v4567_v7 }
 0x3f2   :  { %1421 = vmatpush.bf16.msra.mxu0 %v4675_v37  ;;  %1434 = vmatpush.bf16.msra.mxu1 %v4681_v46 }
 0x3f5   :  { %1396 = vmatpush.bf16.msrb.mxu2 %v4585_v17  ;;  %1409 = vmatpush.bf16.msrb.mxu3 %v4587_v20 }
 0x3f6   :  { %1422 = vmatpush.bf16.msra.mxu0 %v4690_v30  ;;  %1435 = vmatpush.bf16.msra.mxu1 %v4693_v51 }
 0x3f9   :  { %1397 = vmatpush.bf16.msrb.mxu2 %v4591_v26  ;;  %1410 = vmatpush.bf16.msrb.mxu3 %v4593_v31 }
 0x3fa   :  { %1423 = vmatpush.bf16.msra.mxu0 %v4698_v60  ;;  %1436 = vmatpush.bf16.msra.mxu1 %v4701_v61 }
 0x3fd   :  { %1398 = vmatpush.bf16.msrb.mxu2 %v4596_v34  ;;  %1411 = vmatpush.bf16.msrb.mxu3 %v4599_v36 }
 0x3fe   :  { %1424 = vmatpush.bf16.msra.mxu0 %v4715_v8  ;;  %1437 = vmatpush.bf16.msra.mxu1 %v4748_v45 }
 0x401   :  { %1399 = vmatpush.bf16.msrb.mxu2 %v4602_v42  ;;  %1412 = vmatpush.bf16.msrb.mxu3 %v4605_v43 }
 0x402   :  { %1425 = vmatpush.bf16.msra.mxu0 %v4723_v14  ;;  %1438 = vmatpush.bf16.msra.mxu1 %v4754_v48 }
 0x405   :  { %1400 = vmatpush.bf16.msrb.mxu2 %v4615_v49  ;;  %1413 = vmatpush.bf16.msrb.mxu3 %v4617_v53 }
 0x406   :  { %1426 = vmatpush.bf16.msra.mxu0 %v4746_v29  ;;  %1439 = vmatpush.bf16.msra.mxu1 %v4759_v55 }
 0x409   :  { %1401 = vmatpush.bf16.msrb.mxu2 %v4620_v58  ;;  %1414 = vmatpush.bf16.msrb.mxu3 %v4623_v59 }
 0x40a   :  { %1427 = vmatpush.bf16.msra.mxu0 %v4751_v47  ;;  %1440 = vmatpush.bf16.msra.mxu1 %v4763_v63 }
 0x469   :  { %v1179_v4 = vpop.f32.mrf.mxu0  ;;  %v1192_v32 = vpop.f32.mrf.mxu1 }
 0x46a   :  { %v1198_v10 = vadd.f32 %v1179_v4, %v608_v41 }
 0x46c   :  { %v3589_v44 = vmul.f32 -1.442695, %v1198_v10  ;;  %v1199_v10 = vadd.f32 %v1192_v32, %v649_v11 }
 0x46e   :  { %3932 = vpow2.f32 %v3589_v44  ;;  %v1153_v12 = vpop.f32.mrf.mxu2  ;;  %v1166_v16 = vpop.f32.mrf.mxu3 }
 0x46f   :  { %v1196_v25 = vadd.f32 %v1153_v12, %v526_v19  ;;  %v1197_v15 = vadd.f32 %v1166_v16, %v567_v56 }
 0x471   :  { %v3587_v23 = vmul.f32 -1.442695, %v1196_v25  ;;  %v3588_v22 = vmul.f32 -1.442695, %v1197_v15  ;;  %v1181_v0 = vpop.f32.mrf.mxu0  ;;  %v1194_v35 = vpop.f32.mrf.mxu1 }
 0x473   :  { %3934 = vpow2.f32 %v3587_v23 }
 0x474   :  { %v3933_v50 = vpop.eup %3932  ;;  %3936 = vpow2.f32 %v3588_v22 }
 0x475   :  { %v1211_v54 = vadd.f32 1.0, %v3933_v50 }
 0x476   :  { %v1155_v13 = vpop.f32.mrf.mxu2  ;;  %v1168_v9 = vpop.f32.mrf.mxu3 }
 0x477   :  { %3938 = vrcp.f32 %v1211_v54  ;;  %vm1247_vm6 = vweird.f32 %v1211_v54 }
 0x479   :  { %v3935_v39 = vpop.eup %3934 }
 0x47a   :  { %v3937_v5 = vpop.eup %3936  ;;  %v1209_v27 = vadd.f32 1.0, %v3935_v39 }
 0x47b   :  { %v1210_v33 = vadd.f32 1.0, %v3937_v5 }
 0x47c   :  { %3940 = vrcp.f32 %v1209_v27  ;;  %v1223_v16 = vand.u32 2147483648, %v1209_v27  ;;  %v1221_v23 = vand.u32 2147483647, %v1209_v27  ;;  %vm1217_vm14 = vweird.f32 %v1209_v27 }
 0x47d   :  { %3942 = vrcp.f32 %v1210_v33  ;;  %v3939_v41 = vpop.eup %3938  ;;  %v1238_v22 = vand.u32 2147483648, %v1210_v33  ;;  %v1236_v35 = vand.u32 2147483647, %v1210_v33  ;;  %vm1232_vm1 = vweird.f32 %v1210_v33 }
 0x47e   :  { %v1243_v56 = vmul.f32 %v3939_v41, %v1211_v54  ;;  %3944 = vtanh.f32 %v1199_v10  ;;  %v1224_v32 = vor.u32 1.1754944e-38, %v1223_v16  ;;  %vm1222_vm2 = vcmp.eq.f32.partialorder %v1221_v23, 8.507059e+37 }
 0x47f   :  { %v1239_v5 = vor.u32 1.1754944e-38, %v1238_v22  ;;  %vm1237_vm4 = vcmp.eq.f32.partialorder %v1236_v35, 8.507059e+37  ;;  %vm1248_vm5 = vweird.f32 %v3939_v41  ;;  %v1253_v16 = vand.u32 2147483648, %v1211_v54 }
 0x480   :  { %v1244_v50 = vsub.f32 1.0, %v1243_v56  ;;  %vm1249_vm7 = vmor %vm1247_vm6, %vm1248_vm5 }
 0x482   :  { %v3941_v4 = vpop.eup %3940 }
 0x483   :  { %v3943_v44 = vpop.eup %3942  ;;  %v1213_v19 = vmul.f32 %v3941_v4, %v1209_v27  ;;  %vm1218_vm12 = vweird.f32 %v3941_v4 }
 0x484   :  { %v1228_v1 = vmul.f32 %v3943_v44, %v1210_v33  ;;  %vm1233_vm13 = vweird.f32 %v3943_v44  ;;  %vm1219_vm15 = vmor %vm1217_vm14, %vm1218_vm12  ;;  %v3945_v3 = vpop.eup %3944  ;;  %v1251_v33 = vand.u32 2147483647, %v1211_v54  ;;  %v5903_v54 = vld [vmem:[#allocation31_spill] sm:$0xff] }
 0x485   :  { %v1214_v12 = vsub.f32 1.0, %v1213_v19  ;;  %vm1234_vm3 = vmor %vm1232_vm1, %vm1233_vm13  ;;  %v1245_v19 = vmul.f32 %v3939_v41, %v1244_v50 }
 0x486   :  { %v1229_v25 = vsub.f32 1.0, %v1228_v1  ;;  %vm1252_vm8 = vcmp.eq.f32.partialorder %v1251_v33, 8.507059e+37 }
 0x487   :  { %v1215_v15 = vmul.f32 %v3941_v4, %v1214_v12  ;;  %v1246_v27 = vadd.f32 %v3939_v41, %v1245_v19 }
 0x488   :  { %v1230_v0 = vmul.f32 %v3943_v44, %v1229_v25 }
 0x489   :  { %v1216_v13 = vadd.f32 %v3941_v4, %v1215_v15  ;;  %v1254_v15 = vor.u32 1.1754944e-38, %v1253_v16 }
 0x48a   :  { %v1231_v9 = vadd.f32 %v3943_v44, %v1230_v0 }
 0x48b   :  { %v1220_v39 = vsel %vm1219_vm15, %v3941_v4, %v1216_v13  ;;  %v1250_v4 = vsel %vm1249_vm7, %v3939_v41, %v1246_v27  ;;  %v611_v41 = vadd.f32 %v5903_v54, %v4889_v38 }
 0x48c   :  { %v1225_v11 = vsel %vm1222_vm2, %v1224_v32, %v1220_v39  ;;  %v1235_v10 = vsel %vm1234_vm3, %v3943_v44, %v1231_v9  ;;  %v1255_v23 = vsel %vm1252_vm8, %v1254_v15, %v1250_v4  ;;  %v5904_v32 = vld [vmem:[#allocation19_spill] sm:$0xff]  ;;  %v5905_v39 = vld [vmem:[#allocation20_spill] sm:$0xff] }
 0x48d   :  { %v1259_v1 = vmul.f32 %v3945_v3, %v1225_v11  ;;  %v1240_v12 = vsel %vm1237_vm4, %v1239_v5, %v1235_v10  ;;  %v529_v9 = vadd.f32 %v5904_v32, %v4865_v18  ;;  %v570_v5 = vadd.f32 %v5905_v39, %v4867_v21 }
 0x48e   :  { %v1258_v25 = vmul.f32 %v1240_v12, %v4979_v52 }
 0x490   :  { %v5027_v56 = vadd.f32 %v1259_v1, %v1258_v25 }
 0x492   :  { %3946 = vtanh.f32 %v5027_v56 }
 0x498   :  { %v3947_v44 = vpop.eup %3946 }
 0x499   :  { %v5030_v22 = vmul.f32 %v3947_v44, %v1255_v23 }
 0x49b   :  { %5902 = vst [vmem:[#allocation18_spill] sm:$0xff] %v5030_v22  ;;  %v1268_v52 = vpack.c.bf16 %v5030_v22, %v5030_v22 }
 0x49d   :  { %1277 = vmatmul.bf16.vlgmr.msra.gmra.mxu2 %v1268_v52  ;;  %1290 = vmatmul.bf16.vlgmr.msra.gmra.mxu3 %v1268_v52 }
 0x49e   :  { %1303 = vmatmul.bf16.vlgmr.msrb.gmra.mxu0 %v1268_v52  ;;  %1316 = vmatmul.bf16.vlgmr.msrb.gmra.mxu1 %v1268_v52 }
 0x49f   :  { %1519 = vmatpush.bf16.msra.mxu2 %v4556_v62  ;;  %1532 = vmatpush.bf16.msra.mxu3 %v4558_v2 }
 0x4a0   :  { %1545 = vmatpush.bf16.msrb.mxu0 %v4666_v24  ;;  %1558 = vmatpush.bf16.msrb.mxu1 %v4671_v28 }
 0x4a3   :  { %1520 = vmatpush.bf16.msra.mxu2 %v4565_v6  ;;  %1533 = vmatpush.bf16.msra.mxu3 %v4567_v7 }
 0x4a4   :  { %1546 = vmatpush.bf16.msrb.mxu0 %v4675_v37  ;;  %1559 = vmatpush.bf16.msrb.mxu1 %v4681_v46 }
 0x4a7   :  { %1521 = vmatpush.bf16.msra.mxu2 %v4585_v17  ;;  %1534 = vmatpush.bf16.msra.mxu3 %v4587_v20 }
 0x4a8   :  { %1547 = vmatpush.bf16.msrb.mxu0 %v4690_v30  ;;  %1560 = vmatpush.bf16.msrb.mxu1 %v4693_v51 }
 0x4ab   :  { %1522 = vmatpush.bf16.msra.mxu2 %v4591_v26  ;;  %1535 = vmatpush.bf16.msra.mxu3 %v4593_v31 }
 0x4ac   :  { %1548 = vmatpush.bf16.msrb.mxu0 %v4698_v60  ;;  %1561 = vmatpush.bf16.msrb.mxu1 %v4701_v61 }
 0x4af   :  { %1523 = vmatpush.bf16.msra.mxu2 %v4596_v34  ;;  %1536 = vmatpush.bf16.msra.mxu3 %v4599_v36 }
 0x4b0   :  { %1549 = vmatpush.bf16.msrb.mxu0 %v4715_v8  ;;  %1562 = vmatpush.bf16.msrb.mxu1 %v4748_v45 }
 0x4b3   :  { %1524 = vmatpush.bf16.msra.mxu2 %v4602_v42  ;;  %1537 = vmatpush.bf16.msra.mxu3 %v4605_v43 }
 0x4b4   :  { %1550 = vmatpush.bf16.msrb.mxu0 %v4723_v14  ;;  %1563 = vmatpush.bf16.msrb.mxu1 %v4754_v48 }
 0x4b7   :  { %1525 = vmatpush.bf16.msra.mxu2 %v4615_v49  ;;  %1538 = vmatpush.bf16.msra.mxu3 %v4617_v53 }
 0x4b8   :  { %1551 = vmatpush.bf16.msrb.mxu0 %v4746_v29  ;;  %1564 = vmatpush.bf16.msrb.mxu1 %v4759_v55 }
 0x4bb   :  { %1526 = vmatpush.bf16.msra.mxu2 %v4620_v58  ;;  %1539 = vmatpush.bf16.msra.mxu3 %v4623_v59 }
 0x4bc   :  { %1552 = vmatpush.bf16.msrb.mxu0 %v4751_v47  ;;  %1565 = vmatpush.bf16.msrb.mxu1 %v4763_v63 }
 0x51b   :  { %v1304_v0 = vpop.f32.mrf.mxu0  ;;  %v1317_v35 = vpop.f32.mrf.mxu1 }
 0x51c   :  { %v1323_v50 = vadd.f32 %v1304_v0, %v611_v41  ;;  %v5906_v41 = vld [vmem:[#allocation32_spill] sm:$0xff] }
 0x51d   :  { %v652_v0 = vadd.f32 %v5906_v41, %v5900_v40 }
 0x51e   :  { %v3592_v13 = vmul.f32 -1.442695, %v1323_v50 }
 0x51f   :  { %v1324_v32 = vadd.f32 %v1317_v35, %v652_v0 }
 0x520   :  { %3948 = vpow2.f32 %v3592_v13  ;;  %v1278_v3 = vpop.f32.mrf.mxu2  ;;  %v1291_v11 = vpop.f32.mrf.mxu3 }
 0x521   :  { %v1321_v10 = vadd.f32 %v1278_v3, %v529_v9  ;;  %v1322_v19 = vadd.f32 %v1291_v11, %v570_v5 }
 0x523   :  { %v3590_v1 = vmul.f32 -1.442695, %v1321_v10  ;;  %v3591_v12 = vmul.f32 -1.442695, %v1322_v19  ;;  %v1306_v25 = vpop.f32.mrf.mxu0  ;;  %v1319_v27 = vpop.f32.mrf.mxu1 }
 0x525   :  { %3950 = vpow2.f32 %v3590_v1 }
 0x526   :  { %v3949_v16 = vpop.eup %3948  ;;  %3952 = vpow2.f32 %v3591_v12 }
 0x527   :  { %v1336_v15 = vadd.f32 1.0, %v3949_v16 }
 0x528   :  { %v1280_v33 = vpop.f32.mrf.mxu2  ;;  %v1293_v4 = vpop.f32.mrf.mxu3 }
 0x529   :  { %3954 = vrcp.f32 %v1336_v15  ;;  %vm1372_vm3 = vweird.f32 %v1336_v15 }
 0x52b   :  { %v3951_v44 = vpop.eup %3950 }
 0x52c   :  { %v3953_v23 = vpop.eup %3952  ;;  %v1334_v52 = vadd.f32 1.0, %v3951_v44 }
 0x52d   :  { %v1335_v54 = vadd.f32 1.0, %v3953_v23 }
 0x52e   :  { %3956 = vrcp.f32 %v1334_v52  ;;  %v1348_v10 = vand.u32 2147483648, %v1334_v52  ;;  %v1346_v12 = vand.u32 2147483647, %v1334_v52  ;;  %vm1342_vm11 = vweird.f32 %v1334_v52 }
 0x52f   :  { %3958 = vrcp.f32 %v1335_v54  ;;  %v3955_v50 = vpop.eup %3954  ;;  %v1363_v25 = vand.u32 2147483648, %v1335_v54  ;;  %v1361_v16 = vand.u32 2147483647, %v1335_v54  ;;  %vm1357_vm13 = vweird.f32 %v1335_v54 }
 0x530   :  { %v1368_v3 = vmul.f32 %v3955_v50, %v1336_v15  ;;  %3960 = vtanh.f32 %v1324_v32  ;;  %v1349_v35 = vor.u32 1.1754944e-38, %v1348_v10  ;;  %vm1347_vm14 = vcmp.eq.f32.partialorder %v1346_v12, 8.507059e+37 }
 0x531   :  { %v1364_v41 = vor.u32 1.1754944e-38, %v1363_v25  ;;  %vm1362_vm1 = vcmp.eq.f32.partialorder %v1361_v16, 8.507059e+37  ;;  %vm1373_vm2 = vweird.f32 %v3955_v50  ;;  %v1378_v10 = vand.u32 2147483648, %v1336_v15 }
 0x532   :  { %v1369_v33 = vsub.f32 1.0, %v1368_v3  ;;  %vm1374_vm4 = vmor %vm1372_vm3, %vm1373_vm2 }
 0x534   :  { %v3957_v13 = vpop.eup %3956 }
 0x535   :  { %v3959_v9 = vpop.eup %3958  ;;  %v1338_v39 = vmul.f32 %v3957_v13, %v1334_v52  ;;  %vm1343_vm9 = vweird.f32 %v3957_v13 }
 0x536   :  { %v1353_v5 = vmul.f32 %v3959_v9, %v1335_v54  ;;  %vm1358_vm10 = vweird.f32 %v3959_v9  ;;  %vm1344_vm12 = vmor %vm1342_vm11, %vm1343_vm9  ;;  %v3961_v0 = vpop.eup %3960  ;;  %v1376_v54 = vand.u32 2147483647, %v1336_v15 }
 0x537   :  { %v1339_v11 = vsub.f32 1.0, %v1338_v39  ;;  %vm1359_vm15 = vmor %vm1357_vm13, %vm1358_vm10 }
 0x538   :  { %v1354_v19 = vsub.f32 1.0, %v1353_v5  ;;  %v1370_v5 = vmul.f32 %v3955_v50, %v1369_v33  ;;  %vm1377_vm5 = vcmp.eq.f32.partialorder %v1376_v54, 8.507059e+37 }
 0x539   :  { %v1340_v1 = vmul.f32 %v3957_v13, %v1339_v11 }
 0x53a   :  { %v1355_v27 = vmul.f32 %v3959_v9, %v1354_v19  ;;  %v1371_v52 = vadd.f32 %v3955_v50, %v1370_v5 }
 0x53b   :  { %v1341_v4 = vadd.f32 %v3957_v13, %v1340_v1  ;;  %v1379_v1 = vor.u32 1.1754944e-38, %v1378_v10 }
 0x53c   :  { %v1356_v44 = vadd.f32 %v3959_v9, %v1355_v27 }
 0x53d   :  { %v1345_v23 = vsel %vm1344_vm12, %v3957_v13, %v1341_v4  ;;  %v1375_v13 = vsel %vm1374_vm4, %v3955_v50, %v1371_v52  ;;  %v5909_v4 = vld [vmem:[#allocation21_spill] sm:$0xff] }
 0x53e   :  { %v1350_v32 = vsel %vm1347_vm14, %v1349_v35, %v1345_v23  ;;  %v1360_v39 = vsel %vm1359_vm15, %v3959_v9, %v1356_v44  ;;  %v1380_v12 = vsel %vm1377_vm5, %v1379_v1, %v1375_v13  ;;  %v532_v35 = vadd.f32 %v5909_v4, %v4865_v18  ;;  %v5910_v44 = vld [vmem:[#allocation22_spill] sm:$0xff] }
 0x53f   :  { %v1384_v11 = vmul.f32 %v3961_v0, %v1350_v32  ;;  %v1365_v19 = vsel %vm1362_vm1, %v1364_v41, %v1360_v39  ;;  %v573_v23 = vadd.f32 %v5910_v44, %v4867_v21 }
 0x540   :  { %v1383_v22 = vmul.f32 %v1365_v19, %v5027_v56 }
 0x542   :  { %v5075_v3 = vadd.f32 %v1384_v11, %v1383_v22  ;;  %v5908_v22 = vld [vmem:[#allocation33_spill] sm:$0xff] }
 0x543   :  { %v614_v15 = vadd.f32 %v5908_v22, %v4889_v38 }
 0x544   :  { %3962 = vtanh.f32 %v5075_v3 }
 0x54a   :  { %v3963_v9 = vpop.eup %3962 }
 0x54b   :  { %v5078_v25 = vmul.f32 %v3963_v9, %v1380_v12 }
 0x54d   :  { %5907 = vst [vmem:[#allocation29_spill] sm:$0xff] %v5078_v25  ;;  %v1393_v56 = vpack.c.bf16 %v5078_v25, %v5078_v25 }
 0x54f   :  { %1402 = vmatmul.bf16.vlgmr.msrb.gmra.mxu2 %v1393_v56  ;;  %1415 = vmatmul.bf16.vlgmr.msrb.gmra.mxu3 %v1393_v56 }
 0x550   :  { %1428 = vmatmul.bf16.vlgmr.msra.gmra.mxu0 %v1393_v56  ;;  %1441 = vmatmul.bf16.vlgmr.msra.gmra.mxu1 %v1393_v56 }
 0x551   :  { %1644 = vmatpush.bf16.msrb.mxu2 %v4556_v62  ;;  %1657 = vmatpush.bf16.msrb.mxu3 %v4558_v2 }
 0x552   :  { %1670 = vmatpush.bf16.msra.mxu0 %v4666_v24  ;;  %1683 = vmatpush.bf16.msra.mxu1 %v4671_v28 }
 0x555   :  { %1645 = vmatpush.bf16.msrb.mxu2 %v4565_v6  ;;  %1658 = vmatpush.bf16.msrb.mxu3 %v4567_v7 }
 0x556   :  { %1671 = vmatpush.bf16.msra.mxu0 %v4675_v37  ;;  %1684 = vmatpush.bf16.msra.mxu1 %v4681_v46 }
 0x559   :  { %1646 = vmatpush.bf16.msrb.mxu2 %v4585_v17  ;;  %1659 = vmatpush.bf16.msrb.mxu3 %v4587_v20 }
 0x55a   :  { %1672 = vmatpush.bf16.msra.mxu0 %v4690_v30  ;;  %1685 = vmatpush.bf16.msra.mxu1 %v4693_v51 }
 0x55d   :  { %1647 = vmatpush.bf16.msrb.mxu2 %v4591_v26  ;;  %1660 = vmatpush.bf16.msrb.mxu3 %v4593_v31 }
 0x55e   :  { %1673 = vmatpush.bf16.msra.mxu0 %v4698_v60  ;;  %1686 = vmatpush.bf16.msra.mxu1 %v4701_v61 }
 0x561   :  { %1648 = vmatpush.bf16.msrb.mxu2 %v4596_v34  ;;  %1661 = vmatpush.bf16.msrb.mxu3 %v4599_v36 }
 0x562   :  { %1674 = vmatpush.bf16.msra.mxu0 %v4715_v8  ;;  %1687 = vmatpush.bf16.msra.mxu1 %v4748_v45 }
 0x565   :  { %1649 = vmatpush.bf16.msrb.mxu2 %v4602_v42  ;;  %1662 = vmatpush.bf16.msrb.mxu3 %v4605_v43 }
 0x566   :  { %1675 = vmatpush.bf16.msra.mxu0 %v4723_v14  ;;  %1688 = vmatpush.bf16.msra.mxu1 %v4754_v48 }
 0x569   :  { %1650 = vmatpush.bf16.msrb.mxu2 %v4615_v49  ;;  %1663 = vmatpush.bf16.msrb.mxu3 %v4617_v53 }
 0x56a   :  { %1676 = vmatpush.bf16.msra.mxu0 %v4746_v29  ;;  %1689 = vmatpush.bf16.msra.mxu1 %v4759_v55 }
 0x56d   :  { %1651 = vmatpush.bf16.msrb.mxu2 %v4620_v58  ;;  %1664 = vmatpush.bf16.msrb.mxu3 %v4623_v59 }
 0x56e   :  { %1677 = vmatpush.bf16.msra.mxu0 %v4751_v47  ;;  %1690 = vmatpush.bf16.msra.mxu1 %v4763_v63 }
 0x5cd   :  { %v1429_v50 = vpop.f32.mrf.mxu0  ;;  %v1442_v27 = vpop.f32.mrf.mxu1 }
 0x5ce   :  { %v1448_v16 = vadd.f32 %v1429_v50, %v614_v15  ;;  %v5911_v15 = vld [vmem:[#allocation34_spill] sm:$0xff] }
 0x5cf   :  { %v655_v50 = vadd.f32 %v5911_v15, %v5900_v40 }
 0x5d0   :  { %v3595_v33 = vmul.f32 -1.442695, %v1448_v16 }
 0x5d1   :  { %v1449_v4 = vadd.f32 %v1442_v27, %v655_v50 }
 0x5d2   :  { %3964 = vpow2.f32 %v3595_v33  ;;  %v1403_v41 = vpop.f32.mrf.mxu2  ;;  %v1416_v0 = vpop.f32.mrf.mxu3 }
 0x5d3   :  { %v1446_v32 = vadd.f32 %v1403_v41, %v532_v35  ;;  %v1447_v39 = vadd.f32 %v1416_v0, %v573_v23 }
 0x5d5   :  { %v3593_v5 = vmul.f32 -1.442695, %v1446_v32  ;;  %v3594_v11 = vmul.f32 -1.442695, %v1447_v39  ;;  %v1431_v19 = vpop.f32.mrf.mxu0  ;;  %v1444_v52 = vpop.f32.mrf.mxu1 }
 0x5d7   :  { %3966 = vpow2.f32 %v3593_v5 }
 0x5d8   :  { %v3965_v10 = vpop.eup %3964  ;;  %3968 = vpow2.f32 %v3594_v11 }
 0x5d9   :  { %v1461_v1 = vadd.f32 1.0, %v3965_v10 }
 0x5da   :  { %v1405_v54 = vpop.f32.mrf.mxu2  ;;  %v1418_v13 = vpop.f32.mrf.mxu3 }
 0x5db   :  { %3970 = vrcp.f32 %v1461_v1  ;;  %vm1497_vm15 = vweird.f32 %v1461_v1 }
 0x5dd   :  { %v3967_v9 = vpop.eup %3966 }
 0x5de   :  { %v3969_v12 = vpop.eup %3968  ;;  %v1459_v56 = vadd.f32 1.0, %v3967_v9 }
 0x5df   :  { %v1460_v22 = vadd.f32 1.0, %v3969_v12 }
 0x5e0   :  { %3972 = vrcp.f32 %v1459_v56  ;;  %v1473_v32 = vand.u32 2147483648, %v1459_v56  ;;  %v1471_v11 = vand.u32 2147483647, %v1459_v56  ;;  %vm1467_vm8 = vweird.f32 %v1459_v56 }
 0x5e1   :  { %3974 = vrcp.f32 %v1460_v22  ;;  %v3971_v16 = vpop.eup %3970  ;;  %v1488_v19 = vand.u32 2147483648, %v1460_v22  ;;  %v1486_v10 = vand.u32 2147483647, %v1460_v22  ;;  %vm1482_vm10 = vweird.f32 %v1460_v22 }
 0x5e2   :  { %v1493_v41 = vmul.f32 %v3971_v16, %v1461_v1  ;;  %3976 = vtanh.f32 %v1449_v4  ;;  %v1474_v27 = vor.u32 1.1754944e-38, %v1473_v32  ;;  %vm1472_vm11 = vcmp.eq.f32.partialorder %v1471_v11, 8.507059e+37 }
 0x5e3   :  { %v1489_v15 = vor.u32 1.1754944e-38, %v1488_v19  ;;  %vm1487_vm13 = vcmp.eq.f32.partialorder %v1486_v10, 8.507059e+37  ;;  %vm1498_vm14 = vweird.f32 %v3971_v16  ;;  %v1503_v32 = vand.u32 2147483648, %v1461_v1 }
 0x5e4   :  { %v1494_v54 = vsub.f32 1.0, %v1493_v41  ;;  %vm1499_vm1 = vmor %vm1497_vm15, %vm1498_vm14 }
 0x5e6   :  { %v3973_v33 = vpop.eup %3972 }
 0x5e7   :  { %v3975_v35 = vpop.eup %3974  ;;  %v1463_v44 = vmul.f32 %v3973_v33, %v1459_v56  ;;  %vm1468_vm6 = vweird.f32 %v3973_v33 }
 0x5e8   :  { %v1478_v23 = vmul.f32 %v3975_v35, %v1460_v22  ;;  %vm1483_vm7 = vweird.f32 %v3975_v35  ;;  %vm1469_vm9 = vmor %vm1467_vm8, %vm1468_vm6  ;;  %v3977_v50 = vpop.eup %3976  ;;  %v1501_v22 = vand.u32 2147483647, %v1461_v1 }
 0x5e9   :  { %v1464_v0 = vsub.f32 1.0, %v1463_v44  ;;  %vm1484_vm12 = vmor %vm1482_vm10, %vm1483_vm7 }
 0x5ea   :  { %v1479_v39 = vsub.f32 1.0, %v1478_v23  ;;  %v1495_v23 = vmul.f32 %v3971_v16, %v1494_v54  ;;  %vm1502_vm2 = vcmp.eq.f32.partialorder %v1501_v22, 8.507059e+37 }
 0x5eb   :  { %v1465_v5 = vmul.f32 %v3973_v33, %v1464_v0 }
 0x5ec   :  { %v1480_v52 = vmul.f32 %v3975_v35, %v1479_v39  ;;  %v1496_v56 = vadd.f32 %v3971_v16, %v1495_v23 }
 0x5ed   :  { %v1466_v13 = vadd.f32 %v3973_v33, %v1465_v5  ;;  %v1504_v5 = vor.u32 1.1754944e-38, %v1503_v32 }
 0x5ee   :  { %v1481_v9 = vadd.f32 %v3975_v35, %v1480_v52 }
 0x5ef   :  { %v1470_v12 = vsel %vm1469_vm9, %v3973_v33, %v1466_v13  ;;  %v1500_v33 = vsel %vm1499_vm1, %v3971_v16, %v1496_v56 }
 0x5f0   :  { %v1475_v4 = vsel %vm1472_vm11, %v1474_v27, %v1470_v12  ;;  %v1485_v44 = vsel %vm1484_vm12, %v3975_v35, %v1481_v9  ;;  %v1505_v11 = vsel %vm1502_vm2, %v1504_v5, %v1500_v33 }
 0x5f1   :  { %v1509_v0 = vmul.f32 %v3977_v50, %v1475_v4  ;;  %v1490_v39 = vsel %vm1487_vm13, %v1489_v15, %v1485_v44 }
 0x5f2   :  { %v1508_v25 = vmul.f32 %v1490_v39, %v5075_v3 }
 0x5f4   :  { %v5123_v41 = vadd.f32 %v1509_v0, %v1508_v25 }
 0x5f6   :  { %3978 = vtanh.f32 %v5123_v41 }
 0x5fc   :  { %v3979_v35 = vpop.eup %3978 }
 0x5fd   :  { %v5126_v19 = vmul.f32 %v3979_v35, %v1505_v11 }
 0x5ff   :  { %v1518_v3 = vpack.c.bf16 %v5126_v19, %v5126_v19 }
 0x601   :  { %1527 = vmatmul.bf16.vlgmr.msra.gmra.mxu2 %v1518_v3  ;;  %1540 = vmatmul.bf16.vlgmr.msra.gmra.mxu3 %v1518_v3 }
 0x602   :  { %1553 = vmatmul.bf16.vlgmr.msrb.gmra.mxu0 %v1518_v3  ;;  %1566 = vmatmul.bf16.vlgmr.msrb.gmra.mxu1 %v1518_v3 }
 0x603   :  { %1769 = vmatpush.bf16.msra.mxu2 %v4556_v62  ;;  %1782 = vmatpush.bf16.msra.mxu3 %v4558_v2  ;;  %v5912_v62 = vld [vmem:[#allocation36_spill] sm:$0xff] }
 0x604   :  { %1795 = vmatpush.bf16.msrb.mxu0 %v4666_v24  ;;  %1808 = vmatpush.bf16.msrb.mxu1 %v4671_v28  ;;  %v617_v2 = vadd.f32 %v5912_v62, %v4889_v38 }
 0x607   :  { %1770 = vmatpush.bf16.msra.mxu2 %v4565_v6  ;;  %1783 = vmatpush.bf16.msra.mxu3 %v4567_v7 }
 0x608   :  { %1796 = vmatpush.bf16.msrb.mxu0 %v4675_v37  ;;  %1809 = vmatpush.bf16.msrb.mxu1 %v4681_v46 }
 0x60b   :  { %1771 = vmatpush.bf16.msra.mxu2 %v4585_v17  ;;  %1784 = vmatpush.bf16.msra.mxu3 %v4587_v20 }
 0x60c   :  { %1797 = vmatpush.bf16.msrb.mxu0 %v4690_v30  ;;  %1810 = vmatpush.bf16.msrb.mxu1 %v4693_v51 }
 0x60f   :  { %1772 = vmatpush.bf16.msra.mxu2 %v4591_v26  ;;  %1785 = vmatpush.bf16.msra.mxu3 %v4593_v31  ;;  %v5913_v26 = vld [vmem:[#allocation23_spill] sm:$0xff] }
 0x610   :  { %1798 = vmatpush.bf16.msrb.mxu0 %v4698_v60  ;;  %1811 = vmatpush.bf16.msrb.mxu1 %v4701_v61  ;;  %v535_v31 = vadd.f32 %v5913_v26, %v4865_v18 }
 0x613   :  { %1773 = vmatpush.bf16.msra.mxu2 %v4596_v34  ;;  %1786 = vmatpush.bf16.msra.mxu3 %v4599_v36  ;;  %v5914_v34 = vld [vmem:[#allocation24_spill] sm:$0xff] }
 0x614   :  { %1799 = vmatpush.bf16.msrb.mxu0 %v4715_v8  ;;  %1812 = vmatpush.bf16.msrb.mxu1 %v4748_v45  ;;  %v576_v36 = vadd.f32 %v5914_v34, %v4867_v21 }
 0x617   :  { %1774 = vmatpush.bf16.msra.mxu2 %v4602_v42  ;;  %1787 = vmatpush.bf16.msra.mxu3 %v4605_v43 }
 0x618   :  { %1800 = vmatpush.bf16.msrb.mxu0 %v4723_v14  ;;  %1813 = vmatpush.bf16.msrb.mxu1 %v4754_v48 }
 0x61b   :  { %1775 = vmatpush.bf16.msra.mxu2 %v4615_v49  ;;  %1788 = vmatpush.bf16.msra.mxu3 %v4617_v53 }
 0x61c   :  { %1801 = vmatpush.bf16.msrb.mxu0 %v4746_v29  ;;  %1814 = vmatpush.bf16.msrb.mxu1 %v4759_v55  ;;  %v5915_v29 = vld [vmem:[#allocation37_spill] sm:$0xff] }
 0x61d   :  { %v658_v45 = vadd.f32 %v5915_v29, %v5900_v40  ;;  %v1954_v29 = vld [vmem:[#allocation11 + $0x1c8] sm:$0xff] }
 0x61f   :  { %1776 = vmatpush.bf16.msra.mxu2 %v4620_v58  ;;  %1789 = vmatpush.bf16.msra.mxu3 %v4623_v59 }
 0x620   :  { %1802 = vmatpush.bf16.msrb.mxu0 %v4751_v47  ;;  %1815 = vmatpush.bf16.msrb.mxu1 %v4763_v63 }
 0x67f   :  { %v1554_v6 = vpop.f32.mrf.mxu0  ;;  %v1567_v7 = vpop.f32.mrf.mxu1 }
 0x680   :  { %v1573_v17 = vadd.f32 %v1554_v6, %v617_v2  ;;  %v1574_v55 = vadd.f32 %v1567_v7, %v658_v45  ;;  %v1955_v45 = vld [vmem:[#allocation11 + $0x1d0] sm:$0xff] }
 0x682   :  { %v3598_v20 = vmul.f32 -1.442695, %v1573_v17 }
 0x684   :  { %3980 = vpow2.f32 %v3598_v20  ;;  %v1528_v42 = vpop.f32.mrf.mxu2  ;;  %v1541_v43 = vpop.f32.mrf.mxu3 }
 0x685   :  { %v1571_v49 = vadd.f32 %v1528_v42, %v535_v31  ;;  %v1572_v53 = vadd.f32 %v1541_v43, %v576_v36  ;;  %v5916_v42 = vld [vmem:[#allocation38_spill] sm:$0xff] }
 0x687   :  { %v3596_v58 = vmul.f32 -1.442695, %v1571_v49  ;;  %v3597_v59 = vmul.f32 -1.442695, %v1572_v53  ;;  %v1556_v24 = vpop.f32.mrf.mxu0  ;;  %v1569_v28 = vpop.f32.mrf.mxu1  ;;  %v5917_v53 = vld [vmem:[#allocation25_spill] sm:$0xff] }
 0x688   :  { %v1957_v28 = vld [vmem:[#allocation11 + $0x1e0] sm:$0xff] }
 0x689   :  { %3982 = vpow2.f32 %v3596_v58  ;;  %v538_v58 = vadd.f32 %v5917_v53, %v4865_v18  ;;  %v1928_v53 = vld [vmem:[#allocation11 + $0xf8] sm:$0xff] }
 0x68a   :  { %v3981_v37 = vpop.eup %3980  ;;  %3984 = vpow2.f32 %v3597_v59  ;;  %v5918_v59 = vld [vmem:[#allocation26_spill] sm:$0xff] }
 0x68b   :  { %v1586_v51 = vadd.f32 1.0, %v3981_v37  ;;  %v579_v24 = vadd.f32 %v5918_v59, %v4867_v21  ;;  %v1958_v37 = vld [vmem:[#allocation11 + $0x1e8] sm:$0xff] }
 0x68c   :  { %v1530_v46 = vpop.f32.mrf.mxu2  ;;  %v1543_v30 = vpop.f32.mrf.mxu3  ;;  %v1922_v59 = vld [vmem:[#allocation11 + $0xc8] sm:$0xff] }
 0x68d   :  { %3986 = vrcp.f32 %v1586_v51  ;;  %v1628_v2 = vand.u32 2147483648, %v1586_v51  ;;  %vm1622_vm12 = vweird.f32 %v1586_v51  ;;  %v1626_v6 = vand.u32 2147483647, %v1586_v51  ;;  %v1959_v46 = vld [vmem:[#allocation11 + $0x1f0] sm:$0xff] }
 0x68f   :  { %v3983_v60 = vpop.eup %3982  ;;  %v1629_v17 = vor.u32 1.1754944e-38, %v1628_v2  ;;  %vm1627_vm14 = vcmp.eq.f32.partialorder %v1626_v6, 8.507059e+37  ;;  %v1929_v6 = vld [vmem:[#allocation11 + $0x100] sm:$0xff] }
 0x690   :  { %v3985_v61 = vpop.eup %3984  ;;  %v1584_v8 = vadd.f32 1.0, %v3983_v60  ;;  %v1960_v60 = vld [vmem:[#allocation11 + $0x1f8] sm:$0xff] }
 0x691   :  { %v1585_v14 = vadd.f32 1.0, %v3985_v61 }
 0x692   :  { %3988 = vrcp.f32 %v1584_v8  ;;  %v1598_v10 = vand.u32 2147483648, %v1584_v8  ;;  %v1596_v27 = vand.u32 2147483647, %v1584_v8  ;;  %vm1592_vm5 = vweird.f32 %v1584_v8 }
 0x693   :  { %3990 = vrcp.f32 %v1585_v14  ;;  %v3987_v47 = vpop.eup %3986  ;;  %v1613_v9 = vand.u32 2147483648, %v1585_v14  ;;  %v1611_v15 = vand.u32 2147483647, %v1585_v14  ;;  %vm1607_vm7 = vweird.f32 %v1585_v14 }
 0x694   :  { %v1618_v16 = vmul.f32 %v3987_v47, %v1586_v51  ;;  %3992 = vtanh.f32 %v1574_v55  ;;  %v1599_v44 = vor.u32 1.1754944e-38, %v1598_v10  ;;  %vm1597_vm8 = vcmp.eq.f32.partialorder %v1596_v27, 8.507059e+37  ;;  %v1952_v10 = vld [vmem:[#allocation11 + $0x1b8] sm:$0xff]  ;;  %v1947_v27 = vld [vmem:[#allocation11 + $0x190] sm:$0xff] }
 0x695   :  { %v1614_v39 = vor.u32 1.1754944e-38, %v1613_v9  ;;  %vm1612_vm10 = vcmp.eq.f32.partialorder %v1611_v15, 8.507059e+37  ;;  %vm1623_vm11 = vweird.f32 %v3987_v47  ;;  %v1948_v9 = vld [vmem:[#allocation11 + $0x198] sm:$0xff]  ;;  %v1941_v15 = vld [vmem:[#allocation11 + $0x160] sm:$0xff] }
 0x696   :  { %v1619_v50 = vsub.f32 1.0, %v1618_v16  ;;  %vm1624_vm13 = vmor %vm1622_vm12, %vm1623_vm11  ;;  %v1950_v16 = vld [vmem:[#allocation11 + $0x1a8] sm:$0xff] }
 0x698   :  { %v3989_v48 = vpop.eup %3988  ;;  %v1620_v33 = vmul.f32 %v3987_v47, %v1619_v50  ;;  %v1942_v50 = vld [vmem:[#allocation11 + $0x168] sm:$0xff] }
 0x699   :  { %v3991_v63 = vpop.eup %3990  ;;  %v1588_v25 = vmul.f32 %v3989_v48, %v1584_v8  ;;  %vm1593_vm3 = vweird.f32 %v3989_v48 }
 0x69a   :  { %v1603_v1 = vmul.f32 %v3991_v63, %v1585_v14  ;;  %vm1608_vm4 = vweird.f32 %v3991_v63  ;;  %vm1594_vm6 = vmor %vm1592_vm5, %vm1593_vm3  ;;  %v3993_v56 = vpop.eup %3992  ;;  %v1621_v62 = vadd.f32 %v3987_v47, %v1620_v33  ;;  %v1953_v14 = vld [vmem:[#allocation11 + $0x1c0] sm:$0xff] }
 0x69b   :  { %v1589_v52 = vsub.f32 1.0, %v1588_v25  ;;  %vm1609_vm9 = vmor %vm1607_vm7, %vm1608_vm4 }
 0x69c   :  { %v1604_v54 = vsub.f32 1.0, %v1603_v1  ;;  %v1625_v7 = vsel %vm1624_vm13, %v3987_v47, %v1621_v62  ;;  %v1956_v47 = vld [vmem:[#allocation11 + $0x1d8] sm:$0xff]  ;;  %v1949_v1 = vld [vmem:[#allocation11 + $0x1a0] sm:$0xff] }
 0x69d   :  { %v1590_v13 = vmul.f32 %v3989_v48, %v1589_v52  ;;  %v1630_v26 = vsel %vm1627_vm14, %v1629_v17, %v1625_v7  ;;  %v1951_v52 = vld [vmem:[#allocation11 + $0x1b0] sm:$0xff]  ;;  %v1936_v62 = vld [vmem:[#allocation11 + $0x138] sm:$0xff]  ;;  %v1930_v7 = vld [vmem:[#allocation11 + $0x108] sm:$0xff] }
 0x69e   :  { %v1605_v12 = vmul.f32 %v3991_v63, %v1604_v54  ;;  %v1945_v54 = vld [vmem:[#allocation11 + $0x180] sm:$0xff] }
 0x69f   :  { %v1591_v4 = vadd.f32 %v3989_v48, %v1590_v13  ;;  %v1946_v13 = vld [vmem:[#allocation11 + $0x188] sm:$0xff] }
 0x6a0   :  { %v1606_v23 = vadd.f32 %v3991_v63, %v1605_v12 }
 0x6a1   :  { %v1595_v0 = vsel %vm1594_vm6, %v3989_v48, %v1591_v4  ;;  %v1943_v4 = vld [vmem:[#allocation11 + $0x170] sm:$0xff] }
 0x6a2   :  { %v1600_v32 = vsel %vm1597_vm8, %v1599_v44, %v1595_v0  ;;  %v1610_v22 = vsel %vm1609_vm9, %v3991_v63, %v1606_v23  ;;  %v1944_v44 = vld [vmem:[#allocation11 + $0x178] sm:$0xff]  ;;  %v1937_v23 = vld [vmem:[#allocation11 + $0x140] sm:$0xff]  ;;  %v1938_v0 = vld [vmem:[#allocation11 + $0x148] sm:$0xff] }
 0x6a3   :  { %v1634_v5 = vmul.f32 %v3993_v56, %v1600_v32  ;;  %v1615_v35 = vsel %vm1612_vm10, %v1614_v39, %v1610_v22  ;;  %v1939_v32 = vld [vmem:[#allocation11 + $0x150] sm:$0xff]  ;;  %v1940_v22 = vld [vmem:[#allocation11 + $0x158] sm:$0xff] }
 0x6a4   :  { %v1633_v11 = vmul.f32 %v1615_v35, %v5123_v41  ;;  %v1934_v35 = vld [vmem:[#allocation11 + $0x128] sm:$0xff] }
 0x6a6   :  { %v5171_v3 = vadd.f32 %v1634_v5, %v1633_v11  ;;  %v1933_v5 = vld [vmem:[#allocation11 + $0x120] sm:$0xff]  ;;  %v1935_v11 = vld [vmem:[#allocation11 + $0x130] sm:$0xff] }
 0x6a8   :  { %3994 = vtanh.f32 %v5171_v3 }
 0x6ae   :  { %v3995_v20 = vpop.eup %3994 }
 0x6af   :  { %v5174_v31 = vmul.f32 %v3995_v20, %v1630_v26  ;;  %v1931_v26 = vld [vmem:[#allocation11 + $0x110] sm:$0xff] }
 0x6b1   :  { %v1643_v41 = vpack.c.bf16 %v5174_v31, %v5174_v31 }
 0x6b3   :  { %1652 = vmatmul.bf16.vlgmr.msrb.gmra.mxu2 %v1643_v41  ;;  %1665 = vmatmul.bf16.vlgmr.msrb.gmra.mxu3 %v1643_v41 }
 0x6b4   :  { %1678 = vmatmul.bf16.vlgmr.msra.gmra.mxu0 %v1643_v41  ;;  %1691 = vmatmul.bf16.vlgmr.msra.gmra.mxu1 %v1643_v41  ;;  %v1932_v41 = vld [vmem:[#allocation11 + $0x118] sm:$0xff] }
 0x6b5   :  { %1971 = vmatpush.msrb.mxu2 %v1957_v28  ;;  %2012 = vmatpush.msrb.mxu3 %v1958_v37  ;;  %v1924_v28 = vld [vmem:[#allocation11 + $0xd8] sm:$0xff] }
 0x6b6   :  { %2053 = vmatpush.msra.mxu0 %v1959_v46  ;;  %2094 = vmatpush.msra.mxu1 %v1960_v60  ;;  %v1917_v46 = vld [vmem:[#allocation11 + $0xa0] sm:$0xff] }
 0x6b7   :  { %1972 = vmatpush.msrb.mxu2 %v1953_v14  ;;  %2013 = vmatpush.msrb.mxu3 %v1954_v29  ;;  %v1920_v14 = vld [vmem:[#allocation11 + $0xb8] sm:$0xff]  ;;  %v1913_v29 = vld [vmem:[#allocation11 + $0x80] sm:$0xff] }
 0x6b8   :  { %2054 = vmatpush.msra.mxu0 %v1955_v45  ;;  %2095 = vmatpush.msra.mxu1 %v1956_v47  ;;  %v1914_v45 = vld [vmem:[#allocation11 + $0x88] sm:$0xff] }
 0x6b9   :  { %1973 = vmatpush.msrb.mxu2 %v1949_v1  ;;  %2014 = vmatpush.msrb.mxu3 %v1950_v16  ;;  %v1910_v1 = vld [vmem:[#allocation11 + $0x68] sm:$0xff] }
 0x6ba   :  { %2055 = vmatpush.msra.mxu0 %v1951_v52  ;;  %2096 = vmatpush.msra.mxu1 %v1952_v10  ;;  %v1911_v10 = vld [vmem:[#allocation11 + $0x70] sm:$0xff] }
 0x6bb   :  { %1974 = vmatpush.msrb.mxu2 %v1945_v54  ;;  %2015 = vmatpush.msrb.mxu3 %v1946_v13  ;;  %v1912_v54 = vld [vmem:[#allocation11 + $0x78] sm:$0xff] }
 0x6bc   :  { %2056 = vmatpush.msra.mxu0 %v1947_v27  ;;  %2097 = vmatpush.msra.mxu1 %v1948_v9  ;;  %v1905_v9 = vld [vmem:[#allocation11 + $0x40] sm:$0xff] }
 0x6bd   :  { %1975 = vmatpush.msrb.mxu2 %v1941_v15  ;;  %2016 = vmatpush.msrb.mxu3 %v1942_v50 }
 0x6be   :  { %2057 = vmatpush.msra.mxu0 %v1943_v4  ;;  %2098 = vmatpush.msra.mxu1 %v1944_v44  ;;  %v1907_v44 = vld [vmem:[#allocation11 + $0x50] sm:$0xff] }
 0x6bf   :  { %1976 = vmatpush.msrb.mxu2 %v1937_v23  ;;  %2017 = vmatpush.msrb.mxu3 %v1938_v0  ;;  %v1908_v23 = vld [vmem:[#allocation11 + $0x58] sm:$0xff] }
 0x6c0   :  { %2058 = vmatpush.msra.mxu0 %v1939_v32  ;;  %2099 = vmatpush.msra.mxu1 %v1940_v22  ;;  %v1902_v32 = vld [vmem:[#allocation11 + $0x28] sm:$0xff] }
 0x6c1   :  { %1977 = vmatpush.msrb.mxu2 %v1933_v5  ;;  %2018 = vmatpush.msrb.mxu3 %v1934_v35  ;;  %v1903_v35 = vld [vmem:[#allocation11 + $0x30] sm:$0xff] }
 0x6c2   :  { %2059 = vmatpush.msra.mxu0 %v1935_v11  ;;  %2100 = vmatpush.msra.mxu1 %v1936_v62  ;;  %v1904_v11 = vld [vmem:[#allocation11 + $0x38] sm:$0xff] }
 0x6c3   :  { %1978 = vmatpush.msrb.mxu2 %v1929_v6  ;;  %2019 = vmatpush.msrb.mxu3 %v1930_v7  ;;  %v1897_v7 = vld [vmem:[#allocation11] sm:$0xff] }
 0x6c4   :  { %2060 = vmatpush.msra.mxu0 %v1931_v26  ;;  %2101 = vmatpush.msra.mxu1 %v1932_v41  ;;  %v1899_v41 = vld [vmem:[#allocation11 + $0x10] sm:$0xff] }
 0x6c6   :  { %2102 = vmatpush.msra.mxu1 %v1928_v53 }
 0x6c8   :  { %2103 = vmatpush.msra.mxu1 %v1924_v28 }
 0x6ca   :  { %2104 = vmatpush.msra.mxu1 %v1920_v14 }
 0x731   :  { %v1679_v34 = vpop.f32.mrf.mxu0  ;;  %v5178_v36 = vpop.f32.mrf.mxu1 }
 0x732   :  { %v1698_v43 = vadd.f32 %v1679_v34, %v5916_v42  ;;  %v1925_v42 = vld [vmem:[#allocation11 + $0xe0] sm:$0xff] }
 0x733   :  { %1979 = vmatpush.msrb.mxu2 %v1925_v42  ;;  %v1900_v42 = vld [vmem:[#allocation11 + $0x18] sm:$0xff] }
 0x734   :  { %v3601_v49 = vmul.f32 -1.442695, %v1698_v43  ;;  %v1926_v43 = vld [vmem:[#allocation11 + $0xe8] sm:$0xff] }
 0x735   :  { %2020 = vmatpush.msrb.mxu3 %v1926_v43 }
 0x736   :  { %3996 = vpow2.f32 %v3601_v49  ;;  %v1653_v30 = vpop.f32.mrf.mxu2  ;;  %v1666_v51 = vpop.f32.mrf.mxu3  ;;  %v1927_v49 = vld [vmem:[#allocation11 + $0xf0] sm:$0xff] }
 0x737   :  { %v1696_v61 = vadd.f32 %v1653_v30, %v538_v58  ;;  %v1697_v8 = vadd.f32 %v1666_v51, %v579_v24  ;;  %v1921_v58 = vld [vmem:[#allocation11 + $0xc0] sm:$0xff]  ;;  %2061 = vmatpush.msra.mxu0 %v1927_v49  ;;  %v1923_v24 = vld [vmem:[#allocation11 + $0xd0] sm:$0xff]  ;;  %2021 = vmatpush.msrb.mxu3 %v1922_v59  ;;  %v1918_v30 = vld [vmem:[#allocation11 + $0xa8] sm:$0xff] }
 0x738   :  { %1980 = vmatpush.msrb.mxu2 %v1921_v58  ;;  %v1919_v51 = vld [vmem:[#allocation11 + $0xb0] sm:$0xff] }
 0x739   :  { %v3599_v48 = vmul.f32 -1.442695, %v1696_v61  ;;  %v3600_v55 = vmul.f32 -1.442695, %v1697_v8  ;;  %v1681_v63 = vpop.f32.mrf.mxu0  ;;  %v1694_v25 = vpop.f32.mrf.mxu1  ;;  %v5919_v61 = vld [vmem:[#allocation39_spill] sm:$0xff]  ;;  %2062 = vmatpush.msra.mxu0 %v1923_v24  ;;  %2022 = vmatpush.msrb.mxu3 %v1918_v30 }
 0x73a   :  { %v1699_v8 = vadd.f32 %v5178_v36, %v5919_v61  ;;  %1981 = vmatpush.msrb.mxu2 %v1917_v46  ;;  %v1916_v63 = vld [vmem:[#allocation11 + $0x98] sm:$0xff]  ;;  %v1909_v36 = vld [vmem:[#allocation11 + $0x60] sm:$0xff] }
 0x73b   :  { %3998 = vpow2.f32 %v3599_v48  ;;  %2063 = vmatpush.msra.mxu0 %v1919_v51  ;;  %2023 = vmatpush.msrb.mxu3 %v1914_v45  ;;  %v5922_v45 = vld [vmem:[#allocation35_spill] sm:$0xff] }
 0x73c   :  { %v3997_v12 = vpop.eup %3996  ;;  %4000 = vpow2.f32 %v3600_v55  ;;  %v1915_v55 = vld [vmem:[#allocation11 + $0x90] sm:$0xff]  ;;  %1982 = vmatpush.msrb.mxu2 %v1913_v29  ;;  %2105 = vmatpush.msra.mxu1 %v1916_v63 }
 0x73d   :  { %v5185_v33 = vadd.f32 1.0, %v3997_v12  ;;  %2064 = vmatpush.msra.mxu0 %v1915_v55  ;;  %v1906_v12 = vld [vmem:[#allocation11 + $0x48] sm:$0xff]  ;;  %2024 = vmatpush.msrb.mxu3 %v1910_v1  ;;  %v3721_v63 = vld [vmem:[#allocation12 + $0xf0] sm:$0xf0]  ;;  %v3815_v1 = vld [vmem:[#allocation12 + $0xcc] sm:$0xf0] }
 0x73e   :  { %v1655_v39 = vpop.f32.mrf.mxu2  ;;  %v1668_v56 = vpop.f32.mrf.mxu3  ;;  %1983 = vmatpush.msrb.mxu2 %v1909_v36  ;;  %2106 = vmatpush.msra.mxu1 %v1912_v54  ;;  %v3703_v36 = vld [vmem:[#allocation12 + $0xc0] sm:$0xf]  ;;  %v3727_v54 = vld [vmem:[#allocation12 + $0xe8] sm:$0xf] }
 0x73f   :  { %4002 = vrcp.f32 %v5185_v33  ;;  %2065 = vmatpush.msra.mxu0 %v1911_v10  ;;  %v1901_v56 = vld [vmem:[#allocation11 + $0x20] sm:$0xff]  ;;  %2025 = vmatpush.msrb.mxu3 %v1906_v12  ;;  %v1753_v30 = vand.u32 2147483648, %v5185_v33  ;;  %vm1747_vm9 = vweird.f32 %v5185_v33  ;;  %v1751_v51 = vand.u32 2147483647, %v5185_v33  ;;  %v3705_v10 = vld [vmem:[#allocation12 + $0xd0] sm:$0xf0] }
 0x740   :  { %1984 = vmatpush.msrb.mxu2 %v1905_v9  ;;  %2107 = vmatpush.msra.mxu1 %v1908_v23  ;;  %v3818_v9 = vld [vmem:[#allocation12 + $0xec] sm:$0xf]  ;;  %v3729_v12 = vld [vmem:[#allocation12 + $0xf8] sm:$0xf0] }
 0x741   :  { %v3999_v2 = vpop.eup %3998  ;;  %2066 = vmatpush.msra.mxu0 %v1907_v44  ;;  %2026 = vmatpush.msrb.mxu3 %v1902_v32  ;;  %vm1752_vm11 = vcmp.eq.f32.partialorder %v1751_v51, 8.507059e+37  ;;  %v3713_v23 = vld [vmem:[#allocation12 + $0xd8] sm:$0xf0]  ;;  %v3673_v51 = vld [vmem:[#allocation12 + $0x90] sm:$0xf0] }
 0x742   :  { %v4001_v17 = vpop.eup %4000  ;;  %v5187_v20 = vadd.f32 1.0, %v3999_v2  ;;  %1985 = vmatpush.msrb.mxu2 %v1901_v56  ;;  %2108 = vmatpush.msra.mxu1 %v1904_v11  ;;  %v3809_v11 = vld [vmem:[#allocation12 + $0xa4] sm:$0xf] }
 0x743   :  { %v5190_v34 = vadd.f32 1.0, %v4001_v17  ;;  %v1898_v17 = vld [vmem:[#allocation11 + $0x8] sm:$0xff]  ;;  %2067 = vmatpush.msra.mxu0 %v1903_v35  ;;  %v3811_v35 = vld [vmem:[#allocation12 + $0xac] sm:$0xf0] }
 0x744   :  { %4004 = vrcp.f32 %v5187_v20  ;;  %v1723_v13 = vand.u32 2147483648, %v5187_v20  ;;  %v1721_v50 = vand.u32 2147483647, %v5187_v20  ;;  %vm1717_vm2 = vweird.f32 %v5187_v20  ;;  %1986 = vmatpush.msrb.mxu2 %v1897_v7  ;;  %2027 = vmatpush.msrb.mxu3 %v1898_v17  ;;  %v3695_v7 = vld [vmem:[#allocation12 + $0xa8] sm:$0xf] }
 0x745   :  { %4006 = vrcp.f32 %v5190_v34  ;;  %v5194_v37 = vpop.eup %4002  ;;  %v1738_v4 = vand.u32 2147483648, %v5190_v34  ;;  %v1736_v39 = vand.u32 2147483647, %v5190_v34  ;;  %vm1732_vm4 = vweird.f32 %v5190_v34  ;;  %2068 = vmatpush.msra.mxu0 %v1899_v41  ;;  %2109 = vmatpush.msra.mxu1 %v1900_v42  ;;  %v3812_v17 = vld [vmem:[#allocation12 + $0xb4] sm:$0xf0] }
 0x746   :  { %v1743_v16 = vmul.f32 %v5194_v37, %v5185_v33  ;;  %4008 = vtanh.f32 %v1699_v8  ;;  %v1724_v2 = vor.u32 1.1754944e-38, %v1723_v13  ;;  %vm1722_vm5 = vcmp.eq.f32.partialorder %v1721_v50, 8.507059e+37  ;;  %v5923_v33 = vld [vmem:[#allocation18_spill] sm:$0xff]  ;;  %v3816_v50 = vld [vmem:[#allocation12 + $0xd4] sm:$0xf0] }
 0x747   :  { %v1739_v26 = vor.u32 1.1754944e-38, %v1738_v4  ;;  %vm1737_vm7 = vcmp.eq.f32.partialorder %v1736_v39, 8.507059e+37  ;;  %vm1748_vm8 = vweird.f32 %v5194_v37  ;;  %v3814_v4 = vld [vmem:[#allocation12 + $0xcc] sm:$0xf]  ;;  %v5925_v39 = vld [vmem:[#allocation40_spill] sm:$0xff] }
 0x748   :  { %v1744_v22 = vsub.f32 1.0, %v1743_v16  ;;  %vm1749_vm10 = vmor %vm1747_vm9, %vm1748_vm8  ;;  %v3813_v16 = vld [vmem:[#allocation12 + $0xc4] sm:$0xf]  ;;  %v623_v56 = vadd.f32 %v5925_v39, %v4889_v38  ;;  %v3810_v38 = vld [vmem:[#allocation12 + $0xac] sm:$0xf] }
 0x749   :  { %v5275_v13 = vor.u32 %v3813_v16, %v3705_v10  ;;  %v3697_v41 = vld [vmem:[#allocation12 + $0xb8] sm:$0xf0]  ;;  %v3663_v39 = vld [vmem:[#allocation12 + $0x68] sm:$0xf] }
 0x74a   :  { %v5196_v60 = vpop.eup %4004  ;;  %v1745_v53 = vmul.f32 %v5194_v37, %v1744_v22 }
 0x74b   :  { %v5200_v47 = vpop.eup %4006  ;;  %v1713_v48 = vmul.f32 %v5196_v60, %v5187_v20  ;;  %vm1718_vm15 = vweird.f32 %v5196_v60 }
 0x74c   :  { %v1728_v25 = vmul.f32 %v5200_v47, %v5190_v34  ;;  %vm1733_vm1 = vweird.f32 %v5200_v47  ;;  %vm5220_vm3 = vmor %vm1717_vm2, %vm1718_vm15  ;;  %v4009_v43 = vpop.eup %4008  ;;  %v1746_v46 = vadd.f32 %v5194_v37, %v1745_v53  ;;  %v5926_v53 = vld [vmem:[#allocation27_spill] sm:$0xff] }
 0x74d   :  { %v1714_v52 = vsub.f32 1.0, %v1713_v48  ;;  %vm1734_vm6 = vmor %vm1732_vm4, %vm1733_vm1  ;;  %v3817_v48 = vld [vmem:[#allocation12 + $0xe4] sm:$0xf] }
 0x74e   :  { %v1729_v27 = vsub.f32 1.0, %v1728_v25  ;;  %v5257_v25 = vor.u32 %v3817_v48, %v3721_v63  ;;  %v3679_v48 = vld [vmem:[#allocation12 + $0x88] sm:$0xf]  ;;  %v3808_v63 = vld [vmem:[#allocation12 + $0x94] sm:$0xf0] }
 0x74f   :  { %v1715_v15 = vmul.f32 %v5196_v60, %v1714_v52  ;;  %v5273_v52 = vor.u32 %v3815_v1, %v3703_v36 }
 0x750   :  { %v1730_v0 = vmul.f32 %v5200_v47, %v1729_v27 }
 0x751   :  { %v1716_v5 = vadd.f32 %v5196_v60, %v1715_v15  ;;  %v3711_v15 = vld [vmem:[#allocation12 + $0xc8] sm:$0xf] }
 0x752   :  { %v1731_v6 = vadd.f32 %v5200_v47, %v1730_v0  ;;  %v5285_v44 = vor.u32 %v3816_v50, %v3711_v15  ;;  %v5287_v0 = vor.u32 %v3814_v4, %v3713_v23  ;;  %v3681_v15 = vld [vmem:[#allocation12 + $0x98] sm:$0xf0]  ;;  %v3623_v4 = vld [vmem:[#allocation12 + $0x20] sm:$0xf]  ;;  %v3795_v23 = vld [vmem:[#allocation12 + $0x2c] sm:$0xf0] }
 0x753   :  { %v1720_v20 = vsel %vm5220_vm3, %v5196_v60, %v1716_v5  ;;  %v1750_v60 = vsel %vm1749_vm10, %v5194_v37, %v1746_v46  ;;  %v3719_v37 = vld [vmem:[#allocation12 + $0xe0] sm:$0xf] }
 0x754   :  { %v1725_v49 = vsel %vm1722_vm5, %v1724_v2, %v1720_v20  ;;  %v1735_v34 = vsel %vm1734_vm6, %v5200_v47, %v1731_v6  ;;  %v3819_v47 = vld [vmem:[#allocation12 + $0xec] sm:$0xf0]  ;;  %v3687_v5 = vld [vmem:[#allocation12 + $0xa0] sm:$0xf]  ;;  %v3689_v6 = vld [vmem:[#allocation12 + $0xb0] sm:$0xf0] }
 0x755   :  { %v1759_v58 = vmul.f32 %v4009_v43, %v1725_v49  ;;  %v1740_v59 = vsel %vm1737_vm7, %v1739_v26, %v1735_v34  ;;  %v5255_v55 = vor.u32 %v3819_v47, %v3719_v37  ;;  %v5295_v2 = vor.u32 %v3811_v35, %v3687_v5  ;;  %v3671_v43 = vld [vmem:[#allocation12 + $0x80] sm:$0xf]  ;;  %v3807_v49 = vld [vmem:[#allocation12 + $0x8c] sm:$0xf0]  ;;  %v3804_v5 = vld [vmem:[#allocation12 + $0x74] sm:$0xf0] }
 0x756   :  { %v1758_v24 = vmul.f32 %v1740_v59, %v5171_v3  ;;  %v1754_v3 = vor.u32 1.1754944e-38, %v1753_v30  ;;  %v5297_v20 = vor.u32 %v3809_v11, %v3689_v6  ;;  %v5299_v26 = vor.u32 %v3812_v17, %v3695_v7  ;;  %v5927_v59 = vld [vmem:[#allocation28_spill] sm:$0xff]  ;;  %v3805_v30 = vld [vmem:[#allocation12 + $0x84] sm:$0xf]  ;;  %v3799_v47 = vld [vmem:[#allocation12 + $0x4c] sm:$0xf0] }
 0x757   :  { %v5302_v34 = vor.u32 %v3810_v38, %v3697_v41  ;;  %v5309_v46 = vor.u32 %v3807_v49, %v3671_v43  ;;  %v3802_v35 = vld [vmem:[#allocation12 + $0x6c] sm:$0xf]  ;;  %v3665_v11 = vld [vmem:[#allocation12 + $0x78] sm:$0xf0]  ;;  %v3793_v6 = vld [vmem:[#allocation12 + $0x24] sm:$0xf]  ;;  %v5333_v7 = vor.u32 %v3804_v5, %v3663_v39 }
 0x758   :  { %v5234_v28 = vadd.f32 %v1759_v58, %v1758_v24  ;;  %v1755_v8 = vsel %vm1752_vm11, %v1754_v3, %v1750_v60  ;;  %v541_v58 = vadd.f32 %v5926_v53, %v4865_v18  ;;  %v582_v24 = vadd.f32 %v5927_v59, %v4867_v21  ;;  %v3655_v60 = vld [vmem:[#allocation12 + $0x60] sm:$0xf]  ;;  %v3657_v18 = vld [vmem:[#allocation12 + $0x70] sm:$0xf0]  ;;  %v3647_v38 = vld [vmem:[#allocation12 + $0x48] sm:$0xf] }
 0x759   :  { %v5335_v17 = vor.u32 %v3802_v35, %v3665_v11  ;;  %v3800_v41 = vld [vmem:[#allocation12 + $0x54] sm:$0xf0]  ;;  %v3625_v49 = vld [vmem:[#allocation12 + $0x30] sm:$0xf0]  ;;  %v3798_v53 = vld [vmem:[#allocation12 + $0x4c] sm:$0xf] }
 0x75a   :  { %4010 = vtanh.f32 %v5234_v28  ;;  %v3617_v39 = vld [vmem:[#allocation12 + $0x18] sm:$0xf0] }
 0x760   :  { %v4011_v61 = vpop.eup %4010 }
 0x761   :  { %v1762_v14 = vmul.f32 %v4011_v61, %v1755_v8  ;;  %v5312_v8 = vor.u32 %v3805_v30, %v3673_v51  ;;  %v5343_v30 = vor.u32 %v3795_v23, %v3623_v4  ;;  %v3790_v23 = vld [vmem:[#allocation12 + $0xc] sm:$0xf] }
 0x763   :  { %v1768_v29 = vpack.c.bf16 %v1762_v14, %v1762_v14 }
 0x765   :  { %1777 = vmatmul.bf16.vlgmr.msra.gmra.mxu2 %v1768_v29  ;;  %1790 = vmatmul.bf16.vlgmr.msra.gmra.mxu3 %v1768_v29 }
 0x766   :  { %1803 = vmatmul.bf16.vlgmr.msrb.gmra.mxu0 %v1768_v29  ;;  %1816 = vmatmul.bf16.vlgmr.msrb.gmra.mxu1 %v1768_v29  ;;  %v3801_v29 = vld [vmem:[#allocation12 + $0x64] sm:$0xf] }
 0x767   :  { %2363 = vmatpush.bf16.msra.mxu2 %v5255_v55  ;;  %2376 = vmatpush.bf16.msra.mxu3 %v5257_v25  ;;  %v5319_v10 = vor.u32 %v3801_v29, %v3657_v18  ;;  %v3631_v29 = vld [vmem:[#allocation12 + $0x28] sm:$0xf]  ;;  %v3796_v18 = vld [vmem:[#allocation12 + $0x34] sm:$0xf0] }
 0x76b   :  { %2364 = vmatpush.bf16.msra.mxu2 %v5273_v52  ;;  %2377 = vmatpush.bf16.msra.mxu3 %v5275_v13 }
 0x76f   :  { %2365 = vmatpush.bf16.msra.mxu2 %v5295_v2  ;;  %2378 = vmatpush.bf16.msra.mxu3 %v5297_v20 }
 0x773   :  { %2366 = vmatpush.bf16.msra.mxu2 %v5309_v46  ;;  %2379 = vmatpush.bf16.msra.mxu3 %v5312_v8 }
 0x775   :  { %1987 = vmatmul.f32.vlgmr.msrb.gmra.mxu2 %v5922_v45  ;;  %2028 = vmatmul.f32.vlgmr.msrb.gmra.mxu3 %v5922_v45 }
 0x776   :  { %2069 = vmatmul.f32.vlgmr.msra.gmra.mxu0 %v5922_v45  ;;  %2110 = vmatmul.f32.vlgmr.msra.gmra.mxu1 %v5922_v45 }
 0x777   :  { %2380 = vmatpush.bf16.msra.mxu3 %v5319_v10 }
 0x77d   :  { %1990 = vmatmul.f32.gmra.mxu2 %v4982_v57  ;;  %2031 = vmatmul.f32.gmra.mxu3 %v4982_v57 }
 0x77e   :  { %2072 = vmatmul.f32.gmra.mxu0 %v4982_v57  ;;  %2113 = vmatmul.f32.gmra.mxu1 %v4982_v57  ;;  %v5924_v57 = vld [vmem:[#allocation29_spill] sm:$0xff] }
 0x785   :  { %1993 = vmatmul.f32.gmra.mxu2 %v5923_v33  ;;  %2034 = vmatmul.f32.gmra.mxu3 %v5923_v33 }
 0x786   :  { %2075 = vmatmul.f32.gmra.mxu0 %v5923_v33  ;;  %2116 = vmatmul.f32.gmra.mxu1 %v5923_v33  ;;  %v3639_v33 = vld [vmem:[#allocation12 + $0x40] sm:$0xf] }
 0x78d   :  { %1996 = vmatmul.f32.gmra.mxu2 %v5924_v57  ;;  %2037 = vmatmul.f32.gmra.mxu3 %v5924_v57 }
 0x78e   :  { %2078 = vmatmul.f32.gmra.mxu0 %v5924_v57  ;;  %2119 = vmatmul.f32.gmra.mxu1 %v5924_v57 }
 0x795   :  { %1999 = vmatmul.f32.gmra.mxu2 %v5126_v19  ;;  %2040 = vmatmul.f32.gmra.mxu3 %v5126_v19 }
 0x796   :  { %2081 = vmatmul.f32.gmra.mxu0 %v5126_v19  ;;  %2122 = vmatmul.f32.gmra.mxu1 %v5126_v19  ;;  %v3820_v19 = vld [vmem:[#allocation12 + $0xf4] sm:$0xf0] }
 0x797   :  { %v5277_v27 = vor.u32 %v3820_v19, %v3727_v54  ;;  %v5321_v54 = vor.u32 %v3808_v63, %v3679_v48  ;;  %v3806_v19 = vld [vmem:[#allocation12 + $0x8c] sm:$0xf]  ;;  %v3791_v48 = vld [vmem:[#allocation12 + $0xc] sm:$0xf0]  ;;  %v3633_v63 = vld [vmem:[#allocation12 + $0x38] sm:$0xf0] }
 0x798   :  { %v5324_v50 = vor.u32 %v3806_v19, %v3681_v15  ;;  %v5928_v19 = vld [vmem:[#allocation41_spill] sm:$0xff] }
 0x799   :  { %2389 = vmatpush.bf16.msrb.mxu0 %v5277_v27 }
 0x79d   :  { %2002 = vmatmul.f32.gmra.mxu2 %v5174_v31  ;;  %2043 = vmatmul.f32.gmra.mxu3 %v5174_v31 }
 0x79e   :  { %2084 = vmatmul.f32.gmra.mxu0 %v5174_v31  ;;  %2125 = vmatmul.f32.gmra.mxu1 %v5174_v31  ;;  %v5280_v31 = vor.u32 %v3818_v9, %v3729_v12  ;;  %v3797_v9 = vld [vmem:[#allocation12 + $0x44] sm:$0xf]  ;;  %v3641_v12 = vld [vmem:[#allocation12 + $0x50] sm:$0xf0] }
 0x79f   :  { %2390 = vmatpush.bf16.msrb.mxu0 %v5285_v44 }
 0x7a0   :  { %2402 = vmatpush.bf16.msrb.mxu1 %v5280_v31 }
 0x7a3   :  { %2391 = vmatpush.bf16.msrb.mxu0 %v5299_v26 }
 0x7a4   :  { %2403 = vmatpush.bf16.msrb.mxu1 %v5287_v0 }
 0x7a5   :  { %2005 = vmatmul.f32.gmra.mxu2 %v1762_v14  ;;  %2046 = vmatmul.f32.gmra.mxu3 %v1762_v14 }
 0x7a6   :  { %2087 = vmatmul.f32.gmra.mxu0 %v1762_v14  ;;  %2128 = vmatmul.f32.gmra.mxu1 %v1762_v14  ;;  %v3803_v14 = vld [vmem:[#allocation12 + $0x6c] sm:$0xf0] }
 0x7a7   :  { %v5316_v37 = vor.u32 %v3803_v14, %v3655_v60  ;;  %2392 = vmatpush.bf16.msrb.mxu0 %v5321_v54  ;;  %v5346_v60 = vor.u32 %v3793_v6, %v3625_v49 }
 0x7a8   :  { %2404 = vmatpush.bf16.msrb.mxu1 %v5302_v34 }
 0x7a9   :  { %2367 = vmatpush.bf16.msra.mxu2 %v5316_v37 }
 0x7ab   :  { %2393 = vmatpush.bf16.msrb.mxu0 %v5333_v7 }
 0x7ac   :  { %2405 = vmatpush.bf16.msrb.mxu1 %v5324_v50 }
 0x7b0   :  { %2406 = vmatpush.bf16.msrb.mxu1 %v5335_v17 }
 0x7e3   :  { %v1804_v32 = vpop.f32.mrf.mxu0  ;;  %v5292_v22 = vpop.f32.mrf.mxu1 }
 0x7e4   :  { %v1823_v62 = vadd.f32 %v1804_v32, %v623_v56  ;;  %v5327_v32 = vor.u32 %v3799_v47, %v3639_v33  ;;  %v3794_v33 = vld [vmem:[#allocation12 + $0x2c] sm:$0xf]  ;;  %v3607_v47 = vld [vmem:[#allocation12] sm:$0xf] }
 0x7e5   :  { %v5371_v4 = vor.u32 %v3794_v33, %v3633_v63 }
 0x7e6   :  { %v3604_v42 = vmul.f32 -1.442695, %v1823_v62  ;;  %v5330_v62 = vor.u32 %v3797_v9, %v3641_v12  ;;  %2368 = vmatpush.bf16.msra.mxu2 %v5327_v32  ;;  %v664_v9 = vadd.f32 %v5928_v19, %v5900_v40  ;;  %v5367_v12 = vor.u32 %v3791_v48, %v3607_v47 }
 0x7e8   :  { %4012 = vpow2.f32 %v3604_v42  ;;  %v1778_v3 = vpop.f32.mrf.mxu2  ;;  %v1791_v61 = vpop.f32.mrf.mxu3  ;;  %2381 = vmatpush.bf16.msra.mxu3 %v5330_v62  ;;  %v1824_v11 = vadd.f32 %v5292_v22, %v664_v9 }
 0x7e9   :  { %v1821_v21 = vadd.f32 %v1778_v3, %v541_v58  ;;  %v1822_v45 = vadd.f32 %v1791_v61, %v582_v24  ;;  %v3649_v58 = vld [vmem:[#allocation12 + $0x58] sm:$0xf0]  ;;  %v5340_v24 = vor.u32 %v3800_v41, %v3647_v38  ;;  %v5383_v38 = vor.u32 %v3790_v23, %v3617_v39 }
 0x7ea   :  { %v5349_v3 = vor.u32 %v3798_v53, %v3649_v58  ;;  %2369 = vmatpush.bf16.msra.mxu2 %v5343_v30 }
 0x7eb   :  { %v3602_v57 = vmul.f32 -1.442695, %v1821_v21  ;;  %v3603_v36 = vmul.f32 -1.442695, %v1822_v45  ;;  %v1806_v1 = vpop.f32.mrf.mxu0  ;;  %v1819_v16 = vpop.f32.mrf.mxu1  ;;  %2394 = vmatpush.bf16.msrb.mxu0 %v5340_v24  ;;  %v5357_v45 = vor.u32 %v3796_v18, %v3631_v29 }
 0x7ec   :  { %2382 = vmatpush.bf16.msra.mxu3 %v5346_v60  ;;  %2407 = vmatpush.bf16.msrb.mxu1 %v5349_v3  ;;  %v3615_v1 = vld [vmem:[#allocation12 + $0x8] sm:$0xf]  ;;  %v3792_v16 = vld [vmem:[#allocation12 + $0x14] sm:$0xf0] }
 0x7ed   :  { %4014 = vpow2.f32 %v3602_v57  ;;  %v3789_v57 = vld [vmem:[#allocation12 + $0x4] sm:$0xf]  ;;  %v5375_v5 = vor.u32 %v3792_v16, %v3615_v1 }
 0x7ee   :  { %v4013_v56 = vpop.eup %4012  ;;  %4016 = vpow2.f32 %v3603_v36  ;;  %v3609_v36 = vld [vmem:[#allocation12 + $0x10] sm:$0xf0]  ;;  %2370 = vmatpush.bf16.msra.mxu2 %v5367_v12 }
 0x7ef   :  { %v5337_v59 = vadd.f32 1.0, %v4013_v56  ;;  %2395 = vmatpush.bf16.msrb.mxu0 %v5357_v45  ;;  %v5369_v15 = vor.u32 %v3789_v57, %v3609_v36 }
 0x7f0   :  { %v1780_v42 = vpop.f32.mrf.mxu2  ;;  %v1793_v43 = vpop.f32.mrf.mxu3  ;;  %2408 = vmatpush.bf16.msrb.mxu1 %v5371_v4 }
 0x7f1   :  { %4018 = vrcp.f32 %v5337_v59  ;;  %2383 = vmatpush.bf16.msra.mxu3 %v5369_v15  ;;  %vm1872_vm6 = vweird.f32 %v5337_v59 }
 0x7f2   :  { %2488 = vmatpush.bf16.msrb.mxu2 %v5255_v55 }
 0x7f3   :  { %v4015_v51 = vpop.eup %4014  ;;  %2396 = vmatpush.bf16.msrb.mxu0 %v5375_v5 }
 0x7f4   :  { %v4017_v61 = vpop.eup %4016  ;;  %v5351_v14 = vadd.f32 1.0, %v4015_v51  ;;  %2409 = vmatpush.bf16.msrb.mxu1 %v5383_v38 }
 0x7f5   :  { %v5354_v21 = vadd.f32 1.0, %v4017_v61  ;;  %2501 = vmatpush.bf16.msrb.mxu3 %v5257_v25 }
 0x7f6   :  { %4020 = vrcp.f32 %v5351_v14  ;;  %v1848_v43 = vand.u32 2147483648, %v5351_v14  ;;  %v1846_v58 = vand.u32 2147483647, %v5351_v14  ;;  %2489 = vmatpush.bf16.msrb.mxu2 %v5273_v52  ;;  %vm1842_vm14 = vweird.f32 %v5351_v14 }
 0x7f7   :  { %4022 = vrcp.f32 %v5354_v21  ;;  %v5373_v56 = vpop.eup %4018  ;;  %2514 = vmatpush.bf16.msra.mxu0 %v5277_v27  ;;  %v1863_v51 = vand.u32 2147483648, %v5354_v21  ;;  %v1861_v29 = vand.u32 2147483647, %v5354_v21  ;;  %vm1857_vm1 = vweird.f32 %v5354_v21 }
 0x7f8   :  { %v1868_v22 = vmul.f32 %v5373_v56, %v5337_v59  ;;  %4024 = vtanh.f32 %v1824_v11  ;;  %2527 = vmatpush.bf16.msra.mxu1 %v5280_v31  ;;  %v1849_v47 = vor.u32 1.1754944e-38, %v1848_v43  ;;  %vm1847_vm2 = vcmp.eq.f32.partialorder %v1846_v58, 8.507059e+37  ;;  %v1988_v43 = vpop.f32.mrf.mxu2 }
 0x7f9   :  { %2502 = vmatpush.bf16.msrb.mxu3 %v5275_v13  ;;  %v1864_v57 = vor.u32 1.1754944e-38, %v1863_v51  ;;  %vm1862_vm4 = vcmp.eq.f32.partialorder %v1861_v29, 8.507059e+37  ;;  %vm1873_vm5 = vweird.f32 %v5373_v56 }
 0x7fa   :  { %v1869_v18 = vsub.f32 1.0, %v1868_v22  ;;  %2490 = vmatpush.bf16.msrb.mxu2 %v5295_v2  ;;  %vm1874_vm7 = vmor %vm1872_vm6, %vm1873_vm5  ;;  %v2070_v22 = vpop.f32.mrf.mxu0 }
 0x7fb   :  { %2515 = vmatpush.bf16.msra.mxu0 %v5285_v44 }
 0x7fc   :  { %v4021_v35 = vpop.eup %4020  ;;  %2528 = vmatpush.bf16.msra.mxu1 %v5287_v0  ;;  %v1870_v19 = vmul.f32 %v5373_v56, %v1869_v18 }
 0x7fd   :  { %v4023_v40 = vpop.eup %4022  ;;  %v1838_v6 = vmul.f32 %v4021_v35, %v5351_v14  ;;  %vm1843_vm12 = vweird.f32 %v4021_v35  ;;  %2503 = vmatpush.bf16.msrb.mxu3 %v5297_v20 }
 0x7fe   :  { %v1853_v41 = vmul.f32 %v4023_v40, %v5354_v21  ;;  %vm1858_vm13 = vweird.f32 %v4023_v40  ;;  %vm1844_vm15 = vmor %vm1842_vm14, %vm1843_vm12  ;;  %v4025_v36 = vpop.eup %4024  ;;  %2491 = vmatpush.bf16.msrb.mxu2 %v5309_v46  ;;  %v1871_v39 = vadd.f32 %v5373_v56, %v1870_v19 }
 0x7ff   :  { %v1839_v42 = vsub.f32 1.0, %v1838_v6  ;;  %vm1859_vm3 = vmor %vm1857_vm1, %vm1858_vm13  ;;  %2516 = vmatpush.bf16.msra.mxu0 %v5299_v26 }
 0x800   :  { %v1854_v49 = vsub.f32 1.0, %v1853_v41  ;;  %2529 = vmatpush.bf16.msra.mxu1 %v5302_v34  ;;  %v1875_v11 = vsel %vm1874_vm7, %v5373_v56, %v1871_v39  ;;  %v5929_v56 = vmov 0   ;;  %v5478_v51 = vpop.f32.mrf.mxu2 }
 0x801   :  { %v1840_v53 = vmul.f32 %v4021_v35, %v1839_v42  ;;  %2504 = vmatpush.bf16.msrb.mxu3 %v5312_v8  ;;  %v5472_v42 = vpop.f32.mrf.mxu1 }
 0x802   :  { %v1855_v61 = vmul.f32 %v4023_v40, %v1854_v49  ;;  %2492 = vmatpush.bf16.msrb.mxu2 %v5316_v37  ;;  %v2029_v49 = vpop.f32.mrf.mxu3 }
 0x803   :  { %v1841_v33 = vadd.f32 %v4021_v35, %v1840_v53  ;;  %2517 = vmatpush.bf16.msra.mxu0 %v5321_v54  ;;  %v5474_v53 = vpop.f32.mrf.mxu0 }
 0x804   :  { %v1856_v48 = vadd.f32 %v4023_v40, %v1855_v61  ;;  %2530 = vmatpush.bf16.msra.mxu1 %v5324_v50 }
 0x805   :  { %v1845_v63 = vsel %vm1844_vm15, %v4021_v35, %v1841_v33  ;;  %v1878_v35 = vand.u32 2147483648, %v5337_v59  ;;  %2505 = vmatpush.bf16.msrb.mxu3 %v5319_v10 }
 0x806   :  { %v1860_v1 = vsel %vm1859_vm3, %v4023_v40, %v1856_v48  ;;  %v1850_v16 = vsel %vm1847_vm2, %v1849_v47, %v1845_v63  ;;  %2493 = vmatpush.bf16.msrb.mxu2 %v5327_v32 }
 0x807   :  { %v1865_v14 = vsel %vm1862_vm4, %v1864_v57, %v1860_v1  ;;  %v1884_v9 = vmul.f32 %v4025_v36, %v1850_v16  ;;  %2518 = vmatpush.bf16.msra.mxu0 %v5333_v7  ;;  %v1879_v40 = vor.u32 1.1754944e-38, %v1878_v35 }
 0x808   :  { %v1883_v21 = vmul.f32 %v1865_v14, %v5234_v28  ;;  %v1876_v28 = vand.u32 2147483647, %v5337_v59  ;;  %2531 = vmatpush.bf16.msra.mxu1 %v5335_v17  ;;  %v5486_v33 = vpop.f32.mrf.mxu2 }
 0x809   :  { %2506 = vmatpush.bf16.msrb.mxu3 %v5330_v62  ;;  %v5476_v58 = vpop.f32.mrf.mxu1  ;;  %5934 = vst [vmem:[#allocation32_spill] sm:$0xff] %v5486_v33 }
 0x80a   :  { %v1885_v23 = vadd.f32 %v1884_v9, %v1883_v21  ;;  %vm1877_vm8 = vcmp.eq.f32.partialorder %v1876_v28, 8.507059e+37  ;;  %2494 = vmatpush.bf16.msrb.mxu2 %v5343_v30  ;;  %5930 = vst [vmem:[#allocation30_spill] sm:$0xff] %v5476_v58  ;;  %v5480_v61 = vpop.f32.mrf.mxu3 }
 0x80b   :  { %v1880_v41 = vsel %vm1877_vm8, %v1879_v40, %v1875_v11  ;;  %2519 = vmatpush.bf16.msra.mxu0 %v5340_v24  ;;  %5931 = vst [vmem:[#allocation31_spill] sm:$0xff] %v5480_v61  ;;  %v5482_v29 = vpop.f32.mrf.mxu0 }
 0x80c   :  { %4026 = vtanh.f32 %v1885_v23  ;;  %2532 = vmatpush.bf16.msra.mxu1 %v5349_v3  ;;  %5932 = vst [vmem:[#allocation19_spill] sm:$0xff] %v5482_v29 }
 0x80d   :  { %2507 = vmatpush.bf16.msrb.mxu3 %v5346_v60 }
 0x80e   :  { %2495 = vmatpush.bf16.msrb.mxu2 %v5367_v12 }
 0x80f   :  { %2520 = vmatpush.bf16.msra.mxu0 %v5357_v45 }
 0x810   :  { %2533 = vmatpush.bf16.msra.mxu1 %v5371_v4  ;;  %v5494_v57 = vpop.f32.mrf.mxu2 }
 0x811   :  { %2508 = vmatpush.bf16.msrb.mxu3 %v5369_v15  ;;  %v5484_v18 = vpop.f32.mrf.mxu1  ;;  %5938 = vst [vmem:[#allocation34_spill] sm:$0xff] %v5494_v57 }
 0x812   :  { %v4027_v6 = vpop.eup %4026  ;;  %5933 = vst [vmem:[#allocation20_spill] sm:$0xff] %v5484_v18  ;;  %v5488_v47 = vpop.f32.mrf.mxu3 }
 0x813   :  { %v1887_v59 = vmul.f32 %v4027_v6, %v1880_v41  ;;  %2521 = vmatpush.bf16.msra.mxu0 %v5375_v5  ;;  %5935 = vst [vmem:[#allocation33_spill] sm:$0xff] %v5488_v47  ;;  %v5490_v48 = vpop.f32.mrf.mxu0  ;;  %v1961_v6 = vld [vmem:[#allocation14] sm:$0xf] }
 0x814   :  { %2534 = vmatpush.bf16.msra.mxu1 %v5383_v38  ;;  %5936 = vst [vmem:[#allocation21_spill] sm:$0xff] %v5490_v48 }
 0x815   :  { %2008 = vmatmul.f32.gmra.mxu2 %v1887_v59  ;;  %2049 = vmatmul.f32.gmra.mxu3 %v1887_v59 }
 0x816   :  { %2090 = vmatmul.f32.gmra.mxu0 %v1887_v59  ;;  %2131 = vmatmul.f32.gmra.mxu1 %v1887_v59 }
 0x818   :  { %v5502_v14 = vpop.f32.mrf.mxu2 }
 0x819   :  { %v5492_v63 = vpop.f32.mrf.mxu1  ;;  %5942 = vst [vmem:[#allocation37_spill] sm:$0xff] %v5502_v14 }
 0x81a   :  { %5937 = vst [vmem:[#allocation22_spill] sm:$0xff] %v5492_v63  ;;  %v5496_v36 = vpop.f32.mrf.mxu3 }
 0x81b   :  { %5939 = vst [vmem:[#allocation36_spill] sm:$0xff] %v5496_v36  ;;  %v5498_v1 = vpop.f32.mrf.mxu0 }
 0x81c   :  { %5940 = vst [vmem:[#allocation23_spill] sm:$0xff] %v5498_v1 }
 0x81d   :  { %2371 = vmatmul.bf16.vlgmr.msra.gmra.mxu2 %v5929_v56  ;;  %2384 = vmatmul.bf16.vlgmr.msra.gmra.mxu3 %v5929_v56 }
 0x81e   :  { %2397 = vmatmul.bf16.vlgmr.msrb.gmra.mxu0 %v5929_v56  ;;  %2410 = vmatmul.bf16.vlgmr.msrb.gmra.mxu1 %v5929_v56  ;;  %v5526_v56 = vperm.slane %v1961_v6, 2 }
 0x81f   :  { %2613 = vmatpush.bf16.msra.mxu2 %v5255_v55  ;;  %2626 = vmatpush.bf16.msra.mxu3 %v5257_v25 }
 0x820   :  { %2639 = vmatpush.bf16.msrb.mxu0 %v5277_v27  ;;  %2652 = vmatpush.bf16.msrb.mxu1 %v5280_v31  ;;  %v5510_v23 = vpop.f32.mrf.mxu2 }
 0x821   :  { %v5500_v16 = vpop.f32.mrf.mxu1  ;;  %5946 = vst [vmem:[#allocation39_spill] sm:$0xff] %v5510_v23 }
 0x822   :  { %5941 = vst [vmem:[#allocation24_spill] sm:$0xff] %v5500_v16  ;;  %v5504_v19 = vpop.f32.mrf.mxu3 }
 0x823   :  { %2614 = vmatpush.bf16.msra.mxu2 %v5273_v52  ;;  %2627 = vmatpush.bf16.msra.mxu3 %v5275_v13  ;;  %5943 = vst [vmem:[#allocation38_spill] sm:$0xff] %v5504_v19  ;;  %v5506_v9 = vpop.f32.mrf.mxu0 }
 0x824   :  { %2640 = vmatpush.bf16.msrb.mxu0 %v5285_v44  ;;  %2653 = vmatpush.bf16.msrb.mxu1 %v5287_v0  ;;  %5944 = vst [vmem:[#allocation25_spill] sm:$0xff] %v5506_v9 }
 0x827   :  { %2615 = vmatpush.bf16.msra.mxu2 %v5295_v2  ;;  %2628 = vmatpush.bf16.msra.mxu3 %v5297_v20 }
 0x828   :  { %2641 = vmatpush.bf16.msrb.mxu0 %v5299_v26  ;;  %2654 = vmatpush.bf16.msrb.mxu1 %v5302_v34  ;;  %v5518_v11 = vpop.f32.mrf.mxu2 }
 0x829   :  { %v5508_v21 = vpop.f32.mrf.mxu1  ;;  %5950 = vst [vmem:[#allocation40_spill] sm:$0xff] %v5518_v11 }
 0x82a   :  { %5945 = vst [vmem:[#allocation26_spill] sm:$0xff] %v5508_v21  ;;  %v5512_v39 = vpop.f32.mrf.mxu3 }
 0x82b   :  { %2616 = vmatpush.bf16.msra.mxu2 %v5309_v46  ;;  %2629 = vmatpush.bf16.msra.mxu3 %v5312_v8  ;;  %5947 = vst [vmem:[#allocation35_spill] sm:$0xff] %v5512_v39  ;;  %v5514_v35 = vpop.f32.mrf.mxu0  ;;  %v2071_v39 = vadd.f32 %v2070_v22, %v5526_v56 }
 0x82c   :  { %2642 = vmatpush.bf16.msrb.mxu0 %v5321_v54  ;;  %2655 = vmatpush.bf16.msrb.mxu1 %v5324_v50  ;;  %5948 = vst [vmem:[#allocation18_spill] sm:$0xff] %v5514_v35  ;;  %v5533_v35 = vperm.slane %v1961_v6, 0 }
 0x82f   :  { %2617 = vmatpush.bf16.msra.mxu2 %v5316_v37  ;;  %2630 = vmatpush.bf16.msra.mxu3 %v5319_v10 }
 0x830   :  { %2643 = vmatpush.bf16.msrb.mxu0 %v5333_v7  ;;  %2656 = vmatpush.bf16.msrb.mxu1 %v5335_v17 }
 0x831   :  { %v5516_v28 = vpop.f32.mrf.mxu1 }
 0x832   :  { %5949 = vst [vmem:[#allocation29_spill] sm:$0xff] %v5516_v28  ;;  %v5520_v40 = vpop.f32.mrf.mxu3  ;;  %v5535_v28 = vperm.slane %v1961_v6, 1 }
 0x833   :  { %2618 = vmatpush.bf16.msra.mxu2 %v5327_v32  ;;  %2631 = vmatpush.bf16.msra.mxu3 %v5330_v62  ;;  %5951 = vst [vmem:[#allocation27_spill] sm:$0xff] %v5520_v40 }
 0x834   :  { %2644 = vmatpush.bf16.msrb.mxu0 %v5340_v24  ;;  %2657 = vmatpush.bf16.msrb.mxu1 %v5349_v3 }
 0x837   :  { %2619 = vmatpush.bf16.msra.mxu2 %v5343_v30  ;;  %2632 = vmatpush.bf16.msra.mxu3 %v5346_v60 }
 0x838   :  { %2645 = vmatpush.bf16.msrb.mxu0 %v5357_v45  ;;  %2658 = vmatpush.bf16.msrb.mxu1 %v5371_v4 }
 0x83b   :  { %2620 = vmatpush.bf16.msra.mxu2 %v5367_v12  ;;  %2633 = vmatpush.bf16.msra.mxu3 %v5369_v15 }
 0x83c   :  { %2646 = vmatpush.bf16.msrb.mxu0 %v5375_v5  ;;  %2659 = vmatpush.bf16.msrb.mxu1 %v5383_v38 }
 0x893   :  { %v5522_v41 = vpop.f32.mrf.mxu0  ;;  %v5524_v59 = vpop.f32.mrf.mxu1 }
 0x894   :  { %5952 = vst [vmem:[#allocation28_spill] sm:$0xff] %v5522_v41  ;;  %v1989_v41 = vadd.f32 %v1988_v43, %v5533_v35 }
 0x895   :  { %5953 = vst [vmem:[#allocation41_spill] sm:$0xff] %v5524_v59  ;;  %v2030_v59 = vadd.f32 %v2029_v49, %v5535_v28 }
 0x898   :  { %v5528_v21 = vpop.f32.mrf.mxu2  ;;  %v5530_v23 = vpop.f32.mrf.mxu3 }
 0x899   :  { %5954 = vst [vmem:[#allocation42_spill] sm:$0xff] %v5528_v21 }
 0x89a   :  { %5955 = vst [vmem:[#allocation43_spill] sm:$0xff] %v5530_v23 }
 0x89b   :  { %v2398_v11 = vpop.f32.mrf.mxu0  ;;  %v2411_v9 = vpop.f32.mrf.mxu1 }
 0x89c   :  { %v2417_v40 = vadd.f32 %v2398_v11, %v2071_v39 }
 0x89e   :  { %v3735_v16 = vmul.f32 -1.442695, %v2417_v40 }
 0x8a0   :  { %4028 = vpow2.f32 %v3735_v16  ;;  %v2372_v19 = vpop.f32.mrf.mxu2  ;;  %v2385_v14 = vpop.f32.mrf.mxu3  ;;  %v5539_v16 = vperm.slane %v1961_v6, 3 }
 0x8a1   :  { %v2415_v21 = vadd.f32 %v2372_v19, %v1989_v41  ;;  %v2416_v1 = vadd.f32 %v2385_v14, %v2030_v59 }
 0x8a2   :  { %5956 = vst [vmem:[#allocation44_spill] sm:$0xff] %v5539_v16 }
 0x8a3   :  { %v3733_v23 = vmul.f32 -1.442695, %v2415_v21  ;;  %v3734_v63 = vmul.f32 -1.442695, %v2416_v1  ;;  %v2400_v22 = vpop.f32.mrf.mxu0  ;;  %v2413_v36 = vpop.f32.mrf.mxu1  ;;  %v2112_v1 = vadd.f32 %v5472_v42, %v5539_v16 }
 0x8a5   :  { %4030 = vpow2.f32 %v3733_v23  ;;  %v2418_v19 = vadd.f32 %v2411_v9, %v2112_v1 }
 0x8a6   :  { %v4029_v57 = vpop.eup %4028  ;;  %4032 = vpow2.f32 %v3734_v63 }
 0x8a7   :  { %v2430_v39 = vadd.f32 1.0, %v4029_v57 }
 0x8a8   :  { %v2374_v48 = vpop.f32.mrf.mxu2  ;;  %v2387_v18 = vpop.f32.mrf.mxu3 }
 0x8a9   :  { %4034 = vrcp.f32 %v2430_v39  ;;  %vm2466_vm3 = vweird.f32 %v2430_v39 }
 0x8ab   :  { %v4031_v11 = vpop.eup %4030 }
 0x8ac   :  { %v4033_v40 = vpop.eup %4032  ;;  %v2428_v43 = vadd.f32 1.0, %v4031_v11 }
 0x8ad   :  { %v2429_v49 = vadd.f32 1.0, %v4033_v40 }
 0x8ae   :  { %4036 = vrcp.f32 %v2428_v43  ;;  %v2442_v23 = vand.u32 2147483648, %v2428_v43  ;;  %v2440_v6 = vand.u32 2147483647, %v2428_v43  ;;  %vm2436_vm11 = vweird.f32 %v2428_v43 }
 0x8af   :  { %4038 = vrcp.f32 %v2429_v49  ;;  %v4035_v14 = vpop.eup %4034  ;;  %v2457_v22 = vand.u32 2147483648, %v2429_v49  ;;  %v2455_v40 = vand.u32 2147483647, %v2429_v49  ;;  %vm2451_vm13 = vweird.f32 %v2429_v49 }
 0x8b0   :  { %v2462_v57 = vmul.f32 %v4035_v14, %v2430_v39  ;;  %4040 = vtanh.f32 %v2418_v19  ;;  %v2443_v9 = vor.u32 1.1754944e-38, %v2442_v23  ;;  %vm2441_vm14 = vcmp.eq.f32.partialorder %v2440_v6, 8.507059e+37 }
 0x8b1   :  { %vm2456_vm1 = vcmp.eq.f32.partialorder %v2455_v40, 8.507059e+37  ;;  %vm2467_vm2 = vweird.f32 %v4035_v14  ;;  %v2074_v6 = vadd.f32 %v5474_v53, %v5526_v56 }
 0x8b2   :  { %v2463_v42 = vsub.f32 1.0, %v2462_v57  ;;  %v2472_v57 = vand.u32 2147483648, %v2430_v39  ;;  %vm2468_vm4 = vmor %vm2466_vm3, %vm2467_vm2 }
 0x8b4   :  { %v4037_v36 = vpop.eup %4036  ;;  %v2464_v58 = vmul.f32 %v4035_v14, %v2463_v42 }
 0x8b5   :  { %v4039_v21 = vpop.eup %4038  ;;  %v2432_v63 = vmul.f32 %v4037_v36, %v2428_v43  ;;  %vm2437_vm9 = vweird.f32 %v4037_v36 }
 0x8b6   :  { %v2447_v48 = vmul.f32 %v4039_v21, %v2429_v49  ;;  %vm2452_vm10 = vweird.f32 %v4039_v21  ;;  %vm2438_vm12 = vmor %vm2436_vm11, %vm2437_vm9  ;;  %v4041_v33 = vpop.eup %4040  ;;  %v2465_v43 = vadd.f32 %v4035_v14, %v2464_v58  ;;  %v2470_v49 = vand.u32 2147483647, %v2430_v39  ;;  %v5584_v39 = vld [vmem:[#allocation6] ss:$0 sm:$0xff] }
 0x8b7   :  { %v2433_v18 = vsub.f32 1.0, %v2432_v63  ;;  %vm2453_vm15 = vmor %vm2451_vm13, %vm2452_vm10  ;;  %v2458_v63 = vor.u32 1.1754944e-38, %v2457_v22 }
 0x8b8   :  { %v2448_v41 = vsub.f32 1.0, %v2447_v48  ;;  %v2469_v23 = vsel %vm2468_vm4, %v4035_v14, %v2465_v43  ;;  %vm2471_vm5 = vcmp.eq.f32.partialorder %v2470_v49, 8.507059e+37 }
 0x8b9   :  { %v2434_v59 = vmul.f32 %v4037_v36, %v2433_v18 }
 0x8ba   :  { %v2449_v11 = vmul.f32 %v4039_v21, %v2448_v41 }
 0x8bb   :  { %v2435_v47 = vadd.f32 %v4037_v36, %v2434_v59 }
 0x8bc   :  { %v2450_v1 = vadd.f32 %v4039_v21, %v2449_v11 }
 0x8bd   :  { %v2439_v19 = vsel %vm2438_vm12, %v4037_v36, %v2435_v47  ;;  %v2473_v47 = vor.u32 1.1754944e-38, %v2472_v57  ;;  %v5549_v36 = vld [vmem:[%s5858_s9] ss:$0 sm:$0xff] }
 0x8be   :  { %v2444_v48 = vsel %vm2441_vm14, %v2443_v9, %v2439_v19  ;;  %v2454_v18 = vsel %vm2453_vm15, %v4039_v21, %v2450_v1  ;;  %v1992_v9 = vadd.f32 %v5478_v51, %v5533_v35  ;;  %v5957_v1 = vld [vmem:[#allocation31_spill] sm:$0xff] }
 0x8bf   :  { %v2459_v29 = vsel %vm2456_vm1, %v2458_v63, %v2454_v18  ;;  %v2478_v41 = vmul.f32 %v4041_v33, %v2444_v48  ;;  %v2033_v63 = vadd.f32 %v5957_v1, %v5535_v28 }
 0x8c0   :  { %v2477_v16 = vmul.f32 0.0, %v2459_v29  ;;  %v2474_v29 = vsel %vm2471_vm5, %v2473_v47, %v2469_v23 }
 0x8c2   :  { %v5543_v61 = vadd.f32 %v2478_v41, %v2477_v16 }
 0x8c4   :  { %4042 = vtanh.f32 %v5543_v61 }
 0x8ca   :  { %v4043_v33 = vpop.eup %4042 }
 0x8cb   :  { %v2481_v16 = vmul.f32 %v4043_v33, %v2474_v29 }
 0x8cd   :  { %v3370_v58 = vmul.f32 %v5549_v36, %v2481_v16  ;;  %v2487_v21 = vpack.c.bf16 %v2481_v16, %v2481_v16 }
 0x8cf   :  { %3378 = vadd.xlane.f32.xlu0 %v3370_v58  ;;  %2496 = vmatmul.bf16.vlgmr.msrb.gmra.mxu2 %v2487_v21 }
 0x8d0   :  { %2509 = vmatmul.bf16.vlgmr.msrb.gmra.mxu3 %v2487_v21  ;;  %2522 = vmatmul.bf16.vlgmr.msra.gmra.mxu0 %v2487_v21 }
 0x8d1   :  { %2535 = vmatmul.bf16.vlgmr.msra.gmra.mxu1 %v2487_v21  ;;  %2738 = vmatpush.bf16.msrb.mxu2 %v5255_v55 }
 0x8d2   :  { %2751 = vmatpush.bf16.msrb.mxu3 %v5257_v25  ;;  %2764 = vmatpush.bf16.msra.mxu0 %v5277_v27 }
 0x8d3   :  { %2777 = vmatpush.bf16.msra.mxu1 %v5280_v31 }
 0x8d5   :  { %2739 = vmatpush.bf16.msrb.mxu2 %v5273_v52 }
 0x8d6   :  { %2752 = vmatpush.bf16.msrb.mxu3 %v5275_v13  ;;  %2765 = vmatpush.bf16.msra.mxu0 %v5285_v44 }
 0x8d7   :  { %2778 = vmatpush.bf16.msra.mxu1 %v5287_v0 }
 0x8d9   :  { %2740 = vmatpush.bf16.msrb.mxu2 %v5295_v2 }
 0x8da   :  { %2753 = vmatpush.bf16.msrb.mxu3 %v5297_v20  ;;  %2766 = vmatpush.bf16.msra.mxu0 %v5299_v26 }
 0x8db   :  { %2779 = vmatpush.bf16.msra.mxu1 %v5302_v34 }
 0x8dd   :  { %2741 = vmatpush.bf16.msrb.mxu2 %v5309_v46 }
 0x8de   :  { %2754 = vmatpush.bf16.msrb.mxu3 %v5312_v8  ;;  %2767 = vmatpush.bf16.msra.mxu0 %v5321_v54 }
 0x8df   :  { %2780 = vmatpush.bf16.msra.mxu1 %v5324_v50 }
 0x8e1   :  { %2742 = vmatpush.bf16.msrb.mxu2 %v5316_v37 }
 0x8e2   :  { %2755 = vmatpush.bf16.msrb.mxu3 %v5319_v10  ;;  %2768 = vmatpush.bf16.msra.mxu0 %v5333_v7 }
 0x8e3   :  { %2781 = vmatpush.bf16.msra.mxu1 %v5335_v17 }
 0x8e5   :  { %2743 = vmatpush.bf16.msrb.mxu2 %v5327_v32 }
 0x8e6   :  { %2756 = vmatpush.bf16.msrb.mxu3 %v5330_v62  ;;  %2769 = vmatpush.bf16.msra.mxu0 %v5340_v24 }
 0x8e7   :  { %2782 = vmatpush.bf16.msra.mxu1 %v5349_v3 }
 0x8e9   :  { %2744 = vmatpush.bf16.msrb.mxu2 %v5343_v30 }
 0x8ea   :  { %2757 = vmatpush.bf16.msrb.mxu3 %v5346_v60  ;;  %2770 = vmatpush.bf16.msra.mxu0 %v5357_v45 }
 0x8eb   :  { %2783 = vmatpush.bf16.msra.mxu1 %v5371_v4 }
 0x8ed   :  { %2745 = vmatpush.bf16.msrb.mxu2 %v5367_v12 }
 0x8ee   :  { %2758 = vmatpush.bf16.msrb.mxu3 %v5369_v15  ;;  %2771 = vmatpush.bf16.msra.mxu0 %v5375_v5 }
 0x8ef   :  { %2784 = vmatpush.bf16.msra.mxu1 %v5383_v38 }
 0x942   :  { %v3379_v14 = vpop.xlane.xlu0 %3378 }
 0x943   :  { %v3398_v59 = vadd.f32 %v5584_v39, %v3379_v14  ;;  %v5958_v14 = vld [vmem:[#allocation44_spill] sm:$0xff] }
 0x945   :  { %3406 = vst.msk [vmem:[%s5860_s11] sm:$0xff] %vm445_vm0, %v3398_v59  ;;  %v5959_v59 = vld [vmem:[#allocation30_spill] sm:$0xff] }
 0x94d   :  { %v2523_v22 = vpop.f32.mrf.mxu0 }
 0x94e   :  { %v2542_v11 = vadd.f32 %v2523_v22, %v2074_v6  ;;  %v2536_v40 = vpop.f32.mrf.mxu1  ;;  %v2115_v6 = vadd.f32 %v5959_v59, %v5958_v14 }
 0x950   :  { %v3738_v42 = vmul.f32 -1.442695, %v2542_v11 }
 0x952   :  { %4044 = vpow2.f32 %v3738_v42  ;;  %v2497_v19 = vpop.f32.mrf.mxu2  ;;  %v2543_v42 = vadd.f32 %v2536_v40, %v2115_v6 }
 0x953   :  { %v2540_v48 = vadd.f32 %v2497_v19, %v1992_v9  ;;  %v2510_v18 = vpop.f32.mrf.mxu3 }
 0x954   :  { %v2541_v41 = vadd.f32 %v2510_v18, %v2033_v63 }
 0x955   :  { %v3736_v43 = vmul.f32 -1.442695, %v2540_v48  ;;  %v2525_v57 = vpop.f32.mrf.mxu0 }
 0x956   :  { %v3737_v49 = vmul.f32 -1.442695, %v2541_v41  ;;  %v2538_v23 = vpop.f32.mrf.mxu1 }
 0x957   :  { %4046 = vpow2.f32 %v3736_v43 }
 0x958   :  { %v4045_v53 = vpop.eup %4044  ;;  %4048 = vpow2.f32 %v3737_v49 }
 0x959   :  { %v2555_v33 = vadd.f32 1.0, %v4045_v53 }
 0x95a   :  { %v2499_v47 = vpop.f32.mrf.mxu2 }
 0x95b   :  { %v2512_v29 = vpop.f32.mrf.mxu3  ;;  %4050 = vrcp.f32 %v2555_v33  ;;  %vm2591_vm15 = vweird.f32 %v2555_v33 }
 0x95d   :  { %v4047_v16 = vpop.eup %4046 }
 0x95e   :  { %v4049_v51 = vpop.eup %4048  ;;  %v2553_v58 = vadd.f32 1.0, %v4047_v16 }
 0x95f   :  { %v2554_v21 = vadd.f32 1.0, %v4049_v51 }
 0x960   :  { %4052 = vrcp.f32 %v2553_v58  ;;  %v2567_v18 = vand.u32 2147483648, %v2553_v58  ;;  %v2565_v57 = vand.u32 2147483647, %v2553_v58  ;;  %vm2561_vm8 = vweird.f32 %v2553_v58 }
 0x961   :  { %4054 = vrcp.f32 %v2554_v21  ;;  %v4051_v22 = vpop.eup %4050  ;;  %v2582_v49 = vand.u32 2147483648, %v2554_v21  ;;  %v2580_v53 = vand.u32 2147483647, %v2554_v21  ;;  %vm2576_vm10 = vweird.f32 %v2554_v21 }
 0x962   :  { %v2587_v48 = vmul.f32 %v4051_v22, %v2555_v33  ;;  %4056 = vtanh.f32 %v2543_v42  ;;  %v2568_v40 = vor.u32 1.1754944e-38, %v2567_v18  ;;  %vm2566_vm11 = vcmp.eq.f32.partialorder %v2565_v57, 8.507059e+37 }
 0x963   :  { %v2583_v51 = vor.u32 1.1754944e-38, %v2582_v49  ;;  %vm2581_vm13 = vcmp.eq.f32.partialorder %v2580_v53, 8.507059e+37  ;;  %vm2592_vm14 = vweird.f32 %v4051_v22 }
 0x964   :  { %v2588_v29 = vsub.f32 1.0, %v2587_v48  ;;  %v2597_v48 = vand.u32 2147483648, %v2555_v33  ;;  %vm2593_vm1 = vmor %vm2591_vm15, %vm2592_vm14 }
 0x966   :  { %v4053_v11 = vpop.eup %4052  ;;  %v2598_v18 = vor.u32 1.1754944e-38, %v2597_v48 }
 0x967   :  { %v4055_v9 = vpop.eup %4054  ;;  %v2557_v1 = vmul.f32 %v4053_v11, %v2553_v58  ;;  %vm2562_vm6 = vweird.f32 %v4053_v11 }
 0x968   :  { %v2572_v63 = vmul.f32 %v4055_v9, %v2554_v21  ;;  %vm2577_vm7 = vweird.f32 %v4055_v9  ;;  %vm2563_vm9 = vmor %vm2561_vm8, %vm2562_vm6  ;;  %v4057_v6 = vpop.eup %4056  ;;  %v2595_v21 = vand.u32 2147483647, %v2555_v33 }
 0x969   :  { %v2558_v19 = vsub.f32 1.0, %v2557_v1  ;;  %vm2578_vm12 = vmor %vm2576_vm10, %vm2577_vm7 }
 0x96a   :  { %v2573_v41 = vsub.f32 1.0, %v2572_v63  ;;  %vm2596_vm2 = vcmp.eq.f32.partialorder %v2595_v21, 8.507059e+37 }
 0x96b   :  { %v2559_v43 = vmul.f32 %v4053_v11, %v2558_v19  ;;  %v2589_v19 = vmul.f32 %v4051_v22, %v2588_v29 }
 0x96c   :  { %v2574_v23 = vmul.f32 %v4055_v9, %v2573_v41 }
 0x96d   :  { %v2560_v47 = vadd.f32 %v4053_v11, %v2559_v43  ;;  %v2590_v58 = vadd.f32 %v4051_v22, %v2589_v19 }
 0x96e   :  { %v2575_v16 = vadd.f32 %v4055_v9, %v2574_v23 }
 0x96f   :  { %v2564_v59 = vsel %vm2563_vm9, %v4053_v11, %v2560_v47  ;;  %v2594_v11 = vsel %vm2593_vm1, %v4051_v22, %v2590_v58 }
 0x970   :  { %v2569_v42 = vsel %vm2566_vm11, %v2568_v40, %v2564_v59  ;;  %v2579_v1 = vsel %vm2578_vm12, %v4055_v9, %v2575_v16  ;;  %v2599_v9 = vsel %vm2596_vm2, %v2598_v18, %v2594_v11 }
 0x971   :  { %v2584_v63 = vsel %vm2581_vm13, %v2583_v51, %v2579_v1  ;;  %v2603_v41 = vmul.f32 %v4057_v6, %v2569_v42  ;;  %v5961_v51 = vld [vmem:[#allocation32_spill] sm:$0xff]  ;;  %v5962_v6 = vld [vmem:[#allocation33_spill] sm:$0xff] }
 0x972   :  { %v2602_v14 = vmul.f32 %v2584_v63, %v5543_v61  ;;  %v1995_v59 = vadd.f32 %v5961_v51, %v5533_v35  ;;  %v2036_v42 = vadd.f32 %v5962_v6, %v5535_v28 }
 0x974   :  { %v5600_v43 = vadd.f32 %v2603_v41, %v2602_v14  ;;  %v5960_v14 = vld [vmem:[#allocation19_spill] sm:$0xff] }
 0x975   :  { %v2077_v22 = vadd.f32 %v5960_v14, %v5526_v56  ;;  %v5963_v14 = vld [vmem:[#allocation44_spill] sm:$0xff] }
 0x976   :  { %4058 = vtanh.f32 %v5600_v43 }
 0x97c   :  { %v4059_v57 = vpop.eup %4058 }
 0x97d   :  { %v2606_v49 = vmul.f32 %v4059_v57, %v2599_v9 }
 0x97f   :  { %v3371_v23 = vmul.f32 %v5549_v36, %v2606_v49  ;;  %v2612_v53 = vpack.c.bf16 %v2606_v49, %v2606_v49 }
 0x981   :  { %3380 = vadd.xlane.f32.xlu1 %v3371_v23  ;;  %2621 = vmatmul.bf16.vlgmr.msra.gmra.mxu2 %v2612_v53 }
 0x982   :  { %2634 = vmatmul.bf16.vlgmr.msra.gmra.mxu3 %v2612_v53  ;;  %2647 = vmatmul.bf16.vlgmr.msrb.gmra.mxu0 %v2612_v53 }
 0x983   :  { %2660 = vmatmul.bf16.vlgmr.msrb.gmra.mxu1 %v2612_v53  ;;  %2863 = vmatpush.bf16.msra.mxu2 %v5255_v55 }
 0x984   :  { %2876 = vmatpush.bf16.msra.mxu3 %v5257_v25  ;;  %2889 = vmatpush.bf16.msrb.mxu0 %v5277_v27 }
 0x985   :  { %2902 = vmatpush.bf16.msrb.mxu1 %v5280_v31 }
 0x987   :  { %2864 = vmatpush.bf16.msra.mxu2 %v5273_v52 }
 0x988   :  { %2877 = vmatpush.bf16.msra.mxu3 %v5275_v13  ;;  %2890 = vmatpush.bf16.msrb.mxu0 %v5285_v44 }
 0x989   :  { %2903 = vmatpush.bf16.msrb.mxu1 %v5287_v0 }
 0x98b   :  { %2865 = vmatpush.bf16.msra.mxu2 %v5295_v2 }
 0x98c   :  { %2878 = vmatpush.bf16.msra.mxu3 %v5297_v20  ;;  %2891 = vmatpush.bf16.msrb.mxu0 %v5299_v26 }
 0x98d   :  { %2904 = vmatpush.bf16.msrb.mxu1 %v5302_v34 }
 0x98f   :  { %2866 = vmatpush.bf16.msra.mxu2 %v5309_v46 }
 0x990   :  { %2879 = vmatpush.bf16.msra.mxu3 %v5312_v8  ;;  %2892 = vmatpush.bf16.msrb.mxu0 %v5321_v54 }
 0x991   :  { %2905 = vmatpush.bf16.msrb.mxu1 %v5324_v50 }
 0x993   :  { %2867 = vmatpush.bf16.msra.mxu2 %v5316_v37 }
 0x994   :  { %2880 = vmatpush.bf16.msra.mxu3 %v5319_v10  ;;  %2893 = vmatpush.bf16.msrb.mxu0 %v5333_v7 }
 0x995   :  { %2906 = vmatpush.bf16.msrb.mxu1 %v5335_v17 }
 0x997   :  { %2868 = vmatpush.bf16.msra.mxu2 %v5327_v32 }
 0x998   :  { %2881 = vmatpush.bf16.msra.mxu3 %v5330_v62  ;;  %2894 = vmatpush.bf16.msrb.mxu0 %v5340_v24 }
 0x999   :  { %2907 = vmatpush.bf16.msrb.mxu1 %v5349_v3 }
 0x99b   :  { %2869 = vmatpush.bf16.msra.mxu2 %v5343_v30 }
 0x99c   :  { %2882 = vmatpush.bf16.msra.mxu3 %v5346_v60  ;;  %2895 = vmatpush.bf16.msrb.mxu0 %v5357_v45 }
 0x99d   :  { %2908 = vmatpush.bf16.msrb.mxu1 %v5371_v4 }
 0x99f   :  { %2870 = vmatpush.bf16.msra.mxu2 %v5367_v12 }
 0x9a0   :  { %2883 = vmatpush.bf16.msra.mxu3 %v5369_v15  ;;  %2896 = vmatpush.bf16.msrb.mxu0 %v5375_v5 }
 0x9a1   :  { %2909 = vmatpush.bf16.msrb.mxu1 %v5383_v38 }
 0x9f4   :  { %v3381_v61 = vpop.xlane.xlu1 %3380 }
 0x9f5   :  { %v3399_v33 = vadd.f32 %v5584_v39, %v3381_v61 }
 0x9f7   :  { %3407 = vst.msk [vmem:[%s5860_s11 + $0x8] sm:$0xff] %vm445_vm0, %v3399_v33 }
 0x9ff   :  { %v2648_v47 = vpop.f32.mrf.mxu0 }
 0xa00   :  { %v2667_v29 = vadd.f32 %v2648_v47, %v2077_v22  ;;  %v2661_v40 = vpop.f32.mrf.mxu1  ;;  %v5964_v22 = vld [vmem:[#allocation20_spill] sm:$0xff] }
 0xa01   :  { %v2118_v47 = vadd.f32 %v5964_v22, %v5963_v14 }
 0xa02   :  { %v3741_v16 = vmul.f32 -1.442695, %v2667_v29 }
 0xa03   :  { %v2668_v51 = vadd.f32 %v2661_v40, %v2118_v47 }
 0xa04   :  { %4060 = vpow2.f32 %v3741_v16  ;;  %v2622_v1 = vpop.f32.mrf.mxu2 }
 0xa05   :  { %v2665_v63 = vadd.f32 %v2622_v1, %v1995_v59  ;;  %v2635_v19 = vpop.f32.mrf.mxu3 }
 0xa06   :  { %v2666_v41 = vadd.f32 %v2635_v19, %v2036_v42 }
 0xa07   :  { %v3739_v58 = vmul.f32 -1.442695, %v2665_v63  ;;  %v2650_v48 = vpop.f32.mrf.mxu0 }
 0xa08   :  { %v3740_v21 = vmul.f32 -1.442695, %v2666_v41  ;;  %v2663_v11 = vpop.f32.mrf.mxu1 }
 0xa09   :  { %4062 = vpow2.f32 %v3739_v58 }
 0xa0a   :  { %v4061_v18 = vpop.eup %4060  ;;  %4064 = vpow2.f32 %v3740_v21 }
 0xa0b   :  { %v2680_v9 = vadd.f32 1.0, %v4061_v18 }
 0xa0c   :  { %v2624_v57 = vpop.f32.mrf.mxu2 }
 0xa0d   :  { %v2637_v49 = vpop.f32.mrf.mxu3  ;;  %4066 = vrcp.f32 %v2680_v9  ;;  %vm2716_vm12 = vweird.f32 %v2680_v9 }
 0xa0f   :  { %v4063_v23 = vpop.eup %4062 }
 0xa10   :  { %v4065_v53 = vpop.eup %4064  ;;  %v2678_v61 = vadd.f32 1.0, %v4063_v23 }
 0xa11   :  { %v2679_v33 = vadd.f32 1.0, %v4065_v53 }
 0xa12   :  { %4068 = vrcp.f32 %v2678_v61  ;;  %v2692_v19 = vand.u32 2147483648, %v2678_v61  ;;  %v2690_v48 = vand.u32 2147483647, %v2678_v61  ;;  %vm2686_vm5 = vweird.f32 %v2678_v61 }
 0xa13   :  { %4070 = vrcp.f32 %v2679_v33  ;;  %v4067_v29 = vpop.eup %4066  ;;  %v2707_v21 = vand.u32 2147483648, %v2679_v33  ;;  %v2705_v18 = vand.u32 2147483647, %v2679_v33  ;;  %vm2701_vm7 = vweird.f32 %v2679_v33 }
 0xa14   :  { %v2712_v63 = vmul.f32 %v4067_v29, %v2680_v9  ;;  %4072 = vtanh.f32 %v2668_v51  ;;  %v2693_v40 = vor.u32 1.1754944e-38, %v2692_v19  ;;  %vm2691_vm8 = vcmp.eq.f32.partialorder %v2690_v48, 8.507059e+37 }
 0xa15   :  { %v2708_v53 = vor.u32 1.1754944e-38, %v2707_v21  ;;  %vm2706_vm10 = vcmp.eq.f32.partialorder %v2705_v18, 8.507059e+37  ;;  %vm2717_vm11 = vweird.f32 %v4067_v29 }
 0xa16   :  { %v2713_v49 = vsub.f32 1.0, %v2712_v63  ;;  %v2722_v63 = vand.u32 2147483648, %v2680_v9  ;;  %vm2718_vm13 = vmor %vm2716_vm12, %vm2717_vm11 }
 0xa18   :  { %v4069_v16 = vpop.eup %4068  ;;  %v2723_v19 = vor.u32 1.1754944e-38, %v2722_v63 }
 0xa19   :  { %v4071_v59 = vpop.eup %4070  ;;  %v2682_v6 = vmul.f32 %v4069_v16, %v2678_v61  ;;  %vm2687_vm3 = vweird.f32 %v4069_v16 }
 0xa1a   :  { %v2697_v42 = vmul.f32 %v4071_v59, %v2679_v33  ;;  %vm2702_vm4 = vweird.f32 %v4071_v59  ;;  %vm2688_vm6 = vmor %vm2686_vm5, %vm2687_vm3  ;;  %v4073_v47 = vpop.eup %4072  ;;  %v2720_v33 = vand.u32 2147483647, %v2680_v9 }
 0xa1b   :  { %v2683_v1 = vsub.f32 1.0, %v2682_v6  ;;  %vm2703_vm9 = vmor %vm2701_vm7, %vm2702_vm4 }
 0xa1c   :  { %v2698_v41 = vsub.f32 1.0, %v2697_v42  ;;  %vm2721_vm14 = vcmp.eq.f32.partialorder %v2720_v33, 8.507059e+37 }
 0xa1d   :  { %v2684_v58 = vmul.f32 %v4069_v16, %v2683_v1  ;;  %v2714_v1 = vmul.f32 %v4067_v29, %v2713_v49 }
 0xa1e   :  { %v2699_v11 = vmul.f32 %v4071_v59, %v2698_v41 }
 0xa1f   :  { %v2685_v57 = vadd.f32 %v4069_v16, %v2684_v58  ;;  %v2715_v61 = vadd.f32 %v4067_v29, %v2714_v1 }
 0xa20   :  { %v2700_v23 = vadd.f32 %v4071_v59, %v2699_v11 }
 0xa21   :  { %v2689_v22 = vsel %vm2688_vm6, %v4069_v16, %v2685_v57  ;;  %v2719_v16 = vsel %vm2718_vm13, %v4067_v29, %v2715_v61 }
 0xa22   :  { %v2694_v51 = vsel %vm2691_vm8, %v2693_v40, %v2689_v22  ;;  %v2704_v6 = vsel %vm2703_vm9, %v4071_v59, %v2700_v23  ;;  %v2724_v59 = vsel %vm2721_vm14, %v2723_v19, %v2719_v16 }
 0xa23   :  { %v2709_v42 = vsel %vm2706_vm10, %v2708_v53, %v2704_v6  ;;  %v2728_v41 = vmul.f32 %v4073_v47, %v2694_v51  ;;  %v5966_v53 = vld [vmem:[#allocation34_spill] sm:$0xff]  ;;  %v5967_v47 = vld [vmem:[#allocation36_spill] sm:$0xff] }
 0xa24   :  { %v2727_v14 = vmul.f32 %v2709_v42, %v5600_v43  ;;  %v1998_v22 = vadd.f32 %v5966_v53, %v5533_v35  ;;  %v2039_v51 = vadd.f32 %v5967_v47, %v5535_v28 }
 0xa26   :  { %v5650_v58 = vadd.f32 %v2728_v41, %v2727_v14  ;;  %v5965_v14 = vld [vmem:[#allocation21_spill] sm:$0xff] }
 0xa27   :  { %v2080_v29 = vadd.f32 %v5965_v14, %v5526_v56  ;;  %v5968_v14 = vld [vmem:[#allocation44_spill] sm:$0xff] }
 0xa28   :  { %4074 = vtanh.f32 %v5650_v58 }
 0xa2e   :  { %v4075_v48 = vpop.eup %4074 }
 0xa2f   :  { %v2731_v21 = vmul.f32 %v4075_v48, %v2724_v59 }
 0xa31   :  { %v3372_v11 = vmul.f32 %v5549_v36, %v2731_v21  ;;  %v2737_v18 = vpack.c.bf16 %v2731_v21, %v2731_v21 }
 0xa33   :  { %3382 = vadd.xlane.f32.xlu2 %v3372_v11  ;;  %2746 = vmatmul.bf16.vlgmr.msrb.gmra.mxu2 %v2737_v18 }
 0xa34   :  { %2759 = vmatmul.bf16.vlgmr.msrb.gmra.mxu3 %v2737_v18  ;;  %2772 = vmatmul.bf16.vlgmr.msra.gmra.mxu0 %v2737_v18 }
 0xa35   :  { %2785 = vmatmul.bf16.vlgmr.msra.gmra.mxu1 %v2737_v18  ;;  %2988 = vmatpush.bf16.msrb.mxu2 %v5255_v55 }
 0xa36   :  { %3001 = vmatpush.bf16.msrb.mxu3 %v5257_v25  ;;  %3014 = vmatpush.bf16.msra.mxu0 %v5277_v27 }
 0xa37   :  { %3027 = vmatpush.bf16.msra.mxu1 %v5280_v31 }
 0xa39   :  { %2989 = vmatpush.bf16.msrb.mxu2 %v5273_v52 }
 0xa3a   :  { %3002 = vmatpush.bf16.msrb.mxu3 %v5275_v13  ;;  %3015 = vmatpush.bf16.msra.mxu0 %v5285_v44 }
 0xa3b   :  { %3028 = vmatpush.bf16.msra.mxu1 %v5287_v0 }
 0xa3d   :  { %2990 = vmatpush.bf16.msrb.mxu2 %v5295_v2 }
 0xa3e   :  { %3003 = vmatpush.bf16.msrb.mxu3 %v5297_v20  ;;  %3016 = vmatpush.bf16.msra.mxu0 %v5299_v26 }
 0xa3f   :  { %3029 = vmatpush.bf16.msra.mxu1 %v5302_v34 }
 0xa41   :  { %2991 = vmatpush.bf16.msrb.mxu2 %v5309_v46 }
 0xa42   :  { %3004 = vmatpush.bf16.msrb.mxu3 %v5312_v8  ;;  %3017 = vmatpush.bf16.msra.mxu0 %v5321_v54 }
 0xa43   :  { %3030 = vmatpush.bf16.msra.mxu1 %v5324_v50 }
 0xa45   :  { %2992 = vmatpush.bf16.msrb.mxu2 %v5316_v37 }
 0xa46   :  { %3005 = vmatpush.bf16.msrb.mxu3 %v5319_v10  ;;  %3018 = vmatpush.bf16.msra.mxu0 %v5333_v7 }
 0xa47   :  { %3031 = vmatpush.bf16.msra.mxu1 %v5335_v17 }
 0xa49   :  { %2993 = vmatpush.bf16.msrb.mxu2 %v5327_v32 }
 0xa4a   :  { %3006 = vmatpush.bf16.msrb.mxu3 %v5330_v62  ;;  %3019 = vmatpush.bf16.msra.mxu0 %v5340_v24 }
 0xa4b   :  { %3032 = vmatpush.bf16.msra.mxu1 %v5349_v3 }
 0xa4d   :  { %2994 = vmatpush.bf16.msrb.mxu2 %v5343_v30 }
 0xa4e   :  { %3007 = vmatpush.bf16.msrb.mxu3 %v5346_v60  ;;  %3020 = vmatpush.bf16.msra.mxu0 %v5357_v45 }
 0xa4f   :  { %3033 = vmatpush.bf16.msra.mxu1 %v5371_v4 }
 0xa51   :  { %2995 = vmatpush.bf16.msrb.mxu2 %v5367_v12 }
 0xa52   :  { %3008 = vmatpush.bf16.msrb.mxu3 %v5369_v15  ;;  %3021 = vmatpush.bf16.msra.mxu0 %v5375_v5 }
 0xa53   :  { %3034 = vmatpush.bf16.msra.mxu1 %v5383_v38 }
 0xaa6   :  { %v3383_v43 = vpop.xlane.xlu2 %3382 }
 0xaa7   :  { %v3400_v9 = vadd.f32 %v5584_v39, %v3383_v43 }
 0xaa9   :  { %3408 = vst.msk [vmem:[%s5860_s11 + $0x10] sm:$0xff] %vm445_vm0, %v3400_v9 }
 0xab1   :  { %v2773_v57 = vpop.f32.mrf.mxu0 }
 0xab2   :  { %v2792_v49 = vadd.f32 %v2773_v57, %v2080_v29  ;;  %v2786_v40 = vpop.f32.mrf.mxu1  ;;  %v5969_v29 = vld [vmem:[#allocation22_spill] sm:$0xff] }
 0xab3   :  { %v2121_v57 = vadd.f32 %v5969_v29, %v5968_v14 }
 0xab4   :  { %v3744_v23 = vmul.f32 -1.442695, %v2792_v49 }
 0xab5   :  { %v2793_v53 = vadd.f32 %v2786_v40, %v2121_v57 }
 0xab6   :  { %4076 = vpow2.f32 %v3744_v23  ;;  %v2747_v6 = vpop.f32.mrf.mxu2 }
 0xab7   :  { %v2790_v42 = vadd.f32 %v2747_v6, %v1998_v22  ;;  %v2760_v1 = vpop.f32.mrf.mxu3 }
 0xab8   :  { %v2791_v41 = vadd.f32 %v2760_v1, %v2039_v51 }
 0xab9   :  { %v3742_v61 = vmul.f32 -1.442695, %v2790_v42  ;;  %v2775_v63 = vpop.f32.mrf.mxu0 }
 0xaba   :  { %v3743_v33 = vmul.f32 -1.442695, %v2791_v41  ;;  %v2788_v16 = vpop.f32.mrf.mxu1 }
 0xabb   :  { %4078 = vpow2.f32 %v3742_v61 }
 0xabc   :  { %v4077_v19 = vpop.eup %4076  ;;  %4080 = vpow2.f32 %v3743_v33 }
 0xabd   :  { %v2805_v59 = vadd.f32 1.0, %v4077_v19 }
 0xabe   :  { %v2749_v48 = vpop.f32.mrf.mxu2 }
 0xabf   :  { %v2762_v21 = vpop.f32.mrf.mxu3  ;;  %4082 = vrcp.f32 %v2805_v59  ;;  %vm2841_vm9 = vweird.f32 %v2805_v59 }
 0xac1   :  { %v4079_v11 = vpop.eup %4078 }
 0xac2   :  { %v4081_v18 = vpop.eup %4080  ;;  %v2803_v43 = vadd.f32 1.0, %v4079_v11 }
 0xac3   :  { %v2804_v9 = vadd.f32 1.0, %v4081_v18 }
 0xac4   :  { %4084 = vrcp.f32 %v2803_v43  ;;  %v2817_v1 = vand.u32 2147483648, %v2803_v43  ;;  %v2815_v63 = vand.u32 2147483647, %v2803_v43  ;;  %vm2811_vm2 = vweird.f32 %v2803_v43 }
 0xac5   :  { %4086 = vrcp.f32 %v2804_v9  ;;  %v4083_v49 = vpop.eup %4082  ;;  %v2832_v33 = vand.u32 2147483648, %v2804_v9  ;;  %v2830_v19 = vand.u32 2147483647, %v2804_v9  ;;  %vm2826_vm4 = vweird.f32 %v2804_v9 }
 0xac6   :  { %v2837_v42 = vmul.f32 %v4083_v49, %v2805_v59  ;;  %4088 = vtanh.f32 %v2793_v53  ;;  %v2818_v40 = vor.u32 1.1754944e-38, %v2817_v1  ;;  %vm2816_vm5 = vcmp.eq.f32.partialorder %v2815_v63, 8.507059e+37 }
 0xac7   :  { %v2833_v18 = vor.u32 1.1754944e-38, %v2832_v33  ;;  %vm2831_vm7 = vcmp.eq.f32.partialorder %v2830_v19, 8.507059e+37  ;;  %vm2842_vm8 = vweird.f32 %v4083_v49 }
 0xac8   :  { %v2838_v21 = vsub.f32 1.0, %v2837_v42  ;;  %v2847_v42 = vand.u32 2147483648, %v2805_v59  ;;  %vm2843_vm10 = vmor %vm2841_vm9, %vm2842_vm8 }
 0xaca   :  { %v4085_v23 = vpop.eup %4084  ;;  %v2848_v1 = vor.u32 1.1754944e-38, %v2847_v42 }
 0xacb   :  { %v4087_v22 = vpop.eup %4086  ;;  %v2807_v47 = vmul.f32 %v4085_v23, %v2803_v43  ;;  %vm2812_vm15 = vweird.f32 %v4085_v23 }
 0xacc   :  { %v2822_v51 = vmul.f32 %v4087_v22, %v2804_v9  ;;  %vm2827_vm1 = vweird.f32 %v4087_v22  ;;  %vm2813_vm3 = vmor %vm2811_vm2, %vm2812_vm15  ;;  %v4089_v57 = vpop.eup %4088  ;;  %v2845_v9 = vand.u32 2147483647, %v2805_v59 }
 0xacd   :  { %v2808_v6 = vsub.f32 1.0, %v2807_v47  ;;  %vm2828_vm6 = vmor %vm2826_vm4, %vm2827_vm1 }
 0xace   :  { %v2823_v41 = vsub.f32 1.0, %v2822_v51  ;;  %vm2846_vm11 = vcmp.eq.f32.partialorder %v2845_v9, 8.507059e+37 }
 0xacf   :  { %v2809_v61 = vmul.f32 %v4085_v23, %v2808_v6  ;;  %v2839_v6 = vmul.f32 %v4083_v49, %v2838_v21 }
 0xad0   :  { %v2824_v16 = vmul.f32 %v4087_v22, %v2823_v41 }
 0xad1   :  { %v2810_v48 = vadd.f32 %v4085_v23, %v2809_v61  ;;  %v2840_v43 = vadd.f32 %v4083_v49, %v2839_v6 }
 0xad2   :  { %v2825_v11 = vadd.f32 %v4087_v22, %v2824_v16 }
 0xad3   :  { %v2814_v29 = vsel %vm2813_vm3, %v4085_v23, %v2810_v48  ;;  %v2844_v23 = vsel %vm2843_vm10, %v4083_v49, %v2840_v43 }
 0xad4   :  { %v2819_v53 = vsel %vm2816_vm5, %v2818_v40, %v2814_v29  ;;  %v2829_v47 = vsel %vm2828_vm6, %v4087_v22, %v2825_v11  ;;  %v2849_v22 = vsel %vm2846_vm11, %v2848_v1, %v2844_v23 }
 0xad5   :  { %v2834_v51 = vsel %vm2831_vm7, %v2833_v18, %v2829_v47  ;;  %v2853_v41 = vmul.f32 %v4089_v57, %v2819_v53  ;;  %v5971_v18 = vld [vmem:[#allocation37_spill] sm:$0xff]  ;;  %v5972_v57 = vld [vmem:[#allocation38_spill] sm:$0xff] }
 0xad6   :  { %v2852_v14 = vmul.f32 %v2834_v51, %v5650_v58  ;;  %v2001_v29 = vadd.f32 %v5971_v18, %v5533_v35  ;;  %v2042_v53 = vadd.f32 %v5972_v57, %v5535_v28 }
 0xad8   :  { %v5700_v61 = vadd.f32 %v2853_v41, %v2852_v14  ;;  %v5970_v14 = vld [vmem:[#allocation23_spill] sm:$0xff] }
 0xad9   :  { %v2083_v49 = vadd.f32 %v5970_v14, %v5526_v56  ;;  %v5973_v14 = vld [vmem:[#allocation44_spill] sm:$0xff] }
 0xada   :  { %4090 = vtanh.f32 %v5700_v61 }
 0xae0   :  { %v4091_v63 = vpop.eup %4090 }
 0xae1   :  { %v2856_v33 = vmul.f32 %v4091_v63, %v2849_v22 }
 0xae3   :  { %v3373_v16 = vmul.f32 %v5549_v36, %v2856_v33  ;;  %v2862_v19 = vpack.c.bf16 %v2856_v33, %v2856_v33 }
 0xae5   :  { %3384 = vadd.xlane.f32.xlu2 %v3373_v16  ;;  %2871 = vmatmul.bf16.vlgmr.msra.gmra.mxu2 %v2862_v19 }
 0xae6   :  { %2884 = vmatmul.bf16.vlgmr.msra.gmra.mxu3 %v2862_v19  ;;  %2897 = vmatmul.bf16.vlgmr.msrb.gmra.mxu0 %v2862_v19 }
 0xae7   :  { %2910 = vmatmul.bf16.vlgmr.msrb.gmra.mxu1 %v2862_v19  ;;  %3113 = vmatpush.bf16.msra.mxu2 %v5255_v55 }
 0xae8   :  { %3126 = vmatpush.bf16.msra.mxu3 %v5257_v25  ;;  %3139 = vmatpush.bf16.msrb.mxu0 %v5277_v27 }
 0xae9   :  { %3152 = vmatpush.bf16.msrb.mxu1 %v5280_v31 }
 0xaeb   :  { %3114 = vmatpush.bf16.msra.mxu2 %v5273_v52 }
 0xaec   :  { %3127 = vmatpush.bf16.msra.mxu3 %v5275_v13  ;;  %3140 = vmatpush.bf16.msrb.mxu0 %v5285_v44 }
 0xaed   :  { %3153 = vmatpush.bf16.msrb.mxu1 %v5287_v0 }
 0xaef   :  { %3115 = vmatpush.bf16.msra.mxu2 %v5295_v2 }
 0xaf0   :  { %3128 = vmatpush.bf16.msra.mxu3 %v5297_v20  ;;  %3141 = vmatpush.bf16.msrb.mxu0 %v5299_v26 }
 0xaf1   :  { %3154 = vmatpush.bf16.msrb.mxu1 %v5302_v34 }
 0xaf3   :  { %3116 = vmatpush.bf16.msra.mxu2 %v5309_v46 }
 0xaf4   :  { %3129 = vmatpush.bf16.msra.mxu3 %v5312_v8  ;;  %3142 = vmatpush.bf16.msrb.mxu0 %v5321_v54 }
 0xaf5   :  { %3155 = vmatpush.bf16.msrb.mxu1 %v5324_v50 }
 0xaf7   :  { %3117 = vmatpush.bf16.msra.mxu2 %v5316_v37 }
 0xaf8   :  { %3130 = vmatpush.bf16.msra.mxu3 %v5319_v10  ;;  %3143 = vmatpush.bf16.msrb.mxu0 %v5333_v7 }
 0xaf9   :  { %3156 = vmatpush.bf16.msrb.mxu1 %v5335_v17 }
 0xafb   :  { %3118 = vmatpush.bf16.msra.mxu2 %v5327_v32 }
 0xafc   :  { %3131 = vmatpush.bf16.msra.mxu3 %v5330_v62  ;;  %3144 = vmatpush.bf16.msrb.mxu0 %v5340_v24 }
 0xafd   :  { %3157 = vmatpush.bf16.msrb.mxu1 %v5349_v3 }
 0xaff   :  { %3119 = vmatpush.bf16.msra.mxu2 %v5343_v30 }
 0xb00   :  { %3132 = vmatpush.bf16.msra.mxu3 %v5346_v60  ;;  %3145 = vmatpush.bf16.msrb.mxu0 %v5357_v45 }
 0xb01   :  { %3158 = vmatpush.bf16.msrb.mxu1 %v5371_v4 }
 0xb03   :  { %3120 = vmatpush.bf16.msra.mxu2 %v5367_v12 }
 0xb04   :  { %3133 = vmatpush.bf16.msra.mxu3 %v5369_v15  ;;  %3146 = vmatpush.bf16.msrb.mxu0 %v5375_v5 }
 0xb05   :  { %3159 = vmatpush.bf16.msrb.mxu1 %v5383_v38 }
 0xb58   :  { %v3385_v58 = vpop.xlane.xlu2 %3384 }
 0xb59   :  { %v3401_v59 = vadd.f32 %v5584_v39, %v3385_v58 }
 0xb5b   :  { %3409 = vst.msk [vmem:[%s5860_s11 + $0x18] sm:$0xff] %vm445_vm0, %v3401_v59 }
 0xb63   :  { %v2898_v48 = vpop.f32.mrf.mxu0 }
 0xb64   :  { %v2917_v21 = vadd.f32 %v2898_v48, %v2083_v49  ;;  %v2911_v40 = vpop.f32.mrf.mxu1  ;;  %v5974_v49 = vld [vmem:[#allocation24_spill] sm:$0xff] }
 0xb65   :  { %v2124_v48 = vadd.f32 %v5974_v49, %v5973_v14 }
 0xb66   :  { %v3747_v11 = vmul.f32 -1.442695, %v2917_v21 }
 0xb67   :  { %v2918_v18 = vadd.f32 %v2911_v40, %v2124_v48 }
 0xb68   :  { %4092 = vpow2.f32 %v3747_v11  ;;  %v2872_v47 = vpop.f32.mrf.mxu2 }
 0xb69   :  { %v2915_v51 = vadd.f32 %v2872_v47, %v2001_v29  ;;  %v2885_v6 = vpop.f32.mrf.mxu3 }
 0xb6a   :  { %v2916_v41 = vadd.f32 %v2885_v6, %v2042_v53 }
 0xb6b   :  { %v3745_v43 = vmul.f32 -1.442695, %v2915_v51  ;;  %v2900_v42 = vpop.f32.mrf.mxu0 }
 0xb6c   :  { %v3746_v9 = vmul.f32 -1.442695, %v2916_v41  ;;  %v2913_v23 = vpop.f32.mrf.mxu1 }
 0xb6d   :  { %4094 = vpow2.f32 %v3745_v43 }
 0xb6e   :  { %v4093_v1 = vpop.eup %4092  ;;  %4096 = vpow2.f32 %v3746_v9 }
 0xb6f   :  { %v2930_v22 = vadd.f32 1.0, %v4093_v1 }
 0xb70   :  { %v2874_v63 = vpop.f32.mrf.mxu2 }
 0xb71   :  { %v2887_v33 = vpop.f32.mrf.mxu3  ;;  %4098 = vrcp.f32 %v2930_v22  ;;  %vm2966_vm6 = vweird.f32 %v2930_v22 }
 0xb73   :  { %v4095_v16 = vpop.eup %4094 }
 0xb74   :  { %v4097_v19 = vpop.eup %4096  ;;  %v2928_v58 = vadd.f32 1.0, %v4095_v16 }
 0xb75   :  { %v2929_v59 = vadd.f32 1.0, %v4097_v19 }
 0xb76   :  { %4100 = vrcp.f32 %v2928_v58  ;;  %v2942_v6 = vand.u32 2147483648, %v2928_v58  ;;  %v2940_v42 = vand.u32 2147483647, %v2928_v58  ;;  %vm2936_vm14 = vweird.f32 %v2928_v58 }
 0xb77   :  { %4102 = vrcp.f32 %v2929_v59  ;;  %v4099_v21 = vpop.eup %4098  ;;  %v2957_v9 = vand.u32 2147483648, %v2929_v59  ;;  %v2955_v1 = vand.u32 2147483647, %v2929_v59  ;;  %vm2951_vm1 = vweird.f32 %v2929_v59 }
 0xb78   :  { %v2962_v51 = vmul.f32 %v4099_v21, %v2930_v22  ;;  %4104 = vtanh.f32 %v2918_v18  ;;  %v2943_v40 = vor.u32 1.1754944e-38, %v2942_v6  ;;  %vm2941_vm2 = vcmp.eq.f32.partialorder %v2940_v42, 8.507059e+37 }
 0xb79   :  { %v2958_v19 = vor.u32 1.1754944e-38, %v2957_v9  ;;  %vm2956_vm4 = vcmp.eq.f32.partialorder %v2955_v1, 8.507059e+37  ;;  %vm2967_vm5 = vweird.f32 %v4099_v21 }
 0xb7a   :  { %v2963_v33 = vsub.f32 1.0, %v2962_v51  ;;  %v2972_v51 = vand.u32 2147483648, %v2930_v22  ;;  %vm2968_vm7 = vmor %vm2966_vm6, %vm2967_vm5 }
 0xb7c   :  { %v4101_v11 = vpop.eup %4100  ;;  %v2973_v6 = vor.u32 1.1754944e-38, %v2972_v51 }
 0xb7d   :  { %v4103_v29 = vpop.eup %4102  ;;  %v2932_v57 = vmul.f32 %v4101_v11, %v2928_v58  ;;  %vm2937_vm12 = vweird.f32 %v4101_v11 }
 0xb7e   :  { %v2947_v53 = vmul.f32 %v4103_v29, %v2929_v59  ;;  %vm2952_vm13 = vweird.f32 %v4103_v29  ;;  %vm2938_vm15 = vmor %vm2936_vm14, %vm2937_vm12  ;;  %v4105_v48 = vpop.eup %4104  ;;  %v2970_v59 = vand.u32 2147483647, %v2930_v22 }
 0xb7f   :  { %v2933_v47 = vsub.f32 1.0, %v2932_v57  ;;  %vm2953_vm3 = vmor %vm2951_vm1, %vm2952_vm13 }
 0xb80   :  { %v2948_v41 = vsub.f32 1.0, %v2947_v53  ;;  %vm2971_vm8 = vcmp.eq.f32.partialorder %v2970_v59, 8.507059e+37 }
 0xb81   :  { %v2934_v43 = vmul.f32 %v4101_v11, %v2933_v47  ;;  %v2964_v47 = vmul.f32 %v4099_v21, %v2963_v33 }
 0xb82   :  { %v2949_v23 = vmul.f32 %v4103_v29, %v2948_v41 }
 0xb83   :  { %v2935_v63 = vadd.f32 %v4101_v11, %v2934_v43  ;;  %v2965_v58 = vadd.f32 %v4099_v21, %v2964_v47 }
 0xb84   :  { %v2950_v16 = vadd.f32 %v4103_v29, %v2949_v23 }
 0xb85   :  { %v2939_v49 = vsel %vm2938_vm15, %v4101_v11, %v2935_v63  ;;  %v2969_v11 = vsel %vm2968_vm7, %v4099_v21, %v2965_v58 }
 0xb86   :  { %v2944_v18 = vsel %vm2941_vm2, %v2943_v40, %v2939_v49  ;;  %v2954_v57 = vsel %vm2953_vm3, %v4103_v29, %v2950_v16  ;;  %v2974_v29 = vsel %vm2971_vm8, %v2973_v6, %v2969_v11 }
 0xb87   :  { %v2959_v53 = vsel %vm2956_vm4, %v2958_v19, %v2954_v57  ;;  %v2978_v41 = vmul.f32 %v4105_v48, %v2944_v18 }
 0xb88   :  { %v2977_v14 = vmul.f32 %v2959_v53, %v5700_v61 }
 0xb8a   :  { %v5750_v43 = vadd.f32 %v2978_v41, %v2977_v14 }
 0xb8c   :  { %4106 = vtanh.f32 %v5750_v43 }
 0xb92   :  { %v4107_v42 = vpop.eup %4106 }
 0xb93   :  { %v2981_v9 = vmul.f32 %v4107_v42, %v2974_v29 }
 0xb95   :  { %v3374_v23 = vmul.f32 %v5549_v36, %v2981_v9  ;;  %v2987_v1 = vpack.c.bf16 %v2981_v9, %v2981_v9 }
 0xb97   :  { %3386 = vadd.xlane.f32.xlu0 %v3374_v23  ;;  %2996 = vmatmul.bf16.vlgmr.msrb.gmra.mxu2 %v2987_v1 }
 0xb98   :  { %3009 = vmatmul.bf16.vlgmr.msrb.gmra.mxu3 %v2987_v1  ;;  %3022 = vmatmul.bf16.vlgmr.msra.gmra.mxu0 %v2987_v1 }
 0xb99   :  { %3035 = vmatmul.bf16.vlgmr.msra.gmra.mxu1 %v2987_v1  ;;  %3238 = vmatpush.bf16.msrb.mxu2 %v5255_v55 }
 0xb9a   :  { %3251 = vmatpush.bf16.msrb.mxu3 %v5257_v25  ;;  %3264 = vmatpush.bf16.msra.mxu0 %v5277_v27 }
 0xb9b   :  { %3277 = vmatpush.bf16.msra.mxu1 %v5280_v31 }
 0xb9d   :  { %3239 = vmatpush.bf16.msrb.mxu2 %v5273_v52  ;;  %v5975_v52 = vld [vmem:[#allocation25_spill] sm:$0xff] }
 0xb9e   :  { %3252 = vmatpush.bf16.msrb.mxu3 %v5275_v13  ;;  %3265 = vmatpush.bf16.msra.mxu0 %v5285_v44  ;;  %v2086_v13 = vadd.f32 %v5975_v52, %v5526_v56 }
 0xb9f   :  { %3278 = vmatpush.bf16.msra.mxu1 %v5287_v0 }
 0xba1   :  { %3240 = vmatpush.bf16.msrb.mxu2 %v5295_v2  ;;  %v5976_v2 = vld [vmem:[#allocation39_spill] sm:$0xff] }
 0xba2   :  { %3253 = vmatpush.bf16.msrb.mxu3 %v5297_v20  ;;  %3266 = vmatpush.bf16.msra.mxu0 %v5299_v26  ;;  %v2004_v20 = vadd.f32 %v5976_v2, %v5533_v35  ;;  %v5977_v26 = vld [vmem:[#allocation35_spill] sm:$0xff] }
 0xba3   :  { %3279 = vmatpush.bf16.msra.mxu1 %v5302_v34  ;;  %v2045_v34 = vadd.f32 %v5977_v26, %v5535_v28 }
 0xba5   :  { %3241 = vmatpush.bf16.msrb.mxu2 %v5309_v46 }
 0xba6   :  { %3254 = vmatpush.bf16.msrb.mxu3 %v5312_v8  ;;  %3267 = vmatpush.bf16.msra.mxu0 %v5321_v54 }
 0xba7   :  { %3280 = vmatpush.bf16.msra.mxu1 %v5324_v50 }
 0xba9   :  { %3242 = vmatpush.bf16.msrb.mxu2 %v5316_v37 }
 0xbaa   :  { %3255 = vmatpush.bf16.msrb.mxu3 %v5319_v10  ;;  %3268 = vmatpush.bf16.msra.mxu0 %v5333_v7 }
 0xbab   :  { %3281 = vmatpush.bf16.msra.mxu1 %v5335_v17 }
 0xbad   :  { %3243 = vmatpush.bf16.msrb.mxu2 %v5327_v32 }
 0xbae   :  { %3256 = vmatpush.bf16.msrb.mxu3 %v5330_v62  ;;  %3269 = vmatpush.bf16.msra.mxu0 %v5340_v24 }
 0xbaf   :  { %3282 = vmatpush.bf16.msra.mxu1 %v5349_v3 }
 0xbb1   :  { %3244 = vmatpush.bf16.msrb.mxu2 %v5343_v30 }
 0xbb2   :  { %3257 = vmatpush.bf16.msrb.mxu3 %v5346_v60  ;;  %3270 = vmatpush.bf16.msra.mxu0 %v5357_v45 }
 0xbb3   :  { %3283 = vmatpush.bf16.msra.mxu1 %v5371_v4  ;;  %v5979_v4 = vld [vmem:[#allocation26_spill] sm:$0xff] }
 0xbb5   :  { %3245 = vmatpush.bf16.msrb.mxu2 %v5367_v12 }
 0xbb6   :  { %3258 = vmatpush.bf16.msrb.mxu3 %v5369_v15  ;;  %3271 = vmatpush.bf16.msra.mxu0 %v5375_v5  ;;  %v5978_v15 = vld [vmem:[#allocation44_spill] sm:$0xff] }
 0xbb7   :  { %3284 = vmatpush.bf16.msra.mxu1 %v5383_v38  ;;  %v2127_v5 = vadd.f32 %v5979_v4, %v5978_v15 }
 0xc0a   :  { %v3387_v55 = vpop.xlane.xlu0 %3386 }
 0xc0b   :  { %v3402_v25 = vadd.f32 %v5584_v39, %v3387_v55 }
 0xc0d   :  { %3410 = vst.msk [vmem:[%s5860_s11 + $0x20] sm:$0xff] %vm445_vm0, %v3402_v25 }
 0xc15   :  { %v3023_v27 = vpop.f32.mrf.mxu0 }
 0xc16   :  { %v3042_v31 = vadd.f32 %v3023_v27, %v2086_v13  ;;  %v3036_v44 = vpop.f32.mrf.mxu1 }
 0xc17   :  { %v3043_v39 = vadd.f32 %v3036_v44, %v2127_v5 }
 0xc18   :  { %v3750_v0 = vmul.f32 -1.442695, %v3042_v31 }
 0xc1a   :  { %4108 = vpow2.f32 %v3750_v0  ;;  %v2997_v46 = vpop.f32.mrf.mxu2 }
 0xc1b   :  { %v3040_v8 = vadd.f32 %v2997_v46, %v2004_v20  ;;  %v3010_v37 = vpop.f32.mrf.mxu3 }
 0xc1c   :  { %v3041_v10 = vadd.f32 %v3010_v37, %v2045_v34  ;;  %v5809_v34 = vld [vmem:[#allocation6] ss:$0 sm:$0xff] }
 0xc1d   :  { %v3748_v54 = vmul.f32 -1.442695, %v3040_v8  ;;  %v3025_v50 = vpop.f32.mrf.mxu0  ;;  %v5980_v8 = vld [vmem:[#allocation18_spill] sm:$0xff] }
 0xc1e   :  { %v3749_v32 = vmul.f32 -1.442695, %v3041_v10  ;;  %v3038_v62 = vpop.f32.mrf.mxu1  ;;  %v2089_v37 = vadd.f32 %v5980_v8, %v5526_v56 }
 0xc1f   :  { %4110 = vpow2.f32 %v3748_v54  ;;  %v5981_v62 = vld [vmem:[#allocation40_spill] sm:$0xff] }
 0xc20   :  { %v4109_v7 = vpop.eup %4108  ;;  %4112 = vpow2.f32 %v3749_v32 }
 0xc21   :  { %v3055_v24 = vadd.f32 1.0, %v4109_v7  ;;  %v2007_v7 = vadd.f32 %v5981_v62, %v5533_v35 }
 0xc22   :  { %v2999_v17 = vpop.f32.mrf.mxu2 }
 0xc23   :  { %v3012_v30 = vpop.f32.mrf.mxu3  ;;  %4114 = vrcp.f32 %v3055_v24  ;;  %v3097_v25 = vand.u32 2147483648, %v3055_v24  ;;  %vm3091_vm3 = vweird.f32 %v3055_v24  ;;  %v3095_v52 = vand.u32 2147483647, %v3055_v24  ;;  %v5982_v17 = vld [vmem:[#allocation27_spill] sm:$0xff] }
 0xc25   :  { %v4111_v60 = vpop.eup %4110  ;;  %v3098_v27 = vor.u32 1.1754944e-38, %v3097_v25  ;;  %vm3096_vm5 = vcmp.eq.f32.partialorder %v3095_v52, 8.507059e+37 }
 0xc26   :  { %v4113_v3 = vpop.eup %4112  ;;  %v3053_v45 = vadd.f32 1.0, %v4111_v60 }
 0xc27   :  { %v3054_v12 = vadd.f32 1.0, %v4113_v3 }
 0xc28   :  { %4116 = vrcp.f32 %v3053_v45  ;;  %v3067_v33 = vand.u32 2147483648, %v3053_v45  ;;  %v3065_v19 = vand.u32 2147483647, %v3053_v45  ;;  %vm3061_vm11 = vweird.f32 %v3053_v45 }
 0xc29   :  { %4118 = vrcp.f32 %v3054_v12  ;;  %v4115_v38 = vpop.eup %4114  ;;  %v3082_v49 = vand.u32 2147483648, %v3054_v12  ;;  %v3080_v18 = vand.u32 2147483647, %v3054_v12  ;;  %vm3076_vm13 = vweird.f32 %v3054_v12 }
 0xc2a   :  { %v3087_v63 = vmul.f32 %v4115_v38, %v3055_v24  ;;  %4120 = vtanh.f32 %v3043_v39  ;;  %v3068_v47 = vor.u32 1.1754944e-38, %v3067_v33  ;;  %vm3066_vm14 = vcmp.eq.f32.partialorder %v3065_v19, 8.507059e+37 }
 0xc2b   :  { %v3083_v58 = vor.u32 1.1754944e-38, %v3082_v49  ;;  %vm3081_vm1 = vcmp.eq.f32.partialorder %v3080_v18, 8.507059e+37  ;;  %vm3092_vm2 = vweird.f32 %v4115_v38  ;;  %v2048_v24 = vadd.f32 %v5982_v17, %v5535_v28 }
 0xc2c   :  { %v3088_v53 = vsub.f32 1.0, %v3087_v63  ;;  %vm3093_vm4 = vmor %vm3091_vm3, %vm3092_vm2 }
 0xc2e   :  { %v4117_v36 = vpop.eup %4116  ;;  %v3089_v29 = vmul.f32 %v4115_v38, %v3088_v53 }
 0xc2f   :  { %v4119_v61 = vpop.eup %4118  ;;  %v3057_v22 = vmul.f32 %v4117_v36, %v3053_v45  ;;  %vm3062_vm9 = vweird.f32 %v4117_v36 }
 0xc30   :  { %v3072_v14 = vmul.f32 %v4119_v61, %v3054_v12  ;;  %vm3077_vm10 = vweird.f32 %v4119_v61  ;;  %vm3063_vm12 = vmor %vm3061_vm11, %vm3062_vm9  ;;  %v4121_v59 = vpop.eup %4120  ;;  %v3090_v55 = vadd.f32 %v4115_v38, %v3089_v29 }
 0xc31   :  { %v3058_v21 = vsub.f32 1.0, %v3057_v22  ;;  %vm3078_vm15 = vmor %vm3076_vm13, %vm3077_vm10 }
 0xc32   :  { %v3073_v40 = vsub.f32 1.0, %v3072_v14  ;;  %v3094_v13 = vsel %vm3093_vm4, %v4115_v38, %v3090_v55 }
 0xc33   :  { %v3059_v16 = vmul.f32 %v4117_v36, %v3058_v21  ;;  %v3099_v44 = vsel %vm3096_vm5, %v3098_v27, %v3094_v13 }
 0xc34   :  { %v3074_v48 = vmul.f32 %v4119_v61, %v3073_v40  ;;  %v5983_v40 = vld [vmem:[#allocation29_spill] sm:$0xff] }
 0xc35   :  { %v3060_v57 = vadd.f32 %v4117_v36, %v3059_v16  ;;  %v2130_v16 = vadd.f32 %v5983_v40, %v5978_v15 }
 0xc36   :  { %v3075_v41 = vadd.f32 %v4119_v61, %v3074_v48 }
 0xc37   :  { %v3064_v51 = vsel %vm3063_vm12, %v4117_v36, %v3060_v57 }
 0xc38   :  { %v3069_v11 = vsel %vm3066_vm14, %v3068_v47, %v3064_v51  ;;  %v3079_v6 = vsel %vm3078_vm15, %v4119_v61, %v3075_v41 }
 0xc39   :  { %v3084_v42 = vsel %vm3081_vm1, %v3083_v58, %v3079_v6  ;;  %v3103_v9 = vmul.f32 %v4121_v59, %v3069_v11 }
 0xc3a   :  { %v3102_v23 = vmul.f32 %v3084_v42, %v5750_v43  ;;  %v5806_v43 = vld [vmem:[%s5858_s9] ss:$0 sm:$0xff] }
 0xc3c   :  { %v5800_v1 = vadd.f32 %v3103_v9, %v3102_v23 }
 0xc3e   :  { %4122 = vtanh.f32 %v5800_v1 }
 0xc44   :  { %v4123_v31 = vpop.eup %4122 }
 0xc45   :  { %v3106_v0 = vmul.f32 %v4123_v31, %v3099_v44 }
 0xc47   :  { %v3375_v2 = vmul.f32 %v5806_v43, %v3106_v0  ;;  %v3112_v20 = vpack.c.bf16 %v3106_v0, %v3106_v0 }
 0xc49   :  { %3388 = vadd.xlane.f32.xlu1 %v3375_v2  ;;  %3121 = vmatmul.bf16.vlgmr.msra.gmra.mxu2 %v3112_v20 }
 0xc4a   :  { %3134 = vmatmul.bf16.vlgmr.msra.gmra.mxu3 %v3112_v20  ;;  %3147 = vmatmul.bf16.vlgmr.msrb.gmra.mxu0 %v3112_v20 }
 0xc4b   :  { %3160 = vmatmul.bf16.vlgmr.msrb.gmra.mxu1 %v3112_v20 }
 0xcbc   :  { %v3389_v26 = vpop.xlane.xlu1 %3388 }
 0xcbd   :  { %v3403_v46 = vadd.f32 %v5809_v34, %v3389_v26 }
 0xcbf   :  { %3411 = vst.msk [vmem:[%s5860_s11 + $0x28] sm:$0xff] %vm445_vm0, %v3403_v46 }
 0xcc7   :  { %v3148_v10 = vpop.f32.mrf.mxu0 }
 0xcc8   :  { %v3167_v54 = vadd.f32 %v3148_v10, %v2089_v37  ;;  %v3161_v50 = vpop.f32.mrf.mxu1 }
 0xcc9   :  { %v3168_v48 = vadd.f32 %v3161_v50, %v2130_v16 }
 0xcca   :  { %v3753_v32 = vmul.f32 -1.442695, %v3167_v54 }
 0xccc   :  { %4124 = vpow2.f32 %v3753_v32  ;;  %v3122_v30 = vpop.f32.mrf.mxu2 }
 0xccd   :  { %v3165_v60 = vadd.f32 %v3122_v30, %v2007_v7  ;;  %v3135_v3 = vpop.f32.mrf.mxu3 }
 0xcce   :  { %v3166_v45 = vadd.f32 %v3135_v3, %v2048_v24 }
 0xccf   :  { %v3751_v12 = vmul.f32 -1.442695, %v3165_v60  ;;  %v3150_v4 = vpop.f32.mrf.mxu0  ;;  %v5984_v60 = vld [vmem:[#allocation28_spill] sm:$0xff] }
 0xcd0   :  { %v3752_v5 = vmul.f32 -1.442695, %v3166_v45  ;;  %v3163_v38 = vpop.f32.mrf.mxu1  ;;  %v2092_v3 = vadd.f32 %v5984_v60, %v5526_v56 }
 0xcd1   :  { %4126 = vpow2.f32 %v3751_v12  ;;  %v5985_v38 = vld [vmem:[#allocation42_spill] sm:$0xff] }
 0xcd2   :  { %v4125_v36 = vpop.eup %4124  ;;  %4128 = vpow2.f32 %v3752_v5 }
 0xcd3   :  { %v3180_v61 = vadd.f32 1.0, %v4125_v36  ;;  %v2010_v36 = vadd.f32 %v5985_v38, %v5533_v35 }
 0xcd4   :  { %v3124_v39 = vpop.f32.mrf.mxu2 }
 0xcd5   :  { %v3137_v22 = vpop.f32.mrf.mxu3  ;;  %4130 = vrcp.f32 %v3180_v61  ;;  %v3222_v37 = vand.u32 2147483648, %v3180_v61  ;;  %vm3216_vm15 = vweird.f32 %v3180_v61  ;;  %v3220_v10 = vand.u32 2147483647, %v3180_v61  ;;  %v5986_v39 = vld [vmem:[#allocation43_spill] sm:$0xff] }
 0xcd7   :  { %v4127_v14 = vpop.eup %4126  ;;  %v3223_v50 = vor.u32 1.1754944e-38, %v3222_v37  ;;  %vm3221_vm2 = vcmp.eq.f32.partialorder %v3220_v10, 8.507059e+37 }
 0xcd8   :  { %v4129_v21 = vpop.eup %4128  ;;  %v3178_v63 = vadd.f32 1.0, %v4127_v14 }
 0xcd9   :  { %v3179_v33 = vadd.f32 1.0, %v4129_v21 }
 0xcda   :  { %4132 = vrcp.f32 %v3178_v63  ;;  %v3192_v58 = vand.u32 2147483648, %v3178_v63  ;;  %v3190_v11 = vand.u32 2147483647, %v3178_v63  ;;  %vm3186_vm8 = vweird.f32 %v3178_v63 }
 0xcdb   :  { %4134 = vrcp.f32 %v3179_v33  ;;  %v4131_v19 = vpop.eup %4130  ;;  %v3207_v6 = vand.u32 2147483648, %v3179_v33  ;;  %v3205_v29 = vand.u32 2147483647, %v3179_v33  ;;  %vm3201_vm10 = vweird.f32 %v3179_v33 }
 0xcdc   :  { %v3212_v41 = vmul.f32 %v4131_v19, %v3180_v61  ;;  %4136 = vtanh.f32 %v3168_v48  ;;  %v3193_v55 = vor.u32 1.1754944e-38, %v3192_v58  ;;  %vm3191_vm11 = vcmp.eq.f32.partialorder %v3190_v11, 8.507059e+37 }
 0xcdd   :  { %v3208_v52 = vor.u32 1.1754944e-38, %v3207_v6  ;;  %vm3206_vm13 = vcmp.eq.f32.partialorder %v3205_v29, 8.507059e+37  ;;  %vm3217_vm14 = vweird.f32 %v4131_v19  ;;  %v2051_v61 = vadd.f32 %v5986_v39, %v5535_v28 }
 0xcde   :  { %v3213_v23 = vsub.f32 1.0, %v3212_v41  ;;  %vm3218_vm1 = vmor %vm3216_vm15, %vm3217_vm14 }
 0xce0   :  { %v4133_v49 = vpop.eup %4132  ;;  %v3214_v2 = vmul.f32 %v4131_v19, %v3213_v23 }
 0xce1   :  { %v4135_v18 = vpop.eup %4134  ;;  %v3182_v57 = vmul.f32 %v4133_v49, %v3178_v63  ;;  %vm3187_vm6 = vweird.f32 %v4133_v49 }
 0xce2   :  { %v3197_v53 = vmul.f32 %v4135_v18, %v3179_v33  ;;  %vm3202_vm7 = vweird.f32 %v4135_v18  ;;  %vm3188_vm9 = vmor %vm3186_vm8, %vm3187_vm6  ;;  %v4137_v27 = vpop.eup %4136  ;;  %v3215_v8 = vadd.f32 %v4131_v19, %v3214_v2 }
 0xce3   :  { %v3183_v47 = vsub.f32 1.0, %v3182_v57  ;;  %vm3203_vm12 = vmor %vm3201_vm10, %vm3202_vm7 }
 0xce4   :  { %v3198_v51 = vsub.f32 1.0, %v3197_v53  ;;  %v3219_v54 = vsel %vm3218_vm1, %v4131_v19, %v3215_v8 }
 0xce5   :  { %v3184_v59 = vmul.f32 %v4133_v49, %v3183_v47  ;;  %v3224_v62 = vsel %vm3221_vm2, %v3223_v50, %v3219_v54  ;;  %v5987_v47 = vld [vmem:[#allocation41_spill] sm:$0xff] }
 0xce6   :  { %v3199_v42 = vmul.f32 %v4135_v18, %v3198_v51  ;;  %v2133_v41 = vadd.f32 %v5987_v47, %v5978_v15 }
 0xce7   :  { %v3185_v9 = vadd.f32 %v4133_v49, %v3184_v59 }
 0xce8   :  { %v3200_v25 = vadd.f32 %v4135_v18, %v3199_v42 }
 0xce9   :  { %v3189_v13 = vsel %vm3188_vm9, %v4133_v49, %v3185_v9 }
 0xcea   :  { %v3194_v31 = vsel %vm3191_vm11, %v3193_v55, %v3189_v13  ;;  %v3204_v44 = vsel %vm3203_vm12, %v4135_v18, %v3200_v25 }
 0xceb   :  { %v3209_v0 = vsel %vm3206_vm13, %v3208_v52, %v3204_v44  ;;  %v3228_v20 = vmul.f32 %v4137_v27, %v3194_v31 }
 0xcec   :  { %v3227_v26 = vmul.f32 %v3209_v0, %v5800_v1 }
 0xcee   :  { %v5825_v46 = vadd.f32 %v3228_v20, %v3227_v26 }
 0xcf0   :  { %4138 = vtanh.f32 %v5825_v46 }
 0xcf6   :  { %v4139_v32 = vpop.eup %4138 }
 0xcf7   :  { %v3231_v7 = vmul.f32 %v4139_v32, %v3224_v62 }
 0xcf9   :  { %v3376_v17 = vmul.f32 %v5806_v43, %v3231_v7  ;;  %v3237_v24 = vpack.c.bf16 %v3231_v7, %v3231_v7 }
 0xcfb   :  { %3390 = vadd.xlane.f32.xlu2 %v3376_v17  ;;  %3246 = vmatmul.bf16.vlgmr.msrb.gmra.mxu2 %v3237_v24 }
 0xcfc   :  { %3259 = vmatmul.bf16.vlgmr.msrb.gmra.mxu3 %v3237_v24  ;;  %3272 = vmatmul.bf16.vlgmr.msra.gmra.mxu0 %v3237_v24 }
 0xcfd   :  { %3285 = vmatmul.bf16.vlgmr.msra.gmra.mxu1 %v3237_v24 }
 0xd6e   :  { %v3391_v1 = vpop.xlane.xlu2 %3390 }
 0xd6f   :  { %v3404_v30 = vadd.f32 %v5809_v34, %v3391_v1 }
 0xd71   :  { %3412 = vst.msk [vmem:[%s5860_s11 + $0x30] sm:$0xff] %vm445_vm0, %v3404_v30 }
 0xd79   :  { %v3273_v45 = vpop.f32.mrf.mxu0 }
 0xd7a   :  { %v3292_v12 = vadd.f32 %v3273_v45, %v2092_v3  ;;  %v3286_v4 = vpop.f32.mrf.mxu1 }
 0xd7b   :  { %v3293_v59 = vadd.f32 %v3286_v4, %v2133_v41 }
 0xd7c   :  { %v3756_v5 = vmul.f32 -1.442695, %v3292_v12 }
 0xd7e   :  { %4140 = vpow2.f32 %v3756_v5  ;;  %v3247_v22 = vpop.f32.mrf.mxu2 }
 0xd7f   :  { %v3290_v14 = vadd.f32 %v3247_v22, %v2010_v36  ;;  %v3260_v21 = vpop.f32.mrf.mxu3 }
 0xd80   :  { %v3291_v63 = vadd.f32 %v3260_v21, %v2051_v61 }
 0xd81   :  { %v3754_v33 = vmul.f32 -1.442695, %v3290_v14  ;;  %v3275_v40 = vpop.f32.mrf.mxu0 }
 0xd82   :  { %v3755_v16 = vmul.f32 -1.442695, %v3291_v63  ;;  %v3288_v19 = vpop.f32.mrf.mxu1 }
 0xd83   :  { %4142 = vpow2.f32 %v3754_v33 }
 0xd84   :  { %v4141_v56 = vpop.eup %4140  ;;  %4144 = vpow2.f32 %v3755_v16 }
 0xd85   :  { %v3305_v48 = vadd.f32 1.0, %v4141_v56 }
 0xd86   :  { %v3249_v49 = vpop.f32.mrf.mxu2 }
 0xd87   :  { %v3262_v18 = vpop.f32.mrf.mxu3  ;;  %4146 = vrcp.f32 %v3305_v48  ;;  %v3347_v24 = vand.u32 2147483648, %v3305_v48  ;;  %vm3341_vm12 = vweird.f32 %v3305_v48  ;;  %v3345_v1 = vand.u32 2147483647, %v3305_v48 }
 0xd89   :  { %v4143_v57 = vpop.eup %4142  ;;  %v3348_v60 = vor.u32 1.1754944e-38, %v3347_v24  ;;  %vm3346_vm14 = vcmp.eq.f32.partialorder %v3345_v1, 8.507059e+37 }
 0xd8a   :  { %v4145_v35 = vpop.eup %4144  ;;  %v3303_v53 = vadd.f32 1.0, %v4143_v57 }
 0xd8b   :  { %v3304_v28 = vadd.f32 1.0, %v4145_v35 }
 0xd8c   :  { %4148 = vrcp.f32 %v3303_v53  ;;  %v3317_v23 = vand.u32 2147483648, %v3303_v53  ;;  %v3315_v52 = vand.u32 2147483647, %v3303_v53  ;;  %vm3311_vm5 = vweird.f32 %v3303_v53 }
 0xd8d   :  { %4150 = vrcp.f32 %v3304_v28  ;;  %v4147_v58 = vpop.eup %4146  ;;  %v3332_v13 = vand.u32 2147483648, %v3304_v28  ;;  %v3330_v31 = vand.u32 2147483647, %v3304_v28  ;;  %vm3326_vm7 = vweird.f32 %v3304_v28 }
 0xd8e   :  { %v3337_v9 = vmul.f32 %v4147_v58, %v3305_v48  ;;  %4152 = vtanh.f32 %v3293_v59  ;;  %v3318_v0 = vor.u32 1.1754944e-38, %v3317_v23  ;;  %vm3316_vm9 = vcmp.eq.f32.partialorder %v3315_v52, 8.507059e+37 }
 0xd8f   :  { %v3333_v20 = vor.u32 1.1754944e-38, %v3332_v13  ;;  %vm3331_vm10 = vcmp.eq.f32.partialorder %v3330_v31, 8.507059e+37  ;;  %vm3342_vm11 = vweird.f32 %v4147_v58 }
 0xd90   :  { %v3338_v15 = vsub.f32 1.0, %v3337_v9  ;;  %vm3343_vm13 = vmor %vm3341_vm12, %vm3342_vm11 }
 0xd92   :  { %v4149_v51 = vpop.eup %4148  ;;  %v3339_v50 = vmul.f32 %v4147_v58, %v3338_v15 }
 0xd93   :  { %v4151_v11 = vpop.eup %4150  ;;  %v3307_v6 = vmul.f32 %v4149_v51, %v3303_v53  ;;  %vm3312_vm3 = vweird.f32 %v4149_v51 }
 0xd94   :  { %v3322_v42 = vmul.f32 %v4151_v11, %v3304_v28  ;;  %vm3327_vm4 = vweird.f32 %v4151_v11  ;;  %vm3313_vm6 = vmor %vm3311_vm5, %vm3312_vm3  ;;  %v4153_v8 = vpop.eup %4152  ;;  %v3340_v17 = vadd.f32 %v4147_v58, %v3339_v50 }
 0xd95   :  { %v3308_v29 = vsub.f32 1.0, %v3307_v6  ;;  %vm3328_vm8 = vmor %vm3326_vm7, %vm3327_vm4 }
 0xd96   :  { %v3323_v55 = vsub.f32 1.0, %v3322_v42  ;;  %v3344_v30 = vsel %vm3343_vm13, %v4147_v58, %v3340_v17 }
 0xd97   :  { %v3309_v25 = vmul.f32 %v4149_v51, %v3308_v29  ;;  %v3349_v45 = vsel %vm3346_vm14, %v3348_v60, %v3344_v30 }
 0xd98   :  { %v3324_v27 = vmul.f32 %v4151_v11, %v3323_v55 }
 0xd99   :  { %v3310_v44 = vadd.f32 %v4149_v51, %v3309_v25 }
 0xd9a   :  { %v3325_v2 = vadd.f32 %v4151_v11, %v3324_v27 }
 0xd9b   :  { %v3314_v26 = vsel %vm3313_vm6, %v4149_v51, %v3310_v44 }
 0xd9c   :  { %v3319_v37 = vsel %vm3316_vm9, %v3318_v0, %v3314_v26  ;;  %v3329_v10 = vsel %vm3328_vm8, %v4151_v11, %v3325_v2 }
 0xd9d   :  { %v3334_v54 = vsel %vm3331_vm10, %v3333_v20, %v3329_v10  ;;  %v3353_v32 = vmul.f32 %v4153_v8, %v3319_v37 }
 0xd9e   :  { %v3352_v62 = vmul.f32 %v3334_v54, %v5825_v46 }
 0xda0   :  { %v3354_v7 = vadd.f32 %v3353_v32, %v3352_v62 }
 0xda2   :  { %4154 = vtanh.f32 %v3354_v7 }
 0xda8   :  { %v4155_v3 = vpop.eup %4154 }
 0xda9   :  { %v3356_v12 = vmul.f32 %v4155_v3, %v3349_v45 }
 0xdab   :  { %v3377_v4 = vmul.f32 %v5806_v43, %v3356_v12 }
 0xdad   :  { %3392 = vadd.xlane.f32.xlu0 %v3377_v4 }
 0xe20   :  { %v3393_v5 = vpop.xlane.xlu0 %3392 }
 0xe21   :  { %v3405_v46 = vadd.f32 %v5809_v34, %v3393_v5 }
 0xe23   :  { %3413 = vst.msk [vmem:[%s5860_s11 + $0x38] sm:$0xff] %vm445_vm0, %v3405_v46 }
 0xe24   :  { %3418 = vsyncpa [#allocation8], 1 }
 0xe25   :  { %3419 = vsyncpa [#allocation10], 1 }
 0xe26   :  { %3420 = vsyncpa [#allocation13], 1 }

</bundles_post_ra>
